<compile_context>
chip_gen: v5e
topology: v5e:2x2
jax: 0.10.0
libtpu: 0.0.40
codegen_flags: <defaults>
</compile_context>

<pallas_src>
import functools
import itertools
import math

import numpy as np
import jax
import jax.numpy as jnp
from jax import lax
from jax.experimental import pallas as pl
from jax.experimental.pallas import tpu as pltpu


def _fusion_attention_kernel(
    feats_ref, x_ref,
    wq_ref, bq_ref, wk_ref, bk_ref,
    sq_ref, bias1_ref,
    wv_ref, bv_ref,
    th2w_ref, th2b_ref,
    wp_ref, bp_ref,
    out_ref,
    *, num_heads, batch_tile, compute_dtype):
  cd = compute_dtype
  f32 = jnp.float32

  # Constant operands: load / cast once, hoisted out of the batch loop.
  wq = wq_ref[...].astype(cd)          # (C, nh_kd)
  wk = wk_ref[...].astype(cd)          # (C, nh_kd)
  wp = wp_ref[...].astype(cd)          # (dh, dim)
  bq = bq_ref[...]                     # (1, nh_kd)
  bk = bk_ref[...]                     # (1, nh_kd)
  bp = bp_ref[...]                     # (1, dim)

  for b in range(batch_tile):
    feats = feats_ref[b].astype(cd)    # (N, C)
    xin = x_ref[b].astype(cd)          # (N, C)

    q = jnp.dot(feats, wq, preferred_element_type=f32) + bq   # (N, nh_kd) f32
    k = jnp.dot(xin, wk, preferred_element_type=f32) + bk     # (N, nh_kd) f32
    k_c = k.astype(cd)

    # Logits with scale & talking_head1 folded in, then softmax.
    # Only this one stacked set of softmax planes stays live.
    s_heads = []
    for o in range(num_heads):
      qo = (q * sq_ref[o]).astype(cd)                         # (N, nh_kd)
      logits = lax.dot_general(qo, k_c, (((1,), (1,)), ((), ())),
                               preferred_element_type=f32)    # (N, N)
      logits = logits + bias1_ref[o].astype(f32)
      m = jnp.max(logits, axis=-1, keepdims=True)
      e = jnp.exp(logits - m)
      r = pl.reciprocal(jnp.sum(e, axis=-1, keepdims=True), approx=True)
      s_heads.append(e * r)                                   # (N, N) f32

    # talking_head2 mix + (attn @ v) + ReLU per output head; a single mixed
    # (N, N) plane is transient per head.
    head_outs = []
    for p in range(num_heads):
      a2 = th2w_ref[p, 0] * s_heads[0]
      for o in range(1, num_heads):
        a2 = a2 + th2w_ref[p, o] * s_heads[o]
      a2 = a2 + th2b_ref[p]
      v_p = jnp.dot(xin, wv_ref[p].astype(cd),
                    preferred_element_type=f32) + bv_ref[p]   # (N, d)
      oh = jnp.dot(a2.astype(cd), v_p.astype(cd),
                   preferred_element_type=f32)                # (N, d)
      head_outs.append(jnp.maximum(oh, 0.0))

    # ReLU'd heads concatenated along lanes -> one (N, dh)@(dh, dim) MXU pass.
    heads = jnp.concatenate(head_outs, axis=-1)               # (N, dh)
    out = jnp.dot(heads.astype(cd), wp, preferred_element_type=f32) + bp
    out_ref[b] = out.astype(out_ref.dtype)


def _const_spec(shape):
  zeros = (0,) * len(shape)
  return pl.BlockSpec(shape, lambda i, _z=zeros: _z)


def fusion_attention4d_nlc(x_nlc, feats_nlc, params, *, num_heads, key_dim,
                           attn_ratio, compute_dtype=jnp.float32,
                           batch_tile=None):
  """Core entry point on channel-last (B, N, C) activations."""
  B, N, C = x_nlc.shape
  d = int(attn_ratio * key_dim)
  dh = d * num_heads
  nh_kd = key_dim * num_heads
  dim = C
  scale = key_dim ** (-0.5)
  cd = compute_dtype

  if batch_tile is None:
    # fattest tile that divides B (<= 8); for small B the whole batch per step.
    batch_tile = next(t for t in range(min(B, 8), 0, -1) if B % t == 0)
  assert B % batch_tile == 0
  num_tiles = B // batch_tile

  # Fold scale + talking_head1 into a per-output-head lane scaling of q and a
  # precomputed bias:
  #   attn1[o] = (q * sq[o]) @ k^T + bias1[o]
  #   sq[o, h*kd + c] = scale * th1_w[o, h]
  #   bias1[o]        = sum_h th1_w[o, h] * ab[h] + th1_b[o]
  th1_w = params["th1_w"]
  th1_b = params["th1_b"]
  sq = (scale * jnp.repeat(th1_w, key_dim, axis=1)).reshape(num_heads, 1, nh_kd)
  bias1 = (jnp.einsum("oh,hnm->onm", th1_w, params["ab"])
           + th1_b[:, None, None]).astype(cd)

  # Head-blocked value projection weights (leading-axis indexing in-kernel,
  # no lane slicing); MXU-operand constants stored in compute_dtype.
  wq = params["wq"].astype(cd)
  wk = params["wk"].astype(cd)
  wp = params["wp"].astype(cd)
  wv_h = params["wv"].reshape(C, num_heads, d).transpose(1, 0, 2).astype(cd)
  bv_h = params["bv"].reshape(1, num_heads, d).transpose(1, 0, 2)   # (H, 1, d)

  kernel = functools.partial(_fusion_attention_kernel,
                             num_heads=num_heads, batch_tile=batch_tile,
                             compute_dtype=cd)

  smem_spec = pl.BlockSpec(memory_space=pltpu.MemorySpace.SMEM)

  out = pl.pallas_call(
      kernel,
      out_shape=jax.ShapeDtypeStruct((B, N, dim), jnp.float32),
      grid=(num_tiles,),
      in_specs=[
          pl.BlockSpec((batch_tile, N, C), lambda i: (i, 0, 0)),   # feats (q)
          pl.BlockSpec((batch_tile, N, C), lambda i: (i, 0, 0)),   # x (k, v)
          _const_spec((C, nh_kd)), _const_spec((1, nh_kd)),        # Wq, bq
          _const_spec((C, nh_kd)), _const_spec((1, nh_kd)),        # Wk, bk
          _const_spec((num_heads, 1, nh_kd)),                      # sq (scale*th1)
          _const_spec((num_heads, N, N)),                          # bias1
          _const_spec((num_heads, C, d)),                          # Wv (head-blocked)
          _const_spec((num_heads, 1, d)),                          # bv (head-blocked)
          smem_spec, smem_spec,                                    # th2 w / b
          _const_spec((dh, dim)), _const_spec((1, dim)),           # Wproj, bproj
      ],
      out_specs=pl.BlockSpec((batch_tile, N, dim), lambda i: (i, 0, 0)),
      compiler_params=pltpu.CompilerParams(
          dimension_semantics=("parallel",)),
  )(feats_nlc, x_nlc,
    wq, params["bq"], wk, params["bk"],
    sq, bias1, wv_h, bv_h,
    params["th2_w"], params["th2_b"],
    wp, params["bp"])
  return out


def fusion_attention4d(x_nchw, feats_nchw, params, *, num_heads, key_dim,
                       attn_ratio, compute_dtype=jnp.float32, batch_tile=None):
  """NCHW adapter around the (B, N, C) core (layout plumbing only)."""
  B, C, H, W = x_nchw.shape
  N = H * W
  x_n = jnp.transpose(x_nchw.reshape(B, C, N), (0, 2, 1))
  feats_n = jnp.transpose(feats_nchw.reshape(B, C, N), (0, 2, 1))
  out = fusion_attention4d_nlc(x_n, feats_n, params, num_heads=num_heads,
                               key_dim=key_dim, attn_ratio=attn_ratio,
                               compute_dtype=compute_dtype,
                               batch_tile=batch_tile)
  return jnp.transpose(out, (0, 2, 1)).reshape(B, C, H, W)


def make_params(key, *, dim, key_dim, num_heads, attn_ratio, resolution, eps=1e-5):
  """Deterministic synthetic parameters; conv+BN (eval mode) are folded."""
  nh_kd = key_dim * num_heads
  d = int(attn_ratio * key_dim)
  dh = d * num_heads
  N = resolution ** 2
  keys = iter(jax.random.split(key, 40))

  def fold_conv_bn(c_in, c_out):
    w = jax.random.normal(next(keys), (c_out, c_in), jnp.float32) / math.sqrt(c_in)
    b = 0.05 * jax.random.normal(next(keys), (c_out,), jnp.float32)
    gamma = 1.0 + 0.1 * jax.random.normal(next(keys), (c_out,), jnp.float32)
    beta = 0.1 * jax.random.normal(next(keys), (c_out,), jnp.float32)
    mean = 0.1 * jax.random.normal(next(keys), (c_out,), jnp.float32)
    var = 0.5 + jnp.abs(jax.random.normal(next(keys), (c_out,), jnp.float32)) * 0.5
    s = gamma / jnp.sqrt(var + eps)
    w_eff = (w * s[:, None]).T                    # (c_in, c_out)
    b_eff = ((b - mean) * s + beta).reshape(1, c_out)
    return w_eff, b_eff

  wq, bq = fold_conv_bn(dim, nh_kd)
  wk, bk = fold_conv_bn(dim, nh_kd)
  wv, bv = fold_conv_bn(dim, dh)
  wp, bp = fold_conv_bn(dh, dim)

  th1_w = jax.random.normal(next(keys), (num_heads, num_heads), jnp.float32) / math.sqrt(num_heads)
  th1_b = 0.02 * jax.random.normal(next(keys), (num_heads,), jnp.float32)
  th2_w = jax.random.normal(next(keys), (num_heads, num_heads), jnp.float32) / math.sqrt(num_heads)
  th2_b = 0.02 * jax.random.normal(next(keys), (num_heads,), jnp.float32)

  # relative-position attention bias table + index map (same as the module)
  points = list(itertools.product(range(resolution), range(resolution)))
  attention_offsets, idxs = {}, []
  for p1 in points:
    for p2 in points:
      off = (abs(p1[0] - p2[0]), abs(p1[1] - p2[1]))
      if off not in attention_offsets:
        attention_offsets[off] = len(attention_offsets)
      idxs.append(attention_offsets[off])
  idxs = np.asarray(idxs, dtype=np.int32).reshape(N, N)
  # module initialises attention_biases to zeros; use small deterministic
  # non-zero values so the bias path is exercised.
  attention_biases = 0.02 * jax.random.normal(
      next(keys), (num_heads, len(attention_offsets)), jnp.float32)
  ab = attention_biases[:, idxs]                  # (num_heads, N, N)

  return dict(wq=wq, bq=bq, wk=wk, bk=bk, wv=wv, bv=bv,
              wp=wp, bp=bp, th1_w=th1_w, th1_b=th1_b,
              th2_w=th2_w, th2_b=th2_b, ab=ab)


def reference(x_nchw, feats_nchw, p, *, num_heads, key_dim, attn_ratio):
  """Pure-JAX reference matching the PyTorch forward (stride=None, eval BN)."""
  B, C, H, W = x_nchw.shape
  N = H * W
  d = int(attn_ratio * key_dim)
  scale = key_dim ** (-0.5)
  x_n = jnp.transpose(x_nchw.reshape(B, C, N), (0, 2, 1))
  feats_n = jnp.transpose(feats_nchw.reshape(B, C, N), (0, 2, 1))

  q = feats_n @ p["wq"] + p["bq"]
  k = x_n @ p["wk"] + p["bk"]
  v = x_n @ p["wv"] + p["bv"]
  qh = q.reshape(B, N, num_heads, key_dim).transpose(0, 2, 1, 3)
  kh = k.reshape(B, N, num_heads, key_dim).transpose(0, 2, 1, 3)
  vh = v.reshape(B, N, num_heads, d).transpose(0, 2, 1, 3)

  attn = jnp.einsum("bhnk,bhmk->bhnm", qh, kh) * scale + p["ab"][None]
  attn = jnp.einsum("oh,bhnm->bonm", p["th1_w"], attn) + p["th1_b"][None, :, None, None]
  attn = jax.nn.softmax(attn, axis=-1)
  attn = jnp.einsum("oh,bhnm->bonm", p["th2_w"], attn) + p["th2_b"][None, :, None, None]
  o = jnp.einsum("bhnm,bhmd->bhnd", attn, vh)
  o = o.transpose(0, 2, 1, 3).reshape(B, N, num_heads * d)
  o = jnp.maximum(o, 0.0)
  out = o @ p["wp"] + p["bp"]
  return jnp.transpose(out, (0, 2, 1)).reshape(B, C, H, W)


if __name__ == "__main__":
  # small config consistent with the module's constructor
  B, dim, key_dim, num_heads, attn_ratio, resolution = 2, 32, 8, 4, 4, 7

  key = jax.random.PRNGKey(0)
  kx, kf, kp = jax.random.split(key, 3)
  x = jax.random.normal(kx, (B, dim, resolution, resolution), jnp.float32)
  feats = jax.random.normal(kf, (B, dim, resolution, resolution), jnp.float32)
  params = make_params(kp, dim=dim, key_dim=key_dim, num_heads=num_heads,
                       attn_ratio=attn_ratio, resolution=resolution)

  ref = jax.block_until_ready(
      reference(x, feats, params, num_heads=num_heads,
                key_dim=key_dim, attn_ratio=attn_ratio))

  # f32 MXU operands: strict check against the pure-JAX reference.
  out = jax.block_until_ready(
      fusion_attention4d(x, feats, params, num_heads=num_heads,
                         key_dim=key_dim, attn_ratio=attn_ratio,
                         compute_dtype=jnp.float32))
  np.testing.assert_allclose(np.asarray(out), np.asarray(ref),
                             rtol=1e-2, atol=1e-2)

  # bf16 MXU operands with f32 accumulation (v6e/v7x fast path): exercise the
  # plumbed path and sanity-check it stays close to the f32 reference.
  out_bf16 = jax.block_until_ready(
      fusion_attention4d(x, feats, params, num_heads=num_heads,
                         key_dim=key_dim, attn_ratio=attn_ratio,
                         compute_dtype=jnp.bfloat16))
  max_err = float(jnp.max(jnp.abs(out_bf16.astype(jnp.float32) - ref)))
  assert np.isfinite(max_err) and max_err < 0.1, f"bf16 path drifted: {max_err}"

  print("KERNEL_OK")
</pallas_src>

<mosaic_0001>
module attributes {stable_mosaic.version = 11 : i64} {
  func.func @_fusion_attention_kernel(%arg0: i32, %arg1: memref<2x49x32xf32, #tpu.memory_space<vmem>>, %arg2: memref<2x49x32xf32, #tpu.memory_space<vmem>>, %arg3: memref<32x32xf32, #tpu.memory_space<vmem>>, %arg4: memref<1x32xf32, #tpu.memory_space<vmem>>, %arg5: memref<32x32xf32, #tpu.memory_space<vmem>>, %arg6: memref<1x32xf32, #tpu.memory_space<vmem>>, %arg7: memref<4x1x32xf32, #tpu.memory_space<vmem>>, %arg8: memref<4x49x49xf32, #tpu.memory_space<vmem>>, %arg9: memref<4x32x32xf32, #tpu.memory_space<vmem>>, %arg10: memref<4x1x32xf32, #tpu.memory_space<vmem>>, %arg11: memref<4x4xf32, #tpu.memory_space<smem>>, %arg12: memref<4xf32, #tpu.memory_space<smem>>, %arg13: memref<128x32xf32, #tpu.memory_space<vmem>>, %arg14: memref<1x32xf32, #tpu.memory_space<vmem>>, %arg15: memref<2x49x32xf32, #tpu.memory_space<vmem>>) attributes {dimension_semantics = [#tpu.dimension_semantics<parallel>], iteration_bounds = array<i64: 1>, scalar_prefetch = 0 : i64, scratch_operands = 0 : i64, tpu.core_type = #tpu.core_type<tc>, window_params = [{transform_indices = @transform_0, window_bounds = array<i64: 2, 49, 32>}, {transform_indices = @transform_1, window_bounds = array<i64: 2, 49, 32>}, {pipeline_mode = #tpu.pipeline_mode<synchronous>, transform_indices = @transform_2, window_bounds = array<i64: 32, 32>}, {pipeline_mode = #tpu.pipeline_mode<synchronous>, transform_indices = @transform_3, window_bounds = array<i64: 1, 32>}, {pipeline_mode = #tpu.pipeline_mode<synchronous>, transform_indices = @transform_4, window_bounds = array<i64: 32, 32>}, {pipeline_mode = #tpu.pipeline_mode<synchronous>, transform_indices = @transform_5, window_bounds = array<i64: 1, 32>}, {pipeline_mode = #tpu.pipeline_mode<synchronous>, transform_indices = @transform_6, window_bounds = array<i64: 4, 1, 32>}, {pipeline_mode = #tpu.pipeline_mode<synchronous>, transform_indices = @transform_7, window_bounds = array<i64: 4, 49, 49>}, {pipeline_mode = #tpu.pipeline_mode<synchronous>, transform_indices = @transform_8, window_bounds = array<i64: 4, 32, 32>}, {pipeline_mode = #tpu.pipeline_mode<synchronous>, transform_indices = @transform_9, window_bounds = array<i64: 4, 1, 32>}, {transform_indices = @transform_10, window_bounds = array<i64: 4, 4>}, {transform_indices = @transform_11, window_bounds = array<i64: 4>}, {pipeline_mode = #tpu.pipeline_mode<synchronous>, transform_indices = @transform_12, window_bounds = array<i64: 128, 32>}, {pipeline_mode = #tpu.pipeline_mode<synchronous>, transform_indices = @transform_13, window_bounds = array<i64: 1, 32>}, {transform_indices = @transform_14, window_bounds = array<i64: 2, 49, 32>}]} {
    %c0 = arith.constant 0 : index
    %c0_0 = arith.constant 0 : index
    %0 = vector.load %arg3[%c0, %c0_0] : memref<32x32xf32, #tpu.memory_space<vmem>>, vector<32x32xf32>
    %c0_1 = arith.constant 0 : index
    %c0_2 = arith.constant 0 : index
    %1 = vector.load %arg5[%c0_1, %c0_2] : memref<32x32xf32, #tpu.memory_space<vmem>>, vector<32x32xf32>
    %c0_3 = arith.constant 0 : index
    %c0_4 = arith.constant 0 : index
    %2 = vector.load %arg13[%c0_3, %c0_4] : memref<128x32xf32, #tpu.memory_space<vmem>>, vector<128x32xf32>
    %c0_5 = arith.constant 0 : index
    %c0_6 = arith.constant 0 : index
    %3 = vector.load %arg4[%c0_5, %c0_6] : memref<1x32xf32, #tpu.memory_space<vmem>>, vector<1x32xf32>
    %c0_7 = arith.constant 0 : index
    %c0_8 = arith.constant 0 : index
    %4 = vector.load %arg6[%c0_7, %c0_8] : memref<1x32xf32, #tpu.memory_space<vmem>>, vector<1x32xf32>
    %c0_9 = arith.constant 0 : index
    %c0_10 = arith.constant 0 : index
    %5 = vector.load %arg14[%c0_9, %c0_10] : memref<1x32xf32, #tpu.memory_space<vmem>>, vector<1x32xf32>
    %c0_11 = arith.constant 0 : index
    %c0_12 = arith.constant 0 : index
    %c0_13 = arith.constant 0 : index
    %6 = vector.load %arg1[%c0_11, %c0_12, %c0_13] : memref<2x49x32xf32, #tpu.memory_space<vmem>>, vector<1x49x32xf32>
    %7 = vector.shape_cast %6 : vector<1x49x32xf32> to vector<49x32xf32>
    %c0_14 = arith.constant 0 : index
    %c0_15 = arith.constant 0 : index
    %c0_16 = arith.constant 0 : index
    %8 = vector.load %arg2[%c0_14, %c0_15, %c0_16] : memref<2x49x32xf32, #tpu.memory_space<vmem>>, vector<1x49x32xf32>
    %9 = vector.shape_cast %8 : vector<1x49x32xf32> to vector<49x32xf32>
    %cst = arith.constant dense<0.000000e+00> : vector<49x32xf32>
    %10 = tpu.matmul %7, %0, %cst {dimension_numbers = #tpu.dot_dimension_numbers<[1], [0], [0], [1], [0, 0, 1, 1], [], []>} : vector<49x32xf32>, vector<32x32xf32>, vector<49x32xf32> -> vector<49x32xf32>
    %11 = vector.broadcast %3 : vector<1x32xf32> to vector<49x32xf32>
    %12 = arith.addf %10, %11 : vector<49x32xf32>
    %cst_17 = arith.constant dense<0.000000e+00> : vector<49x32xf32>
    %13 = tpu.matmul %9, %1, %cst_17 {dimension_numbers = #tpu.dot_dimension_numbers<[1], [0], [0], [1], [0, 0, 1, 1], [], []>} : vector<49x32xf32>, vector<32x32xf32>, vector<49x32xf32> -> vector<49x32xf32>
    %14 = vector.broadcast %4 : vector<1x32xf32> to vector<49x32xf32>
    %15 = arith.addf %13, %14 : vector<49x32xf32>
    %c0_18 = arith.constant 0 : index
    %c0_19 = arith.constant 0 : index
    %c0_20 = arith.constant 0 : index
    %16 = vector.load %arg7[%c0_18, %c0_19, %c0_20] : memref<4x1x32xf32, #tpu.memory_space<vmem>>, vector<1x1x32xf32>
    %17 = vector.shape_cast %16 : vector<1x1x32xf32> to vector<1x32xf32>
    %18 = vector.broadcast %17 : vector<1x32xf32> to vector<49x32xf32>
    %19 = arith.mulf %12, %18 : vector<49x32xf32>
    %cst_21 = arith.constant dense<0.000000e+00> : vector<49x49xf32>
    %20 = tpu.matmul %19, %15, %cst_21 {dimension_numbers = #tpu.dot_dimension_numbers<[1], [1], [0], [0], [0, 0, 1, 0], [], []>} : vector<49x32xf32>, vector<49x32xf32>, vector<49x49xf32> -> vector<49x49xf32>
    %c0_22 = arith.constant 0 : index
    %c0_23 = arith.constant 0 : index
    %c0_24 = arith.constant 0 : index
    %21 = vector.load %arg8[%c0_22, %c0_23, %c0_24] : memref<4x49x49xf32, #tpu.memory_space<vmem>>, vector<1x49x49xf32>
    %22 = vector.shape_cast %21 : vector<1x49x49xf32> to vector<49x49xf32>
    %23 = arith.addf %20, %22 : vector<49x49xf32>
    %cst_25 = arith.constant dense<0xFF800000> : vector<49xf32>
    %24 = vector.multi_reduction <maximumf>, %23, %cst_25 [1] : vector<49x49xf32> to vector<49xf32>
    %25 = vector.shape_cast %24 : vector<49xf32> to vector<49x1xf32>
    %26 = vector.broadcast %25 : vector<49x1xf32> to vector<49x49xf32>
    %27 = arith.subf %23, %26 : vector<49x49xf32>
    %28 = math.exp %27 : vector<49x49xf32>
    %cst_26 = arith.constant dense<0.000000e+00> : vector<49xf32>
    %29 = vector.multi_reduction <add>, %28, %cst_26 [1] : vector<49x49xf32> to vector<49xf32>
    %30 = vector.shape_cast %29 : vector<49xf32> to vector<49x1xf32>
    %31 = tpu.reciprocal %30 {approx = true} : vector<49x1xf32> -> vector<49x1xf32>
    %32 = vector.broadcast %31 : vector<49x1xf32> to vector<49x49xf32>
    %33 = arith.mulf %28, %32 : vector<49x49xf32>
    %c1 = arith.constant 1 : index
    %c0_27 = arith.constant 0 : index
    %c0_28 = arith.constant 0 : index
    %34 = vector.load %arg7[%c1, %c0_27, %c0_28] : memref<4x1x32xf32, #tpu.memory_space<vmem>>, vector<1x1x32xf32>
    %35 = vector.shape_cast %34 : vector<1x1x32xf32> to vector<1x32xf32>
    %36 = vector.broadcast %35 : vector<1x32xf32> to vector<49x32xf32>
    %37 = arith.mulf %12, %36 : vector<49x32xf32>
    %cst_29 = arith.constant dense<0.000000e+00> : vector<49x49xf32>
    %38 = tpu.matmul %37, %15, %cst_29 {dimension_numbers = #tpu.dot_dimension_numbers<[1], [1], [0], [0], [0, 0, 1, 0], [], []>} : vector<49x32xf32>, vector<49x32xf32>, vector<49x49xf32> -> vector<49x49xf32>
    %c1_30 = arith.constant 1 : index
    %c0_31 = arith.constant 0 : index
    %c0_32 = arith.constant 0 : index
    %39 = vector.load %arg8[%c1_30, %c0_31, %c0_32] : memref<4x49x49xf32, #tpu.memory_space<vmem>>, vector<1x49x49xf32>
    %40 = vector.shape_cast %39 : vector<1x49x49xf32> to vector<49x49xf32>
    %41 = arith.addf %38, %40 : vector<49x49xf32>
    %cst_33 = arith.constant dense<0xFF800000> : vector<49xf32>
    %42 = vector.multi_reduction <maximumf>, %41, %cst_33 [1] : vector<49x49xf32> to vector<49xf32>
    %43 = vector.shape_cast %42 : vector<49xf32> to vector<49x1xf32>
    %44 = vector.broadcast %43 : vector<49x1xf32> to vector<49x49xf32>
    %45 = arith.subf %41, %44 : vector<49x49xf32>
    %46 = math.exp %45 : vector<49x49xf32>
    %cst_34 = arith.constant dense<0.000000e+00> : vector<49xf32>
    %47 = vector.multi_reduction <add>, %46, %cst_34 [1] : vector<49x49xf32> to vector<49xf32>
    %48 = vector.shape_cast %47 : vector<49xf32> to vector<49x1xf32>
    %49 = tpu.reciprocal %48 {approx = true} : vector<49x1xf32> -> vector<49x1xf32>
    %50 = vector.broadcast %49 : vector<49x1xf32> to vector<49x49xf32>
    %51 = arith.mulf %46, %50 : vector<49x49xf32>
    %c2 = arith.constant 2 : index
    %c0_35 = arith.constant 0 : index
    %c0_36 = arith.constant 0 : index
    %52 = vector.load %arg7[%c2, %c0_35, %c0_36] : memref<4x1x32xf32, #tpu.memory_space<vmem>>, vector<1x1x32xf32>
    %53 = vector.shape_cast %52 : vector<1x1x32xf32> to vector<1x32xf32>
    %54 = vector.broadcast %53 : vector<1x32xf32> to vector<49x32xf32>
    %55 = arith.mulf %12, %54 : vector<49x32xf32>
    %cst_37 = arith.constant dense<0.000000e+00> : vector<49x49xf32>
    %56 = tpu.matmul %55, %15, %cst_37 {dimension_numbers = #tpu.dot_dimension_numbers<[1], [1], [0], [0], [0, 0, 1, 0], [], []>} : vector<49x32xf32>, vector<49x32xf32>, vector<49x49xf32> -> vector<49x49xf32>
    %c2_38 = arith.constant 2 : index
    %c0_39 = arith.constant 0 : index
    %c0_40 = arith.constant 0 : index
    %57 = vector.load %arg8[%c2_38, %c0_39, %c0_40] : memref<4x49x49xf32, #tpu.memory_space<vmem>>, vector<1x49x49xf32>
    %58 = vector.shape_cast %57 : vector<1x49x49xf32> to vector<49x49xf32>
    %59 = arith.addf %56, %58 : vector<49x49xf32>
    %cst_41 = arith.constant dense<0xFF800000> : vector<49xf32>
    %60 = vector.multi_reduction <maximumf>, %59, %cst_41 [1] : vector<49x49xf32> to vector<49xf32>
    %61 = vector.shape_cast %60 : vector<49xf32> to vector<49x1xf32>
    %62 = vector.broadcast %61 : vector<49x1xf32> to vector<49x49xf32>
    %63 = arith.subf %59, %62 : vector<49x49xf32>
    %64 = math.exp %63 : vector<49x49xf32>
    %cst_42 = arith.constant dense<0.000000e+00> : vector<49xf32>
    %65 = vector.multi_reduction <add>, %64, %cst_42 [1] : vector<49x49xf32> to vector<49xf32>
    %66 = vector.shape_cast %65 : vector<49xf32> to vector<49x1xf32>
    %67 = tpu.reciprocal %66 {approx = true} : vector<49x1xf32> -> vector<49x1xf32>
    %68 = vector.broadcast %67 : vector<49x1xf32> to vector<49x49xf32>
    %69 = arith.mulf %64, %68 : vector<49x49xf32>
    %c3 = arith.constant 3 : index
    %c0_43 = arith.constant 0 : index
    %c0_44 = arith.constant 0 : index
    %70 = vector.load %arg7[%c3, %c0_43, %c0_44] : memref<4x1x32xf32, #tpu.memory_space<vmem>>, vector<1x1x32xf32>
    %71 = vector.shape_cast %70 : vector<1x1x32xf32> to vector<1x32xf32>
    %72 = vector.broadcast %71 : vector<1x32xf32> to vector<49x32xf32>
    %73 = arith.mulf %12, %72 : vector<49x32xf32>
    %cst_45 = arith.constant dense<0.000000e+00> : vector<49x49xf32>
    %74 = tpu.matmul %73, %15, %cst_45 {dimension_numbers = #tpu.dot_dimension_numbers<[1], [1], [0], [0], [0, 0, 1, 0], [], []>} : vector<49x32xf32>, vector<49x32xf32>, vector<49x49xf32> -> vector<49x49xf32>
    %c3_46 = arith.constant 3 : index
    %c0_47 = arith.constant 0 : index
    %c0_48 = arith.constant 0 : index
    %75 = vector.load %arg8[%c3_46, %c0_47, %c0_48] : memref<4x49x49xf32, #tpu.memory_space<vmem>>, vector<1x49x49xf32>
    %76 = vector.shape_cast %75 : vector<1x49x49xf32> to vector<49x49xf32>
    %77 = arith.addf %74, %76 : vector<49x49xf32>
    %cst_49 = arith.constant dense<0xFF800000> : vector<49xf32>
    %78 = vector.multi_reduction <maximumf>, %77, %cst_49 [1] : vector<49x49xf32> to vector<49xf32>
    %79 = vector.shape_cast %78 : vector<49xf32> to vector<49x1xf32>
    %80 = vector.broadcast %79 : vector<49x1xf32> to vector<49x49xf32>
    %81 = arith.subf %77, %80 : vector<49x49xf32>
    %82 = math.exp %81 : vector<49x49xf32>
    %cst_50 = arith.constant dense<0.000000e+00> : vector<49xf32>
    %83 = vector.multi_reduction <add>, %82, %cst_50 [1] : vector<49x49xf32> to vector<49xf32>
    %84 = vector.shape_cast %83 : vector<49xf32> to vector<49x1xf32>
    %85 = tpu.reciprocal %84 {approx = true} : vector<49x1xf32> -> vector<49x1xf32>
    %86 = vector.broadcast %85 : vector<49x1xf32> to vector<49x49xf32>
    %87 = arith.mulf %82, %86 : vector<49x49xf32>
    %c0_51 = arith.constant 0 : index
    %c0_52 = arith.constant 0 : index
    %88 = memref.load %arg11[%c0_51, %c0_52] : memref<4x4xf32, #tpu.memory_space<smem>>
    %89 = vector.broadcast %88 : f32 to vector<49x49xf32>
    %90 = arith.mulf %89, %33 : vector<49x49xf32>
    %c0_53 = arith.constant 0 : index
    %c1_54 = arith.constant 1 : index
    %91 = memref.load %arg11[%c0_53, %c1_54] : memref<4x4xf32, #tpu.memory_space<smem>>
    %92 = vector.broadcast %91 : f32 to vector<49x49xf32>
    %93 = arith.mulf %92, %51 : vector<49x49xf32>
    %94 = arith.addf %90, %93 : vector<49x49xf32>
    %c0_55 = arith.constant 0 : index
    %c2_56 = arith.constant 2 : index
    %95 = memref.load %arg11[%c0_55, %c2_56] : memref<4x4xf32, #tpu.memory_space<smem>>
    %96 = vector.broadcast %95 : f32 to vector<49x49xf32>
    %97 = arith.mulf %96, %69 : vector<49x49xf32>
    %98 = arith.addf %94, %97 : vector<49x49xf32>
    %c0_57 = arith.constant 0 : index
    %c3_58 = arith.constant 3 : index
    %99 = memref.load %arg11[%c0_57, %c3_58] : memref<4x4xf32, #tpu.memory_space<smem>>
    %100 = vector.broadcast %99 : f32 to vector<49x49xf32>
    %101 = arith.mulf %100, %87 : vector<49x49xf32>
    %102 = arith.addf %98, %101 : vector<49x49xf32>
    %c0_59 = arith.constant 0 : index
    %103 = memref.load %arg12[%c0_59] : memref<4xf32, #tpu.memory_space<smem>>
    %104 = vector.broadcast %103 : f32 to vector<49x49xf32>
    %105 = arith.addf %102, %104 : vector<49x49xf32>
    %c0_60 = arith.constant 0 : index
    %c0_61 = arith.constant 0 : index
    %c0_62 = arith.constant 0 : index
    %106 = vector.load %arg9[%c0_60, %c0_61, %c0_62] : memref<4x32x32xf32, #tpu.memory_space<vmem>>, vector<1x32x32xf32>
    %107 = vector.shape_cast %106 : vector<1x32x32xf32> to vector<32x32xf32>
    %cst_63 = arith.constant dense<0.000000e+00> : vector<49x32xf32>
    %108 = tpu.matmul %9, %107, %cst_63 {dimension_numbers = #tpu.dot_dimension_numbers<[1], [0], [0], [1], [0, 0, 1, 1], [], []>} : vector<49x32xf32>, vector<32x32xf32>, vector<49x32xf32> -> vector<49x32xf32>
    %c0_64 = arith.constant 0 : index
    %c0_65 = arith.constant 0 : index
    %c0_66 = arith.constant 0 : index
    %109 = vector.load %arg10[%c0_64, %c0_65, %c0_66] : memref<4x1x32xf32, #tpu.memory_space<vmem>>, vector<1x1x32xf32>
    %110 = vector.shape_cast %109 : vector<1x1x32xf32> to vector<1x32xf32>
    %111 = vector.broadcast %110 : vector<1x32xf32> to vector<49x32xf32>
    %112 = arith.addf %108, %111 : vector<49x32xf32>
    %cst_67 = arith.constant dense<0.000000e+00> : vector<49x32xf32>
    %113 = tpu.matmul %105, %112, %cst_67 {dimension_numbers = #tpu.dot_dimension_numbers<[1], [0], [0], [1], [0, 0, 1, 1], [], []>} : vector<49x49xf32>, vector<49x32xf32>, vector<49x32xf32> -> vector<49x32xf32>
    %cst_68 = arith.constant 0.000000e+00 : f32
    %114 = vector.broadcast %cst_68 : f32 to vector<49x32xf32>
    %115 = arith.maximumf %113, %114 : vector<49x32xf32>
    %c1_69 = arith.constant 1 : index
    %c0_70 = arith.constant 0 : index
    %116 = memref.load %arg11[%c1_69, %c0_70] : memref<4x4xf32, #tpu.memory_space<smem>>
    %117 = vector.broadcast %116 : f32 to vector<49x49xf32>
    %118 = arith.mulf %117, %33 : vector<49x49xf32>
    %c1_71 = arith.constant 1 : index
    %c1_72 = arith.constant 1 : index
    %119 = memref.load %arg11[%c1_71, %c1_72] : memref<4x4xf32, #tpu.memory_space<smem>>
    %120 = vector.broadcast %119 : f32 to vector<49x49xf32>
    %121 = arith.mulf %120, %51 : vector<49x49xf32>
    %122 = arith.addf %118, %121 : vector<49x49xf32>
    %c1_73 = arith.constant 1 : index
    %c2_74 = arith.constant 2 : index
    %123 = memref.load %arg11[%c1_73, %c2_74] : memref<4x4xf32, #tpu.memory_space<smem>>
    %124 = vector.broadcast %123 : f32 to vector<49x49xf32>
    %125 = arith.mulf %124, %69 : vector<49x49xf32>
    %126 = arith.addf %122, %125 : vector<49x49xf32>
    %c1_75 = arith.constant 1 : index
    %c3_76 = arith.constant 3 : index
    %127 = memref.load %arg11[%c1_75, %c3_76] : memref<4x4xf32, #tpu.memory_space<smem>>
    %128 = vector.broadcast %127 : f32 to vector<49x49xf32>
    %129 = arith.mulf %128, %87 : vector<49x49xf32>
    %130 = arith.addf %126, %129 : vector<49x49xf32>
    %c1_77 = arith.constant 1 : index
    %131 = memref.load %arg12[%c1_77] : memref<4xf32, #tpu.memory_space<smem>>
    %132 = vector.broadcast %131 : f32 to vector<49x49xf32>
    %133 = arith.addf %130, %132 : vector<49x49xf32>
    %c1_78 = arith.constant 1 : index
    %c0_79 = arith.constant 0 : index
    %c0_80 = arith.constant 0 : index
    %134 = vector.load %arg9[%c1_78, %c0_79, %c0_80] : memref<4x32x32xf32, #tpu.memory_space<vmem>>, vector<1x32x32xf32>
    %135 = vector.shape_cast %134 : vector<1x32x32xf32> to vector<32x32xf32>
    %cst_81 = arith.constant dense<0.000000e+00> : vector<49x32xf32>
    %136 = tpu.matmul %9, %135, %cst_81 {dimension_numbers = #tpu.dot_dimension_numbers<[1], [0], [0], [1], [0, 0, 1, 1], [], []>} : vector<49x32xf32>, vector<32x32xf32>, vector<49x32xf32> -> vector<49x32xf32>
    %c1_82 = arith.constant 1 : index
    %c0_83 = arith.constant 0 : index
    %c0_84 = arith.constant 0 : index
    %137 = vector.load %arg10[%c1_82, %c0_83, %c0_84] : memref<4x1x32xf32, #tpu.memory_space<vmem>>, vector<1x1x32xf32>
    %138 = vector.shape_cast %137 : vector<1x1x32xf32> to vector<1x32xf32>
    %139 = vector.broadcast %138 : vector<1x32xf32> to vector<49x32xf32>
    %140 = arith.addf %136, %139 : vector<49x32xf32>
    %cst_85 = arith.constant dense<0.000000e+00> : vector<49x32xf32>
    %141 = tpu.matmul %133, %140, %cst_85 {dimension_numbers = #tpu.dot_dimension_numbers<[1], [0], [0], [1], [0, 0, 1, 1], [], []>} : vector<49x49xf32>, vector<49x32xf32>, vector<49x32xf32> -> vector<49x32xf32>
    %cst_86 = arith.constant 0.000000e+00 : f32
    %142 = vector.broadcast %cst_86 : f32 to vector<49x32xf32>
    %143 = arith.maximumf %141, %142 : vector<49x32xf32>
    %c2_87 = arith.constant 2 : index
    %c0_88 = arith.constant 0 : index
    %144 = memref.load %arg11[%c2_87, %c0_88] : memref<4x4xf32, #tpu.memory_space<smem>>
    %145 = vector.broadcast %144 : f32 to vector<49x49xf32>
    %146 = arith.mulf %145, %33 : vector<49x49xf32>
    %c2_89 = arith.constant 2 : index
    %c1_90 = arith.constant 1 : index
    %147 = memref.load %arg11[%c2_89, %c1_90] : memref<4x4xf32, #tpu.memory_space<smem>>
    %148 = vector.broadcast %147 : f32 to vector<49x49xf32>
    %149 = arith.mulf %148, %51 : vector<49x49xf32>
    %150 = arith.addf %146, %149 : vector<49x49xf32>
    %c2_91 = arith.constant 2 : index
    %c2_92 = arith.constant 2 : index
    %151 = memref.load %arg11[%c2_91, %c2_92] : memref<4x4xf32, #tpu.memory_space<smem>>
    %152 = vector.broadcast %151 : f32 to vector<49x49xf32>
    %153 = arith.mulf %152, %69 : vector<49x49xf32>
    %154 = arith.addf %150, %153 : vector<49x49xf32>
    %c2_93 = arith.constant 2 : index
    %c3_94 = arith.constant 3 : index
    %155 = memref.load %arg11[%c2_93, %c3_94] : memref<4x4xf32, #tpu.memory_space<smem>>
    %156 = vector.broadcast %155 : f32 to vector<49x49xf32>
    %157 = arith.mulf %156, %87 : vector<49x49xf32>
    %158 = arith.addf %154, %157 : vector<49x49xf32>
    %c2_95 = arith.constant 2 : index
    %159 = memref.load %arg12[%c2_95] : memref<4xf32, #tpu.memory_space<smem>>
    %160 = vector.broadcast %159 : f32 to vector<49x49xf32>
    %161 = arith.addf %158, %160 : vector<49x49xf32>
    %c2_96 = arith.constant 2 : index
    %c0_97 = arith.constant 0 : index
    %c0_98 = arith.constant 0 : index
    %162 = vector.load %arg9[%c2_96, %c0_97, %c0_98] : memref<4x32x32xf32, #tpu.memory_space<vmem>>, vector<1x32x32xf32>
    %163 = vector.shape_cast %162 : vector<1x32x32xf32> to vector<32x32xf32>
    %cst_99 = arith.constant dense<0.000000e+00> : vector<49x32xf32>
    %164 = tpu.matmul %9, %163, %cst_99 {dimension_numbers = #tpu.dot_dimension_numbers<[1], [0], [0], [1], [0, 0, 1, 1], [], []>} : vector<49x32xf32>, vector<32x32xf32>, vector<49x32xf32> -> vector<49x32xf32>
    %c2_100 = arith.constant 2 : index
    %c0_101 = arith.constant 0 : index
    %c0_102 = arith.constant 0 : index
    %165 = vector.load %arg10[%c2_100, %c0_101, %c0_102] : memref<4x1x32xf32, #tpu.memory_space<vmem>>, vector<1x1x32xf32>
    %166 = vector.shape_cast %165 : vector<1x1x32xf32> to vector<1x32xf32>
    %167 = vector.broadcast %166 : vector<1x32xf32> to vector<49x32xf32>
    %168 = arith.addf %164, %167 : vector<49x32xf32>
    %cst_103 = arith.constant dense<0.000000e+00> : vector<49x32xf32>
    %169 = tpu.matmul %161, %168, %cst_103 {dimension_numbers = #tpu.dot_dimension_numbers<[1], [0], [0], [1], [0, 0, 1, 1], [], []>} : vector<49x49xf32>, vector<49x32xf32>, vector<49x32xf32> -> vector<49x32xf32>
    %cst_104 = arith.constant 0.000000e+00 : f32
    %170 = vector.broadcast %cst_104 : f32 to vector<49x32xf32>
    %171 = arith.maximumf %169, %170 : vector<49x32xf32>
    %c3_105 = arith.constant 3 : index
    %c0_106 = arith.constant 0 : index
    %172 = memref.load %arg11[%c3_105, %c0_106] : memref<4x4xf32, #tpu.memory_space<smem>>
    %173 = vector.broadcast %172 : f32 to vector<49x49xf32>
    %174 = arith.mulf %173, %33 : vector<49x49xf32>
    %c3_107 = arith.constant 3 : index
    %c1_108 = arith.constant 1 : index
    %175 = memref.load %arg11[%c3_107, %c1_108] : memref<4x4xf32, #tpu.memory_space<smem>>
    %176 = vector.broadcast %175 : f32 to vector<49x49xf32>
    %177 = arith.mulf %176, %51 : vector<49x49xf32>
    %178 = arith.addf %174, %177 : vector<49x49xf32>
    %c3_109 = arith.constant 3 : index
    %c2_110 = arith.constant 2 : index
    %179 = memref.load %arg11[%c3_109, %c2_110] : memref<4x4xf32, #tpu.memory_space<smem>>
    %180 = vector.broadcast %179 : f32 to vector<49x49xf32>
    %181 = arith.mulf %180, %69 : vector<49x49xf32>
    %182 = arith.addf %178, %181 : vector<49x49xf32>
    %c3_111 = arith.constant 3 : index
    %c3_112 = arith.constant 3 : index
    %183 = memref.load %arg11[%c3_111, %c3_112] : memref<4x4xf32, #tpu.memory_space<smem>>
    %184 = vector.broadcast %183 : f32 to vector<49x49xf32>
    %185 = arith.mulf %184, %87 : vector<49x49xf32>
    %186 = arith.addf %182, %185 : vector<49x49xf32>
    %c3_113 = arith.constant 3 : index
    %187 = memref.load %arg12[%c3_113] : memref<4xf32, #tpu.memory_space<smem>>
    %188 = vector.broadcast %187 : f32 to vector<49x49xf32>
    %189 = arith.addf %186, %188 : vector<49x49xf32>
    %c3_114 = arith.constant 3 : index
    %c0_115 = arith.constant 0 : index
    %c0_116 = arith.constant 0 : index
    %190 = vector.load %arg9[%c3_114, %c0_115, %c0_116] : memref<4x32x32xf32, #tpu.memory_space<vmem>>, vector<1x32x32xf32>
    %191 = vector.shape_cast %190 : vector<1x32x32xf32> to vector<32x32xf32>
    %cst_117 = arith.constant dense<0.000000e+00> : vector<49x32xf32>
    %192 = tpu.matmul %9, %191, %cst_117 {dimension_numbers = #tpu.dot_dimension_numbers<[1], [0], [0], [1], [0, 0, 1, 1], [], []>} : vector<49x32xf32>, vector<32x32xf32>, vector<49x32xf32> -> vector<49x32xf32>
    %c3_118 = arith.constant 3 : index
    %c0_119 = arith.constant 0 : index
    %c0_120 = arith.constant 0 : index
    %193 = vector.load %arg10[%c3_118, %c0_119, %c0_120] : memref<4x1x32xf32, #tpu.memory_space<vmem>>, vector<1x1x32xf32>
    %194 = vector.shape_cast %193 : vector<1x1x32xf32> to vector<1x32xf32>
    %195 = vector.broadcast %194 : vector<1x32xf32> to vector<49x32xf32>
    %196 = arith.addf %192, %195 : vector<49x32xf32>
    %cst_121 = arith.constant dense<0.000000e+00> : vector<49x32xf32>
    %197 = tpu.matmul %189, %196, %cst_121 {dimension_numbers = #tpu.dot_dimension_numbers<[1], [0], [0], [1], [0, 0, 1, 1], [], []>} : vector<49x49xf32>, vector<49x32xf32>, vector<49x32xf32> -> vector<49x32xf32>
    %cst_122 = arith.constant 0.000000e+00 : f32
    %198 = vector.broadcast %cst_122 : f32 to vector<49x32xf32>
    %199 = arith.maximumf %197, %198 : vector<49x32xf32>
    %200 = tpu.concatenate %115, %143, %171, %199 in 1 : vector<49x32xf32>, vector<49x32xf32>, vector<49x32xf32>, vector<49x32xf32> -> vector<49x128xf32>
    %cst_123 = arith.constant dense<0.000000e+00> : vector<49x32xf32>
    %201 = tpu.matmul %200, %2, %cst_123 {dimension_numbers = #tpu.dot_dimension_numbers<[1], [0], [0], [1], [0, 0, 1, 1], [], []>} : vector<49x128xf32>, vector<128x32xf32>, vector<49x32xf32> -> vector<49x32xf32>
    %202 = vector.broadcast %5 : vector<1x32xf32> to vector<49x32xf32>
    %203 = arith.addf %201, %202 : vector<49x32xf32>
    %c0_124 = arith.constant 0 : index
    %c0_125 = arith.constant 0 : index
    %c0_126 = arith.constant 0 : index
    %204 = vector.load %arg15[%c0_124, %c0_125, %c0_126] : memref<2x49x32xf32, #tpu.memory_space<vmem>>, vector<1x49x32xf32>
    %205 = vector.shape_cast %204 : vector<1x49x32xf32> to vector<49x32xf32>
    %206 = vector.shape_cast %203 : vector<49x32xf32> to vector<1x49x32xf32>
    tpu.vector_store %arg15[%c0_124, %c0_125, %c0_126], %206 {strides = array<i32>} : memref<2x49x32xf32, #tpu.memory_space<vmem>>, vector<1x49x32xf32>,
    %c1_127 = arith.constant 1 : index
    %c0_128 = arith.constant 0 : index
    %c0_129 = arith.constant 0 : index
    %207 = vector.load %arg1[%c1_127, %c0_128, %c0_129] : memref<2x49x32xf32, #tpu.memory_space<vmem>>, vector<1x49x32xf32>
    %208 = vector.shape_cast %207 : vector<1x49x32xf32> to vector<49x32xf32>
    %c1_130 = arith.constant 1 : index
    %c0_131 = arith.constant 0 : index
    %c0_132 = arith.constant 0 : index
    %209 = vector.load %arg2[%c1_130, %c0_131, %c0_132] : memref<2x49x32xf32, #tpu.memory_space<vmem>>, vector<1x49x32xf32>
    %210 = vector.shape_cast %209 : vector<1x49x32xf32> to vector<49x32xf32>
    %cst_133 = arith.constant dense<0.000000e+00> : vector<49x32xf32>
    %211 = tpu.matmul %208, %0, %cst_133 {dimension_numbers = #tpu.dot_dimension_numbers<[1], [0], [0], [1], [0, 0, 1, 1], [], []>} : vector<49x32xf32>, vector<32x32xf32>, vector<49x32xf32> -> vector<49x32xf32>
    %212 = vector.broadcast %3 : vector<1x32xf32> to vector<49x32xf32>
    %213 = arith.addf %211, %212 : vector<49x32xf32>
    %cst_134 = arith.constant dense<0.000000e+00> : vector<49x32xf32>
    %214 = tpu.matmul %210, %1, %cst_134 {dimension_numbers = #tpu.dot_dimension_numbers<[1], [0], [0], [1], [0, 0, 1, 1], [], []>} : vector<49x32xf32>, vector<32x32xf32>, vector<49x32xf32> -> vector<49x32xf32>
    %215 = vector.broadcast %4 : vector<1x32xf32> to vector<49x32xf32>
    %216 = arith.addf %214, %215 : vector<49x32xf32>
    %c0_135 = arith.constant 0 : index
    %c0_136 = arith.constant 0 : index
    %c0_137 = arith.constant 0 : index
    %217 = vector.load %arg7[%c0_135, %c0_136, %c0_137] : memref<4x1x32xf32, #tpu.memory_space<vmem>>, vector<1x1x32xf32>
    %218 = vector.shape_cast %217 : vector<1x1x32xf32> to vector<1x32xf32>
    %219 = vector.broadcast %218 : vector<1x32xf32> to vector<49x32xf32>
    %220 = arith.mulf %213, %219 : vector<49x32xf32>
    %cst_138 = arith.constant dense<0.000000e+00> : vector<49x49xf32>
    %221 = tpu.matmul %220, %216, %cst_138 {dimension_numbers = #tpu.dot_dimension_numbers<[1], [1], [0], [0], [0, 0, 1, 0], [], []>} : vector<49x32xf32>, vector<49x32xf32>, vector<49x49xf32> -> vector<49x49xf32>
    %c0_139 = arith.constant 0 : index
    %c0_140 = arith.constant 0 : index
    %c0_141 = arith.constant 0 : index
    %222 = vector.load %arg8[%c0_139, %c0_140, %c0_141] : memref<4x49x49xf32, #tpu.memory_space<vmem>>, vector<1x49x49xf32>
    %223 = vector.shape_cast %222 : vector<1x49x49xf32> to vector<49x49xf32>
    %224 = arith.addf %221, %223 : vector<49x49xf32>
    %cst_142 = arith.constant dense<0xFF800000> : vector<49xf32>
    %225 = vector.multi_reduction <maximumf>, %224, %cst_142 [1] : vector<49x49xf32> to vector<49xf32>
    %226 = vector.shape_cast %225 : vector<49xf32> to vector<49x1xf32>
    %227 = vector.broadcast %226 : vector<49x1xf32> to vector<49x49xf32>
    %228 = arith.subf %224, %227 : vector<49x49xf32>
    %229 = math.exp %228 : vector<49x49xf32>
    %cst_143 = arith.constant dense<0.000000e+00> : vector<49xf32>
    %230 = vector.multi_reduction <add>, %229, %cst_143 [1] : vector<49x49xf32> to vector<49xf32>
    %231 = vector.shape_cast %230 : vector<49xf32> to vector<49x1xf32>
    %232 = tpu.reciprocal %231 {approx = true} : vector<49x1xf32> -> vector<49x1xf32>
    %233 = vector.broadcast %232 : vector<49x1xf32> to vector<49x49xf32>
    %234 = arith.mulf %229, %233 : vector<49x49xf32>
    %c1_144 = arith.constant 1 : index
    %c0_145 = arith.constant 0 : index
    %c0_146 = arith.constant 0 : index
    %235 = vector.load %arg7[%c1_144, %c0_145, %c0_146] : memref<4x1x32xf32, #tpu.memory_space<vmem>>, vector<1x1x32xf32>
    %236 = vector.shape_cast %235 : vector<1x1x32xf32> to vector<1x32xf32>
    %237 = vector.broadcast %236 : vector<1x32xf32> to vector<49x32xf32>
    %238 = arith.mulf %213, %237 : vector<49x32xf32>
    %cst_147 = arith.constant dense<0.000000e+00> : vector<49x49xf32>
    %239 = tpu.matmul %238, %216, %cst_147 {dimension_numbers = #tpu.dot_dimension_numbers<[1], [1], [0], [0], [0, 0, 1, 0], [], []>} : vector<49x32xf32>, vector<49x32xf32>, vector<49x49xf32> -> vector<49x49xf32>
    %c1_148 = arith.constant 1 : index
    %c0_149 = arith.constant 0 : index
    %c0_150 = arith.constant 0 : index
    %240 = vector.load %arg8[%c1_148, %c0_149, %c0_150] : memref<4x49x49xf32, #tpu.memory_space<vmem>>, vector<1x49x49xf32>
    %241 = vector.shape_cast %240 : vector<1x49x49xf32> to vector<49x49xf32>
    %242 = arith.addf %239, %241 : vector<49x49xf32>
    %cst_151 = arith.constant dense<0xFF800000> : vector<49xf32>
    %243 = vector.multi_reduction <maximumf>, %242, %cst_151 [1] : vector<49x49xf32> to vector<49xf32>
    %244 = vector.shape_cast %243 : vector<49xf32> to vector<49x1xf32>
    %245 = vector.broadcast %244 : vector<49x1xf32> to vector<49x49xf32>
    %246 = arith.subf %242, %245 : vector<49x49xf32>
    %247 = math.exp %246 : vector<49x49xf32>
    %cst_152 = arith.constant dense<0.000000e+00> : vector<49xf32>
    %248 = vector.multi_reduction <add>, %247, %cst_152 [1] : vector<49x49xf32> to vector<49xf32>
    %249 = vector.shape_cast %248 : vector<49xf32> to vector<49x1xf32>
    %250 = tpu.reciprocal %249 {approx = true} : vector<49x1xf32> -> vector<49x1xf32>
    %251 = vector.broadcast %250 : vector<49x1xf32> to vector<49x49xf32>
    %252 = arith.mulf %247, %251 : vector<49x49xf32>
    %c2_153 = arith.constant 2 : index
    %c0_154 = arith.constant 0 : index
    %c0_155 = arith.constant 0 : index
    %253 = vector.load %arg7[%c2_153, %c0_154, %c0_155] : memref<4x1x32xf32, #tpu.memory_space<vmem>>, vector<1x1x32xf32>
    %254 = vector.shape_cast %253 : vector<1x1x32xf32> to vector<1x32xf32>
    %255 = vector.broadcast %254 : vector<1x32xf32> to vector<49x32xf32>
    %256 = arith.mulf %213, %255 : vector<49x32xf32>
    %cst_156 = arith.constant dense<0.000000e+00> : vector<49x49xf32>
    %257 = tpu.matmul %256, %216, %cst_156 {dimension_numbers = #tpu.dot_dimension_numbers<[1], [1], [0], [0], [0, 0, 1, 0], [], []>} : vector<49x32xf32>, vector<49x32xf32>, vector<49x49xf32> -> vector<49x49xf32>
    %c2_157 = arith.constant 2 : index
    %c0_158 = arith.constant 0 : index
    %c0_159 = arith.constant 0 : index
    %258 = vector.load %arg8[%c2_157, %c0_158, %c0_159] : memref<4x49x49xf32, #tpu.memory_space<vmem>>, vector<1x49x49xf32>
    %259 = vector.shape_cast %258 : vector<1x49x49xf32> to vector<49x49xf32>
    %260 = arith.addf %257, %259 : vector<49x49xf32>
    %cst_160 = arith.constant dense<0xFF800000> : vector<49xf32>
    %261 = vector.multi_reduction <maximumf>, %260, %cst_160 [1] : vector<49x49xf32> to vector<49xf32>
    %262 = vector.shape_cast %261 : vector<49xf32> to vector<49x1xf32>
    %263 = vector.broadcast %262 : vector<49x1xf32> to vector<49x49xf32>
    %264 = arith.subf %260, %263 : vector<49x49xf32>
    %265 = math.exp %264 : vector<49x49xf32>
    %cst_161 = arith.constant dense<0.000000e+00> : vector<49xf32>
    %266 = vector.multi_reduction <add>, %265, %cst_161 [1] : vector<49x49xf32> to vector<49xf32>
    %267 = vector.shape_cast %266 : vector<49xf32> to vector<49x1xf32>
    %268 = tpu.reciprocal %267 {approx = true} : vector<49x1xf32> -> vector<49x1xf32>
    %269 = vector.broadcast %268 : vector<49x1xf32> to vector<49x49xf32>
    %270 = arith.mulf %265, %269 : vector<49x49xf32>
    %c3_162 = arith.constant 3 : index
    %c0_163 = arith.constant 0 : index
    %c0_164 = arith.constant 0 : index
    %271 = vector.load %arg7[%c3_162, %c0_163, %c0_164] : memref<4x1x32xf32, #tpu.memory_space<vmem>>, vector<1x1x32xf32>
    %272 = vector.shape_cast %271 : vector<1x1x32xf32> to vector<1x32xf32>
    %273 = vector.broadcast %272 : vector<1x32xf32> to vector<49x32xf32>
    %274 = arith.mulf %213, %273 : vector<49x32xf32>
    %cst_165 = arith.constant dense<0.000000e+00> : vector<49x49xf32>
    %275 = tpu.matmul %274, %216, %cst_165 {dimension_numbers = #tpu.dot_dimension_numbers<[1], [1], [0], [0], [0, 0, 1, 0], [], []>} : vector<49x32xf32>, vector<49x32xf32>, vector<49x49xf32> -> vector<49x49xf32>
    %c3_166 = arith.constant 3 : index
    %c0_167 = arith.constant 0 : index
    %c0_168 = arith.constant 0 : index
    %276 = vector.load %arg8[%c3_166, %c0_167, %c0_168] : memref<4x49x49xf32, #tpu.memory_space<vmem>>, vector<1x49x49xf32>
    %277 = vector.shape_cast %276 : vector<1x49x49xf32> to vector<49x49xf32>
    %278 = arith.addf %275, %277 : vector<49x49xf32>
    %cst_169 = arith.constant dense<0xFF800000> : vector<49xf32>
    %279 = vector.multi_reduction <maximumf>, %278, %cst_169 [1] : vector<49x49xf32> to vector<49xf32>
    %280 = vector.shape_cast %279 : vector<49xf32> to vector<49x1xf32>
    %281 = vector.broadcast %280 : vector<49x1xf32> to vector<49x49xf32>
    %282 = arith.subf %278, %281 : vector<49x49xf32>
    %283 = math.exp %282 : vector<49x49xf32>
    %cst_170 = arith.constant dense<0.000000e+00> : vector<49xf32>
    %284 = vector.multi_reduction <add>, %283, %cst_170 [1] : vector<49x49xf32> to vector<49xf32>
    %285 = vector.shape_cast %284 : vector<49xf32> to vector<49x1xf32>
    %286 = tpu.reciprocal %285 {approx = true} : vector<49x1xf32> -> vector<49x1xf32>
    %287 = vector.broadcast %286 : vector<49x1xf32> to vector<49x49xf32>
    %288 = arith.mulf %283, %287 : vector<49x49xf32>
    %c0_171 = arith.constant 0 : index
    %c0_172 = arith.constant 0 : index
    %289 = memref.load %arg11[%c0_171, %c0_172] : memref<4x4xf32, #tpu.memory_space<smem>>
    %290 = vector.broadcast %289 : f32 to vector<49x49xf32>
    %291 = arith.mulf %290, %234 : vector<49x49xf32>
    %c0_173 = arith.constant 0 : index
    %c1_174 = arith.constant 1 : index
    %292 = memref.load %arg11[%c0_173, %c1_174] : memref<4x4xf32, #tpu.memory_space<smem>>
    %293 = vector.broadcast %292 : f32 to vector<49x49xf32>
    %294 = arith.mulf %293, %252 : vector<49x49xf32>
    %295 = arith.addf %291, %294 : vector<49x49xf32>
    %c0_175 = arith.constant 0 : index
    %c2_176 = arith.constant 2 : index
    %296 = memref.load %arg11[%c0_175, %c2_176] : memref<4x4xf32, #tpu.memory_space<smem>>
    %297 = vector.broadcast %296 : f32 to vector<49x49xf32>
    %298 = arith.mulf %297, %270 : vector<49x49xf32>
    %299 = arith.addf %295, %298 : vector<49x49xf32>
    %c0_177 = arith.constant 0 : index
    %c3_178 = arith.constant 3 : index
    %300 = memref.load %arg11[%c0_177, %c3_178] : memref<4x4xf32, #tpu.memory_space<smem>>
    %301 = vector.broadcast %300 : f32 to vector<49x49xf32>
    %302 = arith.mulf %301, %288 : vector<49x49xf32>
    %303 = arith.addf %299, %302 : vector<49x49xf32>
    %c0_179 = arith.constant 0 : index
    %304 = memref.load %arg12[%c0_179] : memref<4xf32, #tpu.memory_space<smem>>
    %305 = vector.broadcast %304 : f32 to vector<49x49xf32>
    %306 = arith.addf %303, %305 : vector<49x49xf32>
    %c0_180 = arith.constant 0 : index
    %c0_181 = arith.constant 0 : index
    %c0_182 = arith.constant 0 : index
    %307 = vector.load %arg9[%c0_180, %c0_181, %c0_182] : memref<4x32x32xf32, #tpu.memory_space<vmem>>, vector<1x32x32xf32>
    %308 = vector.shape_cast %307 : vector<1x32x32xf32> to vector<32x32xf32>
    %cst_183 = arith.constant dense<0.000000e+00> : vector<49x32xf32>
    %309 = tpu.matmul %210, %308, %cst_183 {dimension_numbers = #tpu.dot_dimension_numbers<[1], [0], [0], [1], [0, 0, 1, 1], [], []>} : vector<49x32xf32>, vector<32x32xf32>, vector<49x32xf32> -> vector<49x32xf32>
    %c0_184 = arith.constant 0 : index
    %c0_185 = arith.constant 0 : index
    %c0_186 = arith.constant 0 : index
    %310 = vector.load %arg10[%c0_184, %c0_185, %c0_186] : memref<4x1x32xf32, #tpu.memory_space<vmem>>, vector<1x1x32xf32>
    %311 = vector.shape_cast %310 : vector<1x1x32xf32> to vector<1x32xf32>
    %312 = vector.broadcast %311 : vector<1x32xf32> to vector<49x32xf32>
    %313 = arith.addf %309, %312 : vector<49x32xf32>
    %cst_187 = arith.constant dense<0.000000e+00> : vector<49x32xf32>
    %314 = tpu.matmul %306, %313, %cst_187 {dimension_numbers = #tpu.dot_dimension_numbers<[1], [0], [0], [1], [0, 0, 1, 1], [], []>} : vector<49x49xf32>, vector<49x32xf32>, vector<49x32xf32> -> vector<49x32xf32>
    %cst_188 = arith.constant 0.000000e+00 : f32
    %315 = vector.broadcast %cst_188 : f32 to vector<49x32xf32>
    %316 = arith.maximumf %314, %315 : vector<49x32xf32>
    %c1_189 = arith.constant 1 : index
    %c0_190 = arith.constant 0 : index
    %317 = memref.load %arg11[%c1_189, %c0_190] : memref<4x4xf32, #tpu.memory_space<smem>>
    %318 = vector.broadcast %317 : f32 to vector<49x49xf32>
    %319 = arith.mulf %318, %234 : vector<49x49xf32>
    %c1_191 = arith.constant 1 : index
    %c1_192 = arith.constant 1 : index
    %320 = memref.load %arg11[%c1_191, %c1_192] : memref<4x4xf32, #tpu.memory_space<smem>>
    %321 = vector.broadcast %320 : f32 to vector<49x49xf32>
    %322 = arith.mulf %321, %252 : vector<49x49xf32>
    %323 = arith.addf %319, %322 : vector<49x49xf32>
    %c1_193 = arith.constant 1 : index
    %c2_194 = arith.constant 2 : index
    %324 = memref.load %arg11[%c1_193, %c2_194] : memref<4x4xf32, #tpu.memory_space<smem>>
    %325 = vector.broadcast %324 : f32 to vector<49x49xf32>
    %326 = arith.mulf %325, %270 : vector<49x49xf32>
    %327 = arith.addf %323, %326 : vector<49x49xf32>
    %c1_195 = arith.constant 1 : index
    %c3_196 = arith.constant 3 : index
    %328 = memref.load %arg11[%c1_195, %c3_196] : memref<4x4xf32, #tpu.memory_space<smem>>
    %329 = vector.broadcast %328 : f32 to vector<49x49xf32>
    %330 = arith.mulf %329, %288 : vector<49x49xf32>
    %331 = arith.addf %327, %330 : vector<49x49xf32>
    %c1_197 = arith.constant 1 : index
    %332 = memref.load %arg12[%c1_197] : memref<4xf32, #tpu.memory_space<smem>>
    %333 = vector.broadcast %332 : f32 to vector<49x49xf32>
    %334 = arith.addf %331, %333 : vector<49x49xf32>
    %c1_198 = arith.constant 1 : index
    %c0_199 = arith.constant 0 : index
    %c0_200 = arith.constant 0 : index
    %335 = vector.load %arg9[%c1_198, %c0_199, %c0_200] : memref<4x32x32xf32, #tpu.memory_space<vmem>>, vector<1x32x32xf32>
    %336 = vector.shape_cast %335 : vector<1x32x32xf32> to vector<32x32xf32>
    %cst_201 = arith.constant dense<0.000000e+00> : vector<49x32xf32>
    %337 = tpu.matmul %210, %336, %cst_201 {dimension_numbers = #tpu.dot_dimension_numbers<[1], [0], [0], [1], [0, 0, 1, 1], [], []>} : vector<49x32xf32>, vector<32x32xf32>, vector<49x32xf32> -> vector<49x32xf32>
    %c1_202 = arith.constant 1 : index
    %c0_203 = arith.constant 0 : index
    %c0_204 = arith.constant 0 : index
    %338 = vector.load %arg10[%c1_202, %c0_203, %c0_204] : memref<4x1x32xf32, #tpu.memory_space<vmem>>, vector<1x1x32xf32>
    %339 = vector.shape_cast %338 : vector<1x1x32xf32> to vector<1x32xf32>
    %340 = vector.broadcast %339 : vector<1x32xf32> to vector<49x32xf32>
    %341 = arith.addf %337, %340 : vector<49x32xf32>
    %cst_205 = arith.constant dense<0.000000e+00> : vector<49x32xf32>
    %342 = tpu.matmul %334, %341, %cst_205 {dimension_numbers = #tpu.dot_dimension_numbers<[1], [0], [0], [1], [0, 0, 1, 1], [], []>} : vector<49x49xf32>, vector<49x32xf32>, vector<49x32xf32> -> vector<49x32xf32>
    %cst_206 = arith.constant 0.000000e+00 : f32
    %343 = vector.broadcast %cst_206 : f32 to vector<49x32xf32>
    %344 = arith.maximumf %342, %343 : vector<49x32xf32>
    %c2_207 = arith.constant 2 : index
    %c0_208 = arith.constant 0 : index
    %345 = memref.load %arg11[%c2_207, %c0_208] : memref<4x4xf32, #tpu.memory_space<smem>>
    %346 = vector.broadcast %345 : f32 to vector<49x49xf32>
    %347 = arith.mulf %346, %234 : vector<49x49xf32>
    %c2_209 = arith.constant 2 : index
    %c1_210 = arith.constant 1 : index
    %348 = memref.load %arg11[%c2_209, %c1_210] : memref<4x4xf32, #tpu.memory_space<smem>>
    %349 = vector.broadcast %348 : f32 to vector<49x49xf32>
    %350 = arith.mulf %349, %252 : vector<49x49xf32>
    %351 = arith.addf %347, %350 : vector<49x49xf32>
    %c2_211 = arith.constant 2 : index
    %c2_212 = arith.constant 2 : index
    %352 = memref.load %arg11[%c2_211, %c2_212] : memref<4x4xf32, #tpu.memory_space<smem>>
    %353 = vector.broadcast %352 : f32 to vector<49x49xf32>
    %354 = arith.mulf %353, %270 : vector<49x49xf32>
    %355 = arith.addf %351, %354 : vector<49x49xf32>
    %c2_213 = arith.constant 2 : index
    %c3_214 = arith.constant 3 : index
    %356 = memref.load %arg11[%c2_213, %c3_214] : memref<4x4xf32, #tpu.memory_space<smem>>
    %357 = vector.broadcast %356 : f32 to vector<49x49xf32>
    %358 = arith.mulf %357, %288 : vector<49x49xf32>
    %359 = arith.addf %355, %358 : vector<49x49xf32>
    %c2_215 = arith.constant 2 : index
    %360 = memref.load %arg12[%c2_215] : memref<4xf32, #tpu.memory_space<smem>>
    %361 = vector.broadcast %360 : f32 to vector<49x49xf32>
    %362 = arith.addf %359, %361 : vector<49x49xf32>
    %c2_216 = arith.constant 2 : index
    %c0_217 = arith.constant 0 : index
    %c0_218 = arith.constant 0 : index
    %363 = vector.load %arg9[%c2_216, %c0_217, %c0_218] : memref<4x32x32xf32, #tpu.memory_space<vmem>>, vector<1x32x32xf32>
    %364 = vector.shape_cast %363 : vector<1x32x32xf32> to vector<32x32xf32>
    %cst_219 = arith.constant dense<0.000000e+00> : vector<49x32xf32>
    %365 = tpu.matmul %210, %364, %cst_219 {dimension_numbers = #tpu.dot_dimension_numbers<[1], [0], [0], [1], [0, 0, 1, 1], [], []>} : vector<49x32xf32>, vector<32x32xf32>, vector<49x32xf32> -> vector<49x32xf32>
    %c2_220 = arith.constant 2 : index
    %c0_221 = arith.constant 0 : index
    %c0_222 = arith.constant 0 : index
    %366 = vector.load %arg10[%c2_220, %c0_221, %c0_222] : memref<4x1x32xf32, #tpu.memory_space<vmem>>, vector<1x1x32xf32>
    %367 = vector.shape_cast %366 : vector<1x1x32xf32> to vector<1x32xf32>
    %368 = vector.broadcast %367 : vector<1x32xf32> to vector<49x32xf32>
    %369 = arith.addf %365, %368 : vector<49x32xf32>
    %cst_223 = arith.constant dense<0.000000e+00> : vector<49x32xf32>
    %370 = tpu.matmul %362, %369, %cst_223 {dimension_numbers = #tpu.dot_dimension_numbers<[1], [0], [0], [1], [0, 0, 1, 1], [], []>} : vector<49x49xf32>, vector<49x32xf32>, vector<49x32xf32> -> vector<49x32xf32>
    %cst_224 = arith.constant 0.000000e+00 : f32
    %371 = vector.broadcast %cst_224 : f32 to vector<49x32xf32>
    %372 = arith.maximumf %370, %371 : vector<49x32xf32>
    %c3_225 = arith.constant 3 : index
    %c0_226 = arith.constant 0 : index
    %373 = memref.load %arg11[%c3_225, %c0_226] : memref<4x4xf32, #tpu.memory_space<smem>>
    %374 = vector.broadcast %373 : f32 to vector<49x49xf32>
    %375 = arith.mulf %374, %234 : vector<49x49xf32>
    %c3_227 = arith.constant 3 : index
    %c1_228 = arith.constant 1 : index
    %376 = memref.load %arg11[%c3_227, %c1_228] : memref<4x4xf32, #tpu.memory_space<smem>>
    %377 = vector.broadcast %376 : f32 to vector<49x49xf32>
    %378 = arith.mulf %377, %252 : vector<49x49xf32>
    %379 = arith.addf %375, %378 : vector<49x49xf32>
    %c3_229 = arith.constant 3 : index
    %c2_230 = arith.constant 2 : index
    %380 = memref.load %arg11[%c3_229, %c2_230] : memref<4x4xf32, #tpu.memory_space<smem>>
    %381 = vector.broadcast %380 : f32 to vector<49x49xf32>
    %382 = arith.mulf %381, %270 : vector<49x49xf32>
    %383 = arith.addf %379, %382 : vector<49x49xf32>
    %c3_231 = arith.constant 3 : index
    %c3_232 = arith.constant 3 : index
    %384 = memref.load %arg11[%c3_231, %c3_232] : memref<4x4xf32, #tpu.memory_space<smem>>
    %385 = vector.broadcast %384 : f32 to vector<49x49xf32>
    %386 = arith.mulf %385, %288 : vector<49x49xf32>
    %387 = arith.addf %383, %386 : vector<49x49xf32>
    %c3_233 = arith.constant 3 : index
    %388 = memref.load %arg12[%c3_233] : memref<4xf32, #tpu.memory_space<smem>>
    %389 = vector.broadcast %388 : f32 to vector<49x49xf32>
    %390 = arith.addf %387, %389 : vector<49x49xf32>
    %c3_234 = arith.constant 3 : index
    %c0_235 = arith.constant 0 : index
    %c0_236 = arith.constant 0 : index
    %391 = vector.load %arg9[%c3_234, %c0_235, %c0_236] : memref<4x32x32xf32, #tpu.memory_space<vmem>>, vector<1x32x32xf32>
    %392 = vector.shape_cast %391 : vector<1x32x32xf32> to vector<32x32xf32>
    %cst_237 = arith.constant dense<0.000000e+00> : vector<49x32xf32>
    %393 = tpu.matmul %210, %392, %cst_237 {dimension_numbers = #tpu.dot_dimension_numbers<[1], [0], [0], [1], [0, 0, 1, 1], [], []>} : vector<49x32xf32>, vector<32x32xf32>, vector<49x32xf32> -> vector<49x32xf32>
    %c3_238 = arith.constant 3 : index
    %c0_239 = arith.constant 0 : index
    %c0_240 = arith.constant 0 : index
    %394 = vector.load %arg10[%c3_238, %c0_239, %c0_240] : memref<4x1x32xf32, #tpu.memory_space<vmem>>, vector<1x1x32xf32>
    %395 = vector.shape_cast %394 : vector<1x1x32xf32> to vector<1x32xf32>
    %396 = vector.broadcast %395 : vector<1x32xf32> to vector<49x32xf32>
    %397 = arith.addf %393, %396 : vector<49x32xf32>
    %cst_241 = arith.constant dense<0.000000e+00> : vector<49x32xf32>
    %398 = tpu.matmul %390, %397, %cst_241 {dimension_numbers = #tpu.dot_dimension_numbers<[1], [0], [0], [1], [0, 0, 1, 1], [], []>} : vector<49x49xf32>, vector<49x32xf32>, vector<49x32xf32> -> vector<49x32xf32>
    %cst_242 = arith.constant 0.000000e+00 : f32
    %399 = vector.broadcast %cst_242 : f32 to vector<49x32xf32>
    %400 = arith.maximumf %398, %399 : vector<49x32xf32>
    %401 = tpu.concatenate %316, %344, %372, %400 in 1 : vector<49x32xf32>, vector<49x32xf32>, vector<49x32xf32>, vector<49x32xf32> -> vector<49x128xf32>
    %cst_243 = arith.constant dense<0.000000e+00> : vector<49x32xf32>
    %402 = tpu.matmul %401, %2, %cst_243 {dimension_numbers = #tpu.dot_dimension_numbers<[1], [0], [0], [1], [0, 0, 1, 1], [], []>} : vector<49x128xf32>, vector<128x32xf32>, vector<49x32xf32> -> vector<49x32xf32>
    %403 = vector.broadcast %5 : vector<1x32xf32> to vector<49x32xf32>
    %404 = arith.addf %402, %403 : vector<49x32xf32>
    %c1_244 = arith.constant 1 : index
    %c0_245 = arith.constant 0 : index
    %c0_246 = arith.constant 0 : index
    %405 = vector.load %arg15[%c1_244, %c0_245, %c0_246] : memref<2x49x32xf32, #tpu.memory_space<vmem>>, vector<1x49x32xf32>
    %406 = vector.shape_cast %405 : vector<1x49x32xf32> to vector<49x32xf32>
    %407 = vector.shape_cast %404 : vector<49x32xf32> to vector<1x49x32xf32>
    tpu.vector_store %arg15[%c1_244, %c0_245, %c0_246], %407 {strides = array<i32>} : memref<2x49x32xf32, #tpu.memory_space<vmem>>, vector<1x49x32xf32>,
    return
  }
  func.func @transform_0(%arg0: i32) -> (i32, i32, i32) {
    %c0_i32 = arith.constant 0 : i32
    %c0_i32_0 = arith.constant 0 : i32
    %c0_i32_1 = arith.constant 0 : i32
    return %arg0, %c0_i32, %c0_i32_0 : i32, i32, i32
  }
  func.func @transform_1(%arg0: i32) -> (i32, i32, i32) {
    %c0_i32 = arith.constant 0 : i32
    %c0_i32_0 = arith.constant 0 : i32
    %c0_i32_1 = arith.constant 0 : i32
    return %arg0, %c0_i32, %c0_i32_0 : i32, i32, i32
  }
  func.func @transform_2(%arg0: i32) -> (i32, i32) {
    %c0_i32 = arith.constant 0 : i32
    %c0_i32_0 = arith.constant 0 : i32
    %c0_i32_1 = arith.constant 0 : i32
    return %c0_i32, %c0_i32_0 : i32, i32
  }
  func.func @transform_3(%arg0: i32) -> (i32, i32) {
    %c0_i32 = arith.constant 0 : i32
    %c0_i32_0 = arith.constant 0 : i32
    %c0_i32_1 = arith.constant 0 : i32
    return %c0_i32, %c0_i32_0 : i32, i32
  }
  func.func @transform_4(%arg0: i32) -> (i32, i32) {
    %c0_i32 = arith.constant 0 : i32
    %c0_i32_0 = arith.constant 0 : i32
    %c0_i32_1 = arith.constant 0 : i32
    return %c0_i32, %c0_i32_0 : i32, i32
  }
  func.func @transform_5(%arg0: i32) -> (i32, i32) {
    %c0_i32 = arith.constant 0 : i32
    %c0_i32_0 = arith.constant 0 : i32
    %c0_i32_1 = arith.constant 0 : i32
    return %c0_i32, %c0_i32_0 : i32, i32
  }
  func.func @transform_6(%arg0: i32) -> (i32, i32, i32) {
    %c0_i32 = arith.constant 0 : i32
    %c0_i32_0 = arith.constant 0 : i32
    %c0_i32_1 = arith.constant 0 : i32
    %c0_i32_2 = arith.constant 0 : i32
    return %c0_i32, %c0_i32_0, %c0_i32_1 : i32, i32, i32
  }
  func.func @transform_7(%arg0: i32) -> (i32, i32, i32) {
    %c0_i32 = arith.constant 0 : i32
    %c0_i32_0 = arith.constant 0 : i32
    %c0_i32_1 = arith.constant 0 : i32
    %c0_i32_2 = arith.constant 0 : i32
    return %c0_i32, %c0_i32_0, %c0_i32_1 : i32, i32, i32
  }
  func.func @transform_8(%arg0: i32) -> (i32, i32, i32) {
    %c0_i32 = arith.constant 0 : i32
    %c0_i32_0 = arith.constant 0 : i32
    %c0_i32_1 = arith.constant 0 : i32
    %c0_i32_2 = arith.constant 0 : i32
    return %c0_i32, %c0_i32_0, %c0_i32_1 : i32, i32, i32
  }
  func.func @transform_9(%arg0: i32) -> (i32, i32, i32) {
    %c0_i32 = arith.constant 0 : i32
    %c0_i32_0 = arith.constant 0 : i32
    %c0_i32_1 = arith.constant 0 : i32
    %c0_i32_2 = arith.constant 0 : i32
    return %c0_i32, %c0_i32_0, %c0_i32_1 : i32, i32, i32
  }
  func.func @transform_10(%arg0: i32) -> (i32, i32) {
    %c0_i32 = arith.constant 0 : i32
    %c0_i32_0 = arith.constant 0 : i32
    %c0_i32_1 = arith.constant 0 : i32
    return %c0_i32, %c0_i32_0 : i32, i32
  }
  func.func @transform_11(%arg0: i32) -> i32 {
    %c0_i32 = arith.constant 0 : i32
    %c0_i32_0 = arith.constant 0 : i32
    return %c0_i32 : i32
  }
  func.func @transform_12(%arg0: i32) -> (i32, i32) {
    %c0_i32 = arith.constant 0 : i32
    %c0_i32_0 = arith.constant 0 : i32
    %c0_i32_1 = arith.constant 0 : i32
    return %c0_i32, %c0_i32_0 : i32, i32
  }
  func.func @transform_13(%arg0: i32) -> (i32, i32) {
    %c0_i32 = arith.constant 0 : i32
    %c0_i32_0 = arith.constant 0 : i32
    %c0_i32_1 = arith.constant 0 : i32
    return %c0_i32, %c0_i32_0 : i32, i32
  }
  func.func @transform_14(%arg0: i32) -> (i32, i32, i32) {
    %c0_i32 = arith.constant 0 : i32
    %c0_i32_0 = arith.constant 0 : i32
    %c0_i32_1 = arith.constant 0 : i32
    return %arg0, %c0_i32, %c0_i32_0 : i32, i32, i32
  }
}

</mosaic_0001>

<bundles_post_ra>
// kernel: tpu_custom_call.1
= control target key start
LH: loop header
LB: loop body
LE: loop exit
PB: predicated region body
PF: predicated region fallthrough
CT: control target
= control target key end

     0   :  { %s6821_s0 = inlined_call_operand.vmem [shape: f32[2,49,32], index: 0, kind: input, shape index: {}]   ;;  %s6822_s1 = inlined_call_operand.vmem [shape: f32[2,49,32], index: 1, kind: input, shape index: {}]   ;;  %s6823_s2 = inlined_call_operand.vmem [shape: f32[32,32], index: 2, kind: input, shape index: {}]   ;;  %s6824_s3 = inlined_call_operand.vmem [shape: f32[1,32], index: 3, kind: input, shape index: {}]   ;;  %s6825_s4 = inlined_call_operand.vmem [shape: f32[32,32], index: 4, kind: input, shape index: {}]   ;;  %s6826_s5 = inlined_call_operand.vmem [shape: f32[1,32], index: 5, kind: input, shape index: {}]   ;;  %s6827_s6 = inlined_call_operand.vmem [shape: f32[4,1,32], index: 6, kind: input, shape index: {}]   ;;  %s6828_s7 = inlined_call_operand.vmem [shape: f32[4,49,49], index: 7, kind: input, shape index: {}]   ;;  %s6829_s8 = inlined_call_operand.vmem [shape: f32[4,32,32], index: 8, kind: input, shape index: {}]   ;;  %s6830_s9 = inlined_call_operand.vmem [shape: f32[4,1,32], index: 9, kind: input, shape index: {}]   ;;  %s6831_s10 = inlined_call_operand.vmem [shape: f32[4,4], index: 10, kind: input, shape index: {}]   ;;  %s6832_s11 = inlined_call_operand.vmem [shape: f32[4], index: 11, kind: input, shape index: {}]   ;;  %s6833_s12 = inlined_call_operand.vmem [shape: f32[128,32], index: 12, kind: input, shape index: {}]   ;;  %s6834_s13 = inlined_call_operand.vmem [shape: f32[1,32], index: 13, kind: input, shape index: {}]   ;;  %s6835_s14 = inlined_call_operand.vmem [shape: f32[2,49,32], index: 14, kind: output, shape index: {}]  }
   0x1   :  { %6860 = sst [smem:[#allocation16_spill]] %s6830_s9 }
   0x2   :  { %19 = vsyncpa [#allocation3], 0  ;;  %s46_s15 = sshll.u32 %s6831_s10, 4  ;;  %s47_s15 = int_to_ptr.vmem [resolvable:$true] %s46_s15 }
   0x3   :  { %20 = vsyncpa [#allocation5], 0  ;;  %s55_s18 = sshll.u32 %s6832_s11, 4  ;;  %s4151_s19 = smov [#allocation2]   ;;  %s56_s18 = int_to_ptr.vmem [resolvable:$true] %s55_s18 }
   0x4   :  { %49 = dma.vmem_to_smem %s47_s15, 64, %s4151_s19, [#allocation3]  }
   0x5   :  { %s4152_s20 = smov [#allocation4]  }
   0x6   :  { %58 = dma.vmem_to_smem %s56_s18, 16, %s4152_s20, [#allocation5]  }
   0x7   :  { %4147 = dma.done.wait [#allocation3], 64  }
   0x8   :  { %4148 = vsyncadd [#allocation3], 4294967232 }
   0x9   :  { %4149 = dma.done.wait [#allocation5], 16  }
   0xa   :  { %4150 = vsyncadd [#allocation5], 4294967280 }
   0xb   :  { %71 = sfence }
   0xc   :  { %v4240_v0 = vld [vmem:[%s6825_s4 + $0x18] sm:$0xff]  ;;  %v4245_v1 = vld [vmem:[%s6825_s4 + $0x10] sm:$0xff]  ;;  %v4252_v2 = vld [vmem:[%s6825_s4 + $0x8] sm:$0xff]  ;;  %vm116_vm0 = vcmask 261120   ;;  %vm336_vm1 = vcmask 400384   ;;  %vm355_vm2 = vcmask 393216  }
   0xd   :  { %3821 = vmatpush.msra.mxu3 %v4240_v0  ;;  %212 = vmatpush.msra.mxu1 %v4240_v0  ;;  %v75_v3 = vld [vmem:[%s6823_s2 + $0x18] sm:$0xff]  ;;  %v4262_v4 = vld [vmem:[%s6825_s4] sm:$0xff]  ;;  %v74_v5 = vld [vmem:[%s6823_s2 + $0x10] sm:$0xff]  ;;  %vm1016_vm3 = vcmask 1040384   ;;  %s4975_s21 = sld [smem:[#allocation2 + $0x2]]  ;;  %vm1705_vm4 = vcmask 523264  }
   0xe   :  { %150 = vmatpush.msra.mxu0 %v75_v3  ;;  %3817 = vmatpush.msra.mxu2 %v75_v3  ;;  %v4271_v6 = vld [vmem:[%s6822_s1 + $0x20] sm:$0xff]  ;;  %v73_v8 = vld [vmem:[%s6823_s2 + $0x8] sm:$0xff]  ;;  %v4324_v16 = vld [vmem:[%s6822_s1 + $0x30] sm:$0x1]  ;;  %s4977_s22 = sld [smem:[#allocation2 + $0x82]]  ;;  %vm1713_vm5 = vcmask 785408  }
   0xf   :  { %3822 = vmatpush.msra.mxu3 %v4245_v1  ;;  %213 = vmatpush.msra.mxu1 %v4245_v1  ;;  %v4277_v7 = vld [vmem:[%s6822_s1] sm:$0xff]  ;;  %v4300_v12 = vld [vmem:[%s6822_s1 + $0x28] sm:$0xff]  ;;  %v4329_v17 = vld [vmem:[%s6822_s1 + $0x10] sm:$0xff]  ;;  %s4979_s10 = sld [smem:[#allocation2 + $0x102]]  ;;  %vm1768_vm6 = vcmask 253952  }
  0x10   :  { %151 = vmatpush.msra.mxu0 %v74_v5  ;;  %v72_v9 = vld [vmem:[%s6823_s2] sm:$0xff]  ;;  %3818 = vmatpush.msra.mxu2 %v74_v5  ;;  %v4305_v13 = vld [vmem:[%s6822_s1 + $0x8] sm:$0xff]  ;;  %v101_v18 = vld [vmem:[%s6821_s0 + $0x10] sm:$0xff]  ;;  %s4981_s23 = sld [smem:[#allocation2 + $0x182]] }
  0x11   :  { %3823 = vmatpush.msra.mxu3 %v4252_v2  ;;  %214 = vmatpush.msra.mxu1 %v4252_v2  ;;  %v99_v10 = vld [vmem:[%s6821_s0] sm:$0xff]  ;;  %v100_v14 = vld [vmem:[%s6821_s0 + $0x8] sm:$0xff]  ;;  %v105_v19 = vld [vmem:[%s6821_s0 + $0x30] sm:$0x1]  ;;  %s4983_s11 = sld [smem:[#allocation2 + $0x3]] }
  0x12   :  { %v103_v11 = vld [vmem:[%s6821_s0 + $0x20] sm:$0xff]  ;;  %152 = vmatpush.msra.mxu0 %v73_v8  ;;  %3819 = vmatpush.msra.mxu2 %v73_v8  ;;  %v104_v15 = vld [vmem:[%s6821_s0 + $0x28] sm:$0xff]  ;;  %v4346_v20 = vld [vmem:[%s6822_s1 + $0x18] sm:$0xff]  ;;  %s4985_s24 = sld [smem:[#allocation2 + $0x83]] }
  0x13   :  { %3824 = vmatpush.msra.mxu3 %v4262_v4  ;;  %215 = vmatpush.msra.mxu1 %v4262_v4  ;;  %v102_v21 = vld [vmem:[%s6821_s0 + $0x18] sm:$0xff]  ;;  %v3860_v27 = vld [vmem:[%s6826_s5] ss:$0 sm:$0xff]  ;;  %v4391_v40 = vld [vmem:[%s6827_s6 + $0x1] ss:$0 sm:$0xff]  ;;  %s4987_s25 = sld [smem:[#allocation2 + $0x103]] }
  0x14   :  { %3433 = vmatmul.msk.f32.vlgmr.msra.gmra.mxu3 %vm116_vm0, %v4271_v6  ;;  %3429 = vmatmul.msk.f32.vlgmr.msra.gmra.mxu1 %vm116_vm0, %v4277_v7  ;;  %v4376_v36 = vld [vmem:[%s6824_s3] ss:$0 sm:$0xff]  ;;  %v4398_v41 = vld [vmem:[%s6827_s6 + $0x2] ss:$0 sm:$0xff]  ;;  %v4403_v42 = vld [vmem:[%s6827_s6 + $0x3] ss:$0 sm:$0xff] }
  0x15   :  { %153 = vmatpush.msra.mxu0 %v72_v9  ;;  %3820 = vmatpush.msra.mxu2 %v72_v9  ;;  %v4386_v39 = vld [vmem:[%s6827_s6] ss:$0 sm:$0xff]  ;;  %v952_v62 = vld [vmem:[%s6829_s8 + $0x18] sm:$0xff]  ;;  %s4992_s28 = sld [smem:[#allocation2 + $0x183]] }
  0x16   :  { %3422 = vmatmul.msk.f32.vlgmr.msra.gmra.mxu0 %vm116_vm0, %v99_v10  ;;  %3426 = vmatmul.msk.f32.vlgmr.msra.gmra.mxu2 %vm116_vm0, %v103_v11  ;;  %s4995_s29 = sld [smem:[#allocation2]] }
  0x17   :  { %s4997_s30 = sld [smem:[#allocation2 + $0x80]] }
  0x18   :  { %s4999_s15 = sld [smem:[#allocation2 + $0x100]] }
  0x19   :  { %s5001_s16 = sld [smem:[#allocation2 + $0x180]] }
  0x1a   :  { %s5003_s17 = sld [smem:[#allocation2 + $0x1]] }
  0x1b   :  { %s5005_s18 = sld [smem:[#allocation2 + $0x81]] }
  0x1c   :  { %3434 = vmatmul.msk.f32.gmra.mxu3 %vm116_vm0, %v4300_v12  ;;  %3430 = vmatmul.msk.f32.gmra.mxu1 %vm116_vm0, %v4305_v13  ;;  %s5010_s20 = sld [smem:[#allocation2 + $0x101]] }
  0x1d   :  { %s5012_s26 = sld [smem:[#allocation2 + $0x181]] }
  0x1e   :  { %3423 = vmatmul.msk.f32.gmra.mxu0 %vm116_vm0, %v100_v14  ;;  %3427 = vmatmul.msk.f32.gmra.mxu2 %vm116_vm0, %v104_v15  ;;  %s5015_s27 = sld [smem:[#allocation4]] }
  0x1f   :  { %s3735_s19 = sld [smem:[#allocation2 + $0x80]] }
  0x24   :  { %3435 = vmatmul.msk.f32.gmra.mxu3 %vm116_vm0, %v4324_v16  ;;  %3431 = vmatmul.msk.f32.gmra.mxu1 %vm116_vm0, %v4329_v17 }
  0x26   :  { %3424 = vmatmul.msk.f32.gmra.mxu0 %vm116_vm0, %v101_v18  ;;  %3428 = vmatmul.msk.f32.gmra.mxu2 %vm116_vm0, %v105_v19 }
  0x2c   :  { %3432 = vmatmul.msk.f32.gmra.mxu1 %vm116_vm0, %v4346_v20 }
  0x2e   :  { %3425 = vmatmul.msk.f32.gmra.mxu0 %vm116_vm0, %v102_v21 }
  0x91   :  { %v217_v22 = vpop.f32.mrf.mxu1 }
  0x92   :  { %v218_v43 = vadd.f32 %v3860_v27, %v217_v22 }
  0x93   :  { %v155_v34 = vpop.f32.mrf.mxu0 }
  0x94   :  { %v156_v38 = vadd.f32 %v4376_v36, %v155_v34  ;;  %v949_v34 = vld [vmem:[%s6829_s8] sm:$0xff] }
  0x96   :  { %v242_v45 = vmul.f32 %v4386_v39, %v156_v38  ;;  %v420_v46 = vmul.f32 %v4391_v40, %v156_v38  ;;  %v576_v47 = vmul.f32 %v4398_v41, %v156_v38  ;;  %v732_v48 = vmul.f32 %v4403_v42, %v156_v38  ;;  %v3539_v38 = vld [vmem:[%s6829_s8 + $0x20] sm:$0xff] }
  0x97   :  { %v229_v23 = vpop.f32.mrf.mxu3 }
  0x98   :  { %v230_v32 = vadd.f32 %v3860_v27, %v229_v23 }
  0x99   :  { %v220_v24 = vpop.f32.mrf.mxu1  ;;  %v167_v63 = vpop.f32.mrf.mxu2 }
  0x9a   :  { %v221_v37 = vadd.f32 %v3860_v27, %v220_v24  ;;  %v168_v10 = vadd.f32 %v4376_v36, %v167_v63 }
  0x9b   :  { %v158_v44 = vpop.f32.mrf.mxu0 }
  0x9c   :  { %v159_v49 = vadd.f32 %v4376_v36, %v158_v44  ;;  %v246_v14 = vmul.f32 %v4386_v39, %v168_v10  ;;  %v424_v15 = vmul.f32 %v4391_v40, %v168_v10  ;;  %v736_v18 = vmul.f32 %v4403_v42, %v168_v10  ;;  %v249_v44 = vld [vmem:[%s6828_s7] sm:$0xff] }
  0x9d   :  { %v580_v19 = vmul.f32 %v4398_v41, %v168_v10 }
  0x9e   :  { %v243_v51 = vmul.f32 %v4386_v39, %v159_v49  ;;  %v421_v52 = vmul.f32 %v4391_v40, %v159_v49  ;;  %v577_v53 = vmul.f32 %v4398_v41, %v159_v49  ;;  %v733_v54 = vmul.f32 %v4403_v42, %v159_v49 }
  0x9f   :  { %v232_v25 = vpop.f32.mrf.mxu3 }
  0xa0   :  { %v233_v30 = vadd.f32 %v3860_v27, %v232_v25 }
  0xa1   :  { %v223_v26 = vpop.f32.mrf.mxu1  ;;  %v170_v11 = vpop.f32.mrf.mxu2 }
  0xa2   :  { %v224_v35 = vadd.f32 %v3860_v27, %v223_v26  ;;  %v171_v21 = vadd.f32 %v4376_v36, %v170_v11 }
  0xa3   :  { %v161_v50 = vpop.f32.mrf.mxu0 }
  0xa4   :  { %v162_v55 = vadd.f32 %v4376_v36, %v161_v50  ;;  %v425_v22 = vmul.f32 %v4391_v40, %v171_v21  ;;  %v247_v23 = vmul.f32 %v4386_v39, %v171_v21  ;;  %v581_v25 = vmul.f32 %v4398_v41, %v171_v21 }
  0xa5   :  { %v737_v26 = vmul.f32 %v4403_v42, %v171_v21 }
  0xa6   :  { %v422_v56 = vmul.f32 %v4391_v40, %v162_v55  ;;  %v244_v57 = vmul.f32 %v4386_v39, %v162_v55  ;;  %v578_v59 = vmul.f32 %v4398_v41, %v162_v55  ;;  %v734_v60 = vmul.f32 %v4403_v42, %v162_v55  ;;  %v250_v55 = vld [vmem:[%s6828_s7 + $0x8] sm:$0xff] }
  0xa7   :  { %v235_v28 = vpop.f32.mrf.mxu3 }
  0xa8   :  { %v236_v29 = vadd.f32 %v3860_v27, %v235_v28 }
  0xa9   :  { %v226_v31 = vpop.f32.mrf.mxu1  ;;  %v173_v24 = vpop.f32.mrf.mxu2 }
  0xaa   :  { %3436 = vmatpush.xpose.msk.msrb.mxu2 %vm116_vm0, %v236_v29  ;;  %3458 = vmatpush.xpose.msk.msrb.mxu3 %vm116_vm0, %v236_v29  ;;  %v227_v33 = vadd.f32 %v3860_v27, %v226_v31  ;;  %v174_v27 = vadd.f32 %v4376_v36, %v173_v24  ;;  %v3453_v24 = vld [vmem:[%s6828_s7 + $0x48] sm:$0xff] }
  0xab   :  { %3480 = vmatpush.xpose.msk.msrb.mxu0 %vm116_vm0, %v236_v29  ;;  %3502 = vmatpush.xpose.msk.msrb.mxu1 %vm116_vm0, %v236_v29  ;;  %v164_v58 = vpop.f32.mrf.mxu0 }
  0xac   :  { %v165_v61 = vadd.f32 %v4376_v36, %v164_v58  ;;  %v426_v28 = vmul.f32 %v4391_v40, %v174_v27  ;;  %v248_v29 = vmul.f32 %v4386_v39, %v174_v27  ;;  %v738_v31 = vmul.f32 %v4403_v42, %v174_v27  ;;  %v3541_v36 = vld [vmem:[%s6829_s8 + $0x30] sm:$0xff] }
  0xae   :  { %3437 = vmatpush.xpose.msk.msrb.mxu2 %vm116_vm0, %v233_v30  ;;  %3459 = vmatpush.xpose.msk.msrb.mxu3 %vm116_vm0, %v233_v30  ;;  %v423_v3 = vmul.f32 %v4391_v40, %v165_v61  ;;  %v245_v5 = vmul.f32 %v4386_v39, %v165_v61  ;;  %v735_v8 = vmul.f32 %v4403_v42, %v165_v61  ;;  %v3473_v39 = vld [vmem:[%s6828_s7 + $0x70] sm:$0xff] }
  0xaf   :  { %3481 = vmatpush.xpose.msk.msrb.mxu0 %vm116_vm0, %v233_v30  ;;  %3503 = vmatpush.xpose.msk.msrb.mxu1 %vm116_vm0, %v233_v30  ;;  %v579_v9 = vmul.f32 %v4398_v41, %v165_v61  ;;  %v582_v30 = vmul.f32 %v4398_v41, %v174_v27 }
  0xb2   :  { %3438 = vmatpush.xpose.msk.msrb.mxu2 %vm116_vm0, %v230_v32  ;;  %3460 = vmatpush.xpose.msk.msrb.mxu3 %vm116_vm0, %v230_v32 }
  0xb3   :  { %3482 = vmatpush.xpose.msk.msrb.mxu0 %vm116_vm0, %v230_v32  ;;  %3504 = vmatpush.xpose.msk.msrb.mxu1 %vm116_vm0, %v230_v32  ;;  %v951_v32 = vld [vmem:[%s6829_s8 + $0x10] sm:$0xff] }
  0xb6   :  { %3439 = vmatpush.xpose.msk.msrb.mxu2 %vm116_vm0, %v227_v33  ;;  %3461 = vmatpush.xpose.msk.msrb.mxu3 %vm116_vm0, %v227_v33 }
  0xb7   :  { %3483 = vmatpush.xpose.msk.msrb.mxu0 %vm116_vm0, %v227_v33  ;;  %3505 = vmatpush.xpose.msk.msrb.mxu1 %vm116_vm0, %v227_v33  ;;  %v950_v33 = vld [vmem:[%s6829_s8 + $0x8] sm:$0xff] }
  0xba   :  { %3440 = vmatpush.xpose.msk.msrb.mxu2 %vm116_vm0, %v224_v35  ;;  %3462 = vmatpush.xpose.msk.msrb.mxu3 %vm116_vm0, %v224_v35 }
  0xbb   :  { %3484 = vmatpush.xpose.msk.msrb.mxu0 %vm116_vm0, %v224_v35  ;;  %3506 = vmatpush.xpose.msk.msrb.mxu1 %vm116_vm0, %v224_v35  ;;  %v3542_v35 = vld [vmem:[%s6829_s8 + $0x38] sm:$0xff] }
  0xbe   :  { %3441 = vmatpush.xpose.msk.msrb.mxu2 %vm116_vm0, %v221_v37  ;;  %3463 = vmatpush.xpose.msk.msrb.mxu3 %vm116_vm0, %v221_v37 }
  0xbf   :  { %3485 = vmatpush.xpose.msk.msrb.mxu0 %vm116_vm0, %v221_v37  ;;  %3507 = vmatpush.xpose.msk.msrb.mxu1 %vm116_vm0, %v221_v37  ;;  %v3540_v37 = vld [vmem:[%s6829_s8 + $0x28] sm:$0xff] }
  0xc2   :  { %3442 = vmatpush.xpose.msk.msrb.mxu2 %vm116_vm0, %v218_v43  ;;  %3464 = vmatpush.xpose.msk.msrb.mxu3 %vm116_vm0, %v218_v43 }
  0xc3   :  { %3486 = vmatpush.xpose.msk.msrb.mxu0 %vm116_vm0, %v218_v43  ;;  %3508 = vmatpush.xpose.msk.msrb.mxu1 %vm116_vm0, %v218_v43 }
  0xc5   :  { %3443 = vmatmul.msk.f32.vlgmr.msrb.gmra.mxu2 %vm116_vm0, %v242_v45  ;;  %3465 = vmatmul.msk.f32.vlgmr.msrb.gmra.mxu3 %vm116_vm0, %v420_v46  ;;  %v3495_v45 = vld [vmem:[%s6828_s7 + $0xa8] sm:$0xff] }
  0xc6   :  { %3487 = vmatmul.msk.f32.vlgmr.msrb.gmra.mxu0 %vm116_vm0, %v576_v47  ;;  %3509 = vmatmul.msk.f32.vlgmr.msrb.gmra.mxu1 %vm116_vm0, %v732_v48 }
  0xc7   :  { %969 = vmatpush.msra.mxu2 %v952_v62  ;;  %1153 = vmatpush.msra.mxu0 %v3542_v35 }
  0xc9   :  { %970 = vmatpush.msra.mxu2 %v951_v32  ;;  %1154 = vmatpush.msra.mxu0 %v3541_v36 }
  0xcb   :  { %971 = vmatpush.msra.mxu2 %v950_v33  ;;  %1155 = vmatpush.msra.mxu0 %v3540_v37 }
  0xcd   :  { %3444 = vmatmul.msk.f32.gmra.mxu2 %vm116_vm0, %v243_v51  ;;  %3466 = vmatmul.msk.f32.gmra.mxu3 %vm116_vm0, %v421_v52  ;;  %v3451_v52 = vld [vmem:[%s6828_s7 + $0x38] sm:$0xff] }
  0xce   :  { %3488 = vmatmul.msk.f32.gmra.mxu0 %vm116_vm0, %v577_v53  ;;  %3510 = vmatmul.msk.f32.gmra.mxu1 %vm116_vm0, %v733_v54 }
  0xcf   :  { %972 = vmatpush.msra.mxu2 %v949_v34  ;;  %1156 = vmatpush.msra.mxu0 %v3539_v38  ;;  %v3454_v34 = vld [vmem:[%s6828_s7 + $0x50] sm:$0xff] }
  0xd5   :  { %3467 = vmatmul.msk.f32.gmra.mxu3 %vm116_vm0, %v422_v56  ;;  %3445 = vmatmul.msk.f32.gmra.mxu2 %vm116_vm0, %v244_v57  ;;  %v3496_v57 = vld [vmem:[%s6828_s7 + $0xb0] sm:$0xff] }
  0xd6   :  { %3489 = vmatmul.msk.f32.gmra.mxu0 %vm116_vm0, %v578_v59  ;;  %3511 = vmatmul.msk.f32.gmra.mxu1 %vm116_vm0, %v734_v60 }
  0xdd   :  { %3468 = vmatmul.msk.f32.gmra.mxu3 %vm116_vm0, %v423_v3  ;;  %3446 = vmatmul.msk.f32.gmra.mxu2 %vm116_vm0, %v245_v5  ;;  %v3474_v5 = vld [vmem:[%s6828_s7 + $0x78] sm:$0xff] }
  0xde   :  { %3512 = vmatmul.msk.f32.gmra.mxu1 %vm116_vm0, %v735_v8  ;;  %3490 = vmatmul.msk.f32.gmra.mxu0 %vm116_vm0, %v579_v9  ;;  %v3452_v8 = vld [vmem:[%s6828_s7 + $0x40] sm:$0xff] }
  0xdf   :  { %v3475_v9 = vld [vmem:[%s6828_s7 + $0x80] sm:$0xff] }
  0xe5   :  { %3447 = vmatmul.msk.f32.gmra.mxu2 %vm116_vm0, %v246_v14  ;;  %3469 = vmatmul.msk.f32.gmra.mxu3 %vm116_vm0, %v424_v15 }
  0xe6   :  { %3513 = vmatmul.msk.f32.gmra.mxu1 %vm116_vm0, %v736_v18  ;;  %3491 = vmatmul.msk.f32.gmra.mxu0 %vm116_vm0, %v580_v19  ;;  %v3567_v18 = vld [vmem:[%s6829_s8 + $0x58] sm:$0xff] }
  0xe7   :  { %1336 = vmatpush.msrb.mxu2 %v3567_v18  ;;  %v3455_v18 = vld [vmem:[%s6828_s7 + $0x58] sm:$0xff] }
  0xed   :  { %3470 = vmatmul.msk.f32.gmra.mxu3 %vm116_vm0, %v425_v22  ;;  %3448 = vmatmul.msk.f32.gmra.mxu2 %vm116_vm0, %v247_v23  ;;  %v3566_v22 = vld [vmem:[%s6829_s8 + $0x50] sm:$0xff] }
  0xee   :  { %3492 = vmatmul.msk.f32.gmra.mxu0 %vm116_vm0, %v581_v25  ;;  %3514 = vmatmul.msk.f32.gmra.mxu1 %vm116_vm0, %v737_v26  ;;  %v3497_v25 = vld [vmem:[%s6828_s7 + $0xb8] sm:$0xff]  ;;  %v3565_v26 = vld [vmem:[%s6829_s8 + $0x48] sm:$0xff] }
  0xef   :  { %1337 = vmatpush.msrb.mxu2 %v3566_v22 }
  0xf1   :  { %1338 = vmatpush.msrb.mxu2 %v3565_v26  ;;  %v3589_v26 = vld [vmem:[%s6829_s8 + $0x60] sm:$0xff] }
  0xf5   :  { %3471 = vmatmul.msk.f32.gmra.mxu3 %vm116_vm0, %v426_v28  ;;  %3449 = vmatmul.msk.f32.gmra.mxu2 %vm116_vm0, %v248_v29 }
  0xf6   :  { %3493 = vmatmul.msk.f32.gmra.mxu0 %vm116_vm0, %v582_v30  ;;  %3515 = vmatmul.msk.f32.gmra.mxu1 %vm116_vm0, %v738_v31  ;;  %v3564_v31 = vld [vmem:[%s6829_s8 + $0x40] sm:$0xff] }
  0xf7   :  { %1339 = vmatpush.msrb.mxu2 %v3564_v31 }
  0xfd   :  { %3519 = vmatmul.msk.f32.vlgmr.msra.gmra.mxu2 %vm116_vm0, %v4277_v7 }
  0xfe   :  { %3544 = vmatmul.msk.f32.vlgmr.msra.gmra.mxu0 %vm116_vm0, %v4277_v7 }
 0x105   :  { %3520 = vmatmul.msk.f32.gmra.mxu2 %vm116_vm0, %v4305_v13 }
 0x106   :  { %3545 = vmatmul.msk.f32.gmra.mxu0 %vm116_vm0, %v4305_v13 }
 0x10d   :  { %3521 = vmatmul.msk.f32.gmra.mxu2 %vm116_vm0, %v4329_v17 }
 0x10e   :  { %3546 = vmatmul.msk.f32.gmra.mxu0 %vm116_vm0, %v4329_v17 }
 0x115   :  { %3522 = vmatmul.msk.f32.gmra.mxu2 %vm116_vm0, %v4346_v20 }
 0x116   :  { %3547 = vmatmul.msk.f32.gmra.mxu0 %vm116_vm0, %v4346_v20 }
 0x11d   :  { %3523 = vmatmul.msk.f32.gmra.mxu2 %vm116_vm0, %v4271_v6 }
 0x11e   :  { %3548 = vmatmul.msk.f32.gmra.mxu0 %vm116_vm0, %v4271_v6 }
 0x125   :  { %3524 = vmatmul.msk.f32.gmra.mxu2 %vm116_vm0, %v4300_v12 }
 0x126   :  { %3549 = vmatmul.msk.f32.gmra.mxu0 %vm116_vm0, %v4300_v12 }
 0x12d   :  { %3525 = vmatmul.msk.f32.gmra.mxu2 %vm116_vm0, %v4324_v16 }
 0x12e   :  { %3550 = vmatmul.msk.f32.gmra.mxu0 %vm116_vm0, %v4324_v16 }
 0x135   :  { %3569 = vmatmul.msk.f32.vlgmr.msrb.gmra.mxu2 %vm116_vm0, %v4277_v7 }
 0x13d   :  { %3570 = vmatmul.msk.f32.gmra.mxu2 %vm116_vm0, %v4305_v13 }
 0x143   :  { %v629_v40 = vpop.f32.mrf.mxu0  ;;  %v785_v41 = vpop.f32.mrf.mxu1 }
 0x144   :  { %v4510_v42 = vadd.f32 %v3473_v39, %v629_v40  ;;  %v4524_v49 = vadd.f32 %v3495_v45, %v785_v41  ;;  %v3498_v40 = vld [vmem:[%s6828_s7 + $0xc0] sm:$0xff] }
 0x145   :  { %3571 = vmatmul.msk.f32.gmra.mxu2 %vm116_vm0, %v4329_v17 }
 0x146   :  { %v650_v43 = vsel %vm336_vm1, %v4510_v42, -inf  ;;  %v806_v54 = vsel %vm336_vm1, %v4524_v49, -inf }
 0x147   :  { %651 = vmax.xlane.f32.xlu1 %v650_v43  ;;  %v251_v43 = vld [vmem:[%s6828_s7 + $0x10] sm:$0xff] }
 0x148   :  { %v315_v46 = vpop.f32.mrf.mxu2  ;;  %v473_v47 = vpop.f32.mrf.mxu3 }
 0x149   :  { %v4520_v48 = vadd.f32 %v315_v46, %v249_v44  ;;  %v4538_v56 = vadd.f32 %v3451_v52, %v473_v47  ;;  %v3499_v46 = vld [vmem:[%s6828_s7 + $0xc8] sm:$0xff] }
 0x14b   :  { %v788_v50 = vpop.f32.mrf.mxu1  ;;  %v337_v51 = vsel %vm336_vm1, %v4520_v48, -inf  ;;  %v632_v53 = vpop.f32.mrf.mxu0  ;;  %v494_v63 = vsel %vm336_vm1, %v4538_v56, -inf }
 0x14c   :  { %338 = vmax.xlane.f32.xlu0 %v337_v51  ;;  %v4547_v61 = vadd.f32 %v3496_v57, %v788_v50  ;;  %v4566_v14 = vadd.f32 %v3474_v5, %v632_v53  ;;  %v253_v5 = vld [vmem:[%s6828_s7 + $0x20] sm:$0xff] }
 0x14d   :  { %3572 = vmatmul.msk.f32.gmra.mxu2 %vm116_vm0, %v4346_v20 }
 0x14e   :  { %v809_v11 = vsel %vm336_vm1, %v4547_v61, -inf  ;;  %v653_v28 = vsel %vm336_vm1, %v4566_v14, -inf }
 0x14f   :  { %807 = vmax.xlane.f32.xlu1 %v806_v54  ;;  %v252_v54 = vld [vmem:[%s6828_s7 + $0x18] sm:$0xff] }
 0x150   :  { %v318_v58 = vpop.f32.mrf.mxu2  ;;  %v476_v59 = vpop.f32.mrf.mxu3 }
 0x151   :  { %v4543_v60 = vadd.f32 %v318_v58, %v250_v55  ;;  %v4568_v15 = vadd.f32 %v3452_v8, %v476_v59  ;;  %v3476_v58 = vld [vmem:[%s6828_s7 + $0x88] sm:$0xff] }
 0x153   :  { %v340_v62 = vsel %vm336_vm1, %v4543_v60, -inf  ;;  %v791_v3 = vpop.f32.mrf.mxu1  ;;  %v635_v10 = vpop.f32.mrf.mxu0  ;;  %v497_v27 = vsel %vm336_vm1, %v4568_v15, -inf }
 0x154   :  { %341 = vmax.xlane.f32.xlu2 %v340_v62  ;;  %495 = vmax.xlane.f32.xlu0 %v494_v63  ;;  %v4573_v21 = vadd.f32 %v3475_v9, %v635_v10  ;;  %v4602_v33 = vadd.f32 %v3497_v25, %v791_v3  ;;  %v3592_v62 = vld [vmem:[%s6829_s8 + $0x78] sm:$0xff]  ;;  %v3591_v63 = vld [vmem:[%s6829_s8 + $0x70] sm:$0xff]  ;;  %v3590_v25 = vld [vmem:[%s6829_s8 + $0x68] sm:$0xff] }
 0x155   :  { %1519 = vmatpush.msrb.mxu0 %v3592_v62  ;;  %3573 = vmatmul.msk.f32.gmra.mxu2 %vm116_vm0, %v4271_v6 }
 0x156   :  { %v656_v30 = vsel %vm336_vm1, %v4573_v21, -inf  ;;  %v812_v37 = vsel %vm336_vm1, %v4602_v33, -inf }
 0x157   :  { %810 = vmax.xlane.f32.xlu1 %v809_v11  ;;  %1520 = vmatpush.msrb.mxu0 %v3591_v63  ;;  %v3501_v63 = vld [vmem:[%s6828_s7 + $0xd8] sm:$0x1] }
 0x158   :  { %v479_v19 = vpop.f32.mrf.mxu3  ;;  %v321_v23 = vpop.f32.mrf.mxu2 }
 0x159   :  { %v4600_v32 = vadd.f32 %v3453_v24, %v479_v19  ;;  %v4630_v50 = vadd.f32 %v321_v23, %v251_v43  ;;  %v3477_v23 = vld [vmem:[%s6828_s7 + $0x90] sm:$0xff]  ;;  %1521 = vmatpush.msrb.mxu0 %v3590_v25  ;;  %v3457_v43 = vld [vmem:[%s6828_s7 + $0x68] sm:$0x1] }
 0x15b   :  { %v794_v29 = vpop.f32.mrf.mxu1  ;;  %v500_v38 = vsel %vm336_vm1, %v4600_v32, -inf  ;;  %v638_v39 = vpop.f32.mrf.mxu0  ;;  %v343_v55 = vsel %vm336_vm1, %v4630_v50, -inf  ;;  %1522 = vmatpush.msrb.mxu0 %v3589_v26 }
 0x15c   :  { %498 = vmax.xlane.f32.xlu2 %v497_v27  ;;  %654 = vmax.xlane.f32.xlu0 %v653_v28  ;;  %v4625_v45 = vadd.f32 %v3498_v40, %v794_v29  ;;  %v4661_v9 = vadd.f32 %v3476_v58, %v638_v39  ;;  %v3478_v28 = vld [vmem:[%s6828_s7 + $0x98] sm:$0xff]  ;;  %v3479_v58 = vld [vmem:[%s6828_s7 + $0xa0] sm:$0x1] }
 0x15d   :  { %1878 = vmatpush.msra.mxu0 %v4240_v0  ;;  %3574 = vmatmul.msk.f32.gmra.mxu2 %vm116_vm0, %v4300_v12 }
 0x15e   :  { %v815_v52 = vsel %vm336_vm1, %v4625_v45, -inf  ;;  %v659_v19 = vsel %vm336_vm1, %v4661_v9, -inf  ;;  %3594 = vmatmul.msk.f32.vlgmr.msrb.gmra.mxu0 %vm116_vm0, %v4277_v7 }
 0x15f   :  { %657 = vmax.xlane.f32.xlu1 %v656_v30  ;;  %1879 = vmatpush.msra.mxu0 %v4245_v1 }
 0x160   :  { %v482_v35 = vpop.f32.mrf.mxu3  ;;  %v324_v41 = vpop.f32.mrf.mxu2 }
 0x161   :  { %v4607_v36 = vadd.f32 %v3454_v34, %v482_v35  ;;  %v4656_v3 = vadd.f32 %v324_v41, %v252_v54  ;;  %1880 = vmatpush.msra.mxu0 %v4252_v2 }
 0x163   :  { %v503_v44 = vsel %vm336_vm1, %v4607_v36, -inf  ;;  %v797_v47 = vpop.f32.mrf.mxu1  ;;  %v641_v57 = vpop.f32.mrf.mxu0  ;;  %v346_v11 = vsel %vm336_vm1, %v4656_v3, -inf  ;;  %1881 = vmatpush.msra.mxu0 %v4262_v4  ;;  %v254_v4 = vld [vmem:[%s6828_s7 + $0x28] sm:$0xff] }
 0x164   :  { %813 = vmax.xlane.f32.xlu2 %v812_v37  ;;  %501 = vmax.xlane.f32.xlu0 %v500_v38  ;;  %v4632_v51 = vadd.f32 %v3499_v46, %v797_v47  ;;  %v4692_v30 = vadd.f32 %v3477_v23, %v641_v57  ;;  %v3456_v37 = vld [vmem:[%s6828_s7 + $0x60] sm:$0xff]  ;;  %v3500_v38 = vld [vmem:[%s6828_s7 + $0xd0] sm:$0xff] }
 0x165   :  { %3575 = vmatmul.msk.f32.gmra.mxu2 %vm116_vm0, %v4324_v16 }
 0x166   :  { %v818_v59 = vsel %vm336_vm1, %v4632_v51, -inf  ;;  %v662_v0 = vsel %vm336_vm1, %v4692_v30, -inf  ;;  %3595 = vmatmul.msk.f32.gmra.mxu0 %vm116_vm0, %v4305_v13 }
 0x167   :  { %504 = vmax.xlane.f32.xlu1 %v503_v44 }
 0x168   :  { %v485_v53 = vpop.f32.mrf.mxu3  ;;  %v327_v8 = vpop.f32.mrf.mxu2 }
 0x169   :  { %v4663_v10 = vadd.f32 %v327_v8, %v253_v5  ;;  %v4687_v27 = vadd.f32 %v3455_v18, %v485_v53 }
 0x16b   :  { %v349_v24 = vsel %vm336_vm1, %v4663_v10, -inf  ;;  %v644_v29 = vpop.f32.mrf.mxu0  ;;  %v506_v35 = vsel %vm336_vm1, %v4687_v27, -inf  ;;  %v800_v39 = vpop.f32.mrf.mxu1 }
 0x16c   :  { %344 = vmax.xlane.f32.xlu2 %v343_v55  ;;  %816 = vmax.xlane.f32.xlu0 %v815_v52  ;;  %v4694_v31 = vadd.f32 %v3478_v28, %v644_v29  ;;  %v4716_v41 = vadd.f32 %v3500_v38, %v800_v39  ;;  %v255_v52 = vld [vmem:[%s6828_s7 + $0x30] sm:$0x1] }
 0x16e   :  { %v665_v7 = vsel %vm336_vm1, %v4694_v31, -inf  ;;  %v821_v46 = vsel %vm336_vm1, %v4716_v41, -inf  ;;  %3596 = vmatmul.msk.f32.gmra.mxu0 %vm116_vm0, %v4329_v17 }
 0x16f   :  { %819 = vmax.xlane.f32.xlu1 %v818_v59 }
 0x170   :  { %v488_v22 = vpop.f32.mrf.mxu3  ;;  %v330_v34 = vpop.f32.mrf.mxu2 }
 0x171   :  { %v4714_v40 = vadd.f32 %v3456_v37, %v488_v22  ;;  %v4743_v13 = vadd.f32 %v330_v34, %v254_v4 }
 0x173   :  { %v509_v47 = vsel %vm336_vm1, %v4714_v40, -inf  ;;  %v352_v57 = vsel %vm336_vm1, %v4743_v13, -inf  ;;  %v647_v59 = vpop.f32.mrf.mxu0  ;;  %v803_v5 = vpop.f32.mrf.mxu1 }
 0x174   :  { %660 = vmax.xlane.f32.xlu2 %v659_v19  ;;  %347 = vmax.xlane.f32.xlu0 %v346_v11  ;;  %v4756_v62 = vadd.f32 %v3479_v58, %v647_v59  ;;  %v4767_v8 = vadd.f32 %v3501_v63, %v803_v5 }
 0x176   :  { %3597 = vmatmul.msk.f32.gmra.mxu0 %vm116_vm0, %v4346_v20  ;;  %v668_v17 = vsel %vm355_vm2, %v4756_v62, -inf  ;;  %v824_v20 = vsel %vm355_vm2, %v4767_v8, -inf }
 0x177   :  { %350 = vmax.xlane.f32.xlu1 %v349_v24 }
 0x178   :  { %v491_v44 = vpop.f32.mrf.mxu3  ;;  %v333_v2 = vpop.f32.mrf.mxu2 }
 0x179   :  { %v4723_v1 = vadd.f32 %v3457_v43, %v491_v44  ;;  %v4741_v54 = vadd.f32 %v333_v2, %v255_v52 }
 0x17b   :  { %v512_v53 = vsel %vm355_vm2, %v4723_v1, -inf  ;;  %v356_v55 = vsel %vm355_vm2, %v4741_v54, -inf  ;;  %v4785_v26 = vpop.f32.mrf.mxu0 }
 0x17c   :  { %507 = vmax.xlane.f32.xlu2 %v506_v35  ;;  %663 = vmax.xlane.f32.xlu0 %v662_v0 }
 0x17e   :  { %3598 = vmatmul.msk.f32.gmra.mxu0 %vm116_vm0, %v4271_v6 }
 0x17f   :  { %666 = vmax.xlane.f32.xlu1 %v665_v7 }
 0x180   :  { %v4777_v11 = vpop.f32.mrf.mxu2 }
 0x183   :  { %v4795_v39 = vpop.f32.mrf.mxu0 }
 0x184   :  { %822 = vmax.xlane.f32.xlu2 %v821_v46  ;;  %510 = vmax.xlane.f32.xlu0 %v509_v47 }
 0x186   :  { %3599 = vmatmul.msk.f32.gmra.mxu0 %vm116_vm0, %v4300_v12 }
 0x187   :  { %513 = vmax.xlane.f32.xlu1 %v512_v53 }
 0x188   :  { %v4779_v18 = vpop.f32.mrf.mxu2 }
 0x18c   :  { %353 = vmax.xlane.f32.xlu2 %v352_v57  ;;  %357 = vmax.xlane.f32.xlu0 %v356_v55  ;;  %v4809_v57 = vpop.f32.mrf.mxu0 }
 0x18e   :  { %3600 = vmatmul.msk.f32.gmra.mxu0 %vm116_vm0, %v4324_v16 }
 0x190   :  { %v4782_v24 = vpop.f32.mrf.mxu2 }
 0x194   :  { %669 = vmax.xlane.f32.xlu2 %v668_v17 }
 0x19c   :  { %825 = vmax.xlane.f32.xlu2 %v824_v20 }
 0x1ba   :  { %v652_v19 = vpop.xlane.xlu1 %651 }
 0x1bb   :  { %v671_v22 = vsub.f32 %v4510_v42, %v652_v19 }
 0x1bd   :  { %v678_v23 = vmul.f32 1.442695, %v671_v22 }
 0x1bf   :  { %3879 = vpow2.f32 %v678_v23  ;;  %v339_v6 = vpop.xlane.xlu0 %338 }
 0x1c0   :  { %v359_v25 = vsub.f32 %v4520_v48, %v339_v6  ;;  %v4793_v48 = vpop.f32.mrf.mxu2 }
 0x1c2   :  { %v366_v12 = vmul.f32 1.442695, %v359_v25  ;;  %v808_v28 = vpop.xlane.xlu1 %807 }
 0x1c3   :  { %v827_v16 = vsub.f32 %v4524_v49, %v808_v28 }
 0x1c4   :  { %3881 = vpow2.f32 %v366_v12  ;;  %v4822_v12 = vpop.f32.mrf.mxu0 }
 0x1c5   :  { %v4788_v29 = vpop.eup %3879  ;;  %v834_v34 = vmul.f32 1.442695, %v827_v16 }
 0x1c6   :  { %v692_v42 = vsel %vm336_vm1, %v4788_v29, 0.0 }
 0x1c7   :  { %3883 = vpow2.f32 %v834_v34  ;;  %693 = vadd.xlane.f32.xlu0 %v692_v42  ;;  %v342_v35 = vpop.xlane.xlu2 %341  ;;  %v496_v37 = vpop.xlane.xlu0 %495 }
 0x1c8   :  { %v515_v38 = vsub.f32 %v4538_v56, %v496_v37  ;;  %v360_v43 = vsub.f32 %v4543_v60, %v342_v35  ;;  %v986_v55 = vpop.f32.mrf.mxu2 }
 0x1ca   :  { %v522_v0 = vmul.f32 1.442695, %v515_v38  ;;  %v811_v7 = vpop.xlane.xlu1 %810  ;;  %v4797_v49 = vpop.eup %3881  ;;  %v368_v2 = vmul.f32 1.442695, %v360_v43 }
 0x1cb   :  { %v828_v44 = vsub.f32 %v4547_v61, %v811_v7  ;;  %v380_v56 = vsel %vm336_vm1, %v4797_v49, 0.0 }
 0x1cc   :  { %3885 = vpow2.f32 %v522_v0 }
 0x1cd   :  { %v4801_v46 = vpop.eup %3883  ;;  %v836_v47 = vmul.f32 1.442695, %v828_v44 }
 0x1ce   :  { %v848_v52 = vsel %vm336_vm1, %v4801_v46, 0.0 }
 0x1cf   :  { %3887 = vpow2.f32 %v836_v47  ;;  %849 = vadd.xlane.f32.xlu1 %v848_v52  ;;  %381 = vadd.xlane.f32.xlu0 %v380_v56  ;;  %v499_v4 = vpop.xlane.xlu2 %498  ;;  %v655_v53 = vpop.xlane.xlu0 %654 }
 0x1d0   :  { %v516_v60 = vsub.f32 %v4568_v15, %v499_v4  ;;  %v672_v61 = vsub.f32 %v4566_v14, %v655_v53  ;;  %3889 = vpow2.f32 %v368_v2  ;;  %v4842_v2 = vpop.f32.mrf.mxu0 }
 0x1d2   :  { %v524_v58 = vmul.f32 1.442695, %v516_v60  ;;  %v680_v59 = vmul.f32 1.442695, %v672_v61  ;;  %v658_v17 = vpop.xlane.xlu1 %657  ;;  %v4811_v63 = vpop.eup %3885 }
 0x1d3   :  { %v673_v5 = vsub.f32 %v4573_v21, %v658_v17  ;;  %v536_v14 = vsel %vm336_vm1, %v4811_v63, 0.0  ;;  %v989_v21 = vpop.f32.mrf.mxu2 }
 0x1d4   :  { %3891 = vpow2.f32 %v524_v58 }
 0x1d5   :  { %v4814_v20 = vpop.eup %3887  ;;  %3893 = vpow2.f32 %v680_v59  ;;  %v682_v19 = vmul.f32 1.442695, %v673_v5 }
 0x1d6   :  { %v851_v15 = vsel %vm336_vm1, %v4814_v20, 0.0  ;;  %v4824_v28 = vpop.eup %3889 }
 0x1d7   :  { %852 = vadd.xlane.f32.xlu2 %v851_v15  ;;  %537 = vadd.xlane.f32.xlu1 %v536_v14  ;;  %v814_v22 = vpop.xlane.xlu2 %813  ;;  %v502_v23 = vpop.xlane.xlu0 %501  ;;  %3895 = vpow2.f32 %v682_v19  ;;  %v383_v0 = vsel %vm336_vm1, %v4824_v28, 0.0 }
 0x1d8   :  { %v829_v6 = vsub.f32 %v4602_v33, %v814_v22  ;;  %v517_v25 = vsub.f32 %v4600_v32, %v502_v23  ;;  %v3866_v32 = vld [vmem:[%s6830_s9] ss:$0 sm:$0xff] }
 0x1d9   :  { %v990_v53 = vadd.f32 %v3866_v32, %v989_v21  ;;  %v987_v15 = vadd.f32 %v3866_v32, %v986_v55  ;;  %v984_v14 = vadd.f32 %v3866_v32, %v4793_v48  ;;  %v1173_v48 = vpop.f32.mrf.mxu0 }
 0x1da   :  { %v4826_v16 = vpop.eup %3891  ;;  %v838_v34 = vmul.f32 1.442695, %v829_v6  ;;  %v526_v42 = vmul.f32 1.442695, %v517_v25  ;;  %v505_v35 = vpop.xlane.xlu1 %504  ;;  %v981_v25 = vadd.f32 %v3866_v32, %v4782_v24  ;;  %v975_v24 = vadd.f32 %v3866_v32, %v4777_v11 }
 0x1db   :  { %v4828_v37 = vpop.eup %3893  ;;  %v518_v38 = vsub.f32 %v4607_v36, %v505_v35  ;;  %v539_v33 = vsel %vm336_vm1, %v4826_v16, 0.0  ;;  %v992_v56 = vpop.f32.mrf.mxu2 }
 0x1dc   :  { %3897 = vpow2.f32 %v838_v34  ;;  %540 = vadd.xlane.f32.xlu0 %v539_v33  ;;  %v695_v7 = vsel %vm336_vm1, %v4828_v37, 0.0  ;;  %v993_v60 = vadd.f32 %v3866_v32, %v992_v56 }
 0x1dd   :  { %3899 = vpow2.f32 %v526_v42  ;;  %v528_v43 = vmul.f32 1.442695, %v518_v38  ;;  %v4844_v4 = vpop.eup %3895  ;;  %v978_v38 = vadd.f32 %v3866_v32, %v4779_v18  ;;  %v3867_v18 = vld [vmem:[%s6830_s9 + $0x1] ss:$0 sm:$0xff] }
 0x1de   :  { %3526 = vmatpush.msk.msra.mxu3 %vm1016_vm3, %v993_v60  ;;  %v698_v19 = vsel %vm336_vm1, %v4844_v4, 0.0 }
 0x1df   :  { %384 = vadd.xlane.f32.xlu2 %v383_v0  ;;  %696 = vadd.xlane.f32.xlu1 %v695_v7  ;;  %v345_v36 = vpop.xlane.xlu2 %344  ;;  %v817_v44 = vpop.xlane.xlu0 %816  ;;  %3901 = vpow2.f32 %v528_v43 }
 0x1e0   :  { %v361_v47 = vsub.f32 %v4630_v50, %v345_v36  ;;  %v830_v52 = vsub.f32 %v4625_v45, %v817_v44  ;;  %1030 = vmatpush.msra.mxu3 %v990_v53 }
 0x1e1   :  { %v1176_v53 = vpop.f32.mrf.mxu0 }
 0x1e2   :  { %v4846_v61 = vpop.eup %3897  ;;  %v370_v58 = vmul.f32 1.442695, %v361_v47  ;;  %v840_v59 = vmul.f32 1.442695, %v830_v52  ;;  %v820_v17 = vpop.xlane.xlu1 %819  ;;  %1031 = vmatpush.msra.mxu3 %v987_v15 }
 0x1e3   :  { %v4848_v5 = vpop.eup %3899  ;;  %v831_v50 = vsub.f32 %v4632_v51, %v820_v17  ;;  %v854_v45 = vsel %vm336_vm1, %v4846_v61, 0.0  ;;  %v4862_v34 = vpop.f32.mrf.mxu2 }
 0x1e4   :  { %3903 = vpow2.f32 %v370_v58  ;;  %855 = vadd.xlane.f32.xlu0 %v854_v45  ;;  %v542_v22 = vsel %vm336_vm1, %v4848_v5, 0.0  ;;  %1032 = vmatpush.msra.mxu3 %v984_v14  ;;  %v1174_v58 = vadd.f32 %v3867_v18, %v1173_v48 }
 0x1e5   :  { %3905 = vpow2.f32 %v840_v59  ;;  %v842_v23 = vmul.f32 1.442695, %v831_v50  ;;  %v4864_v42 = vpop.eup %3901  ;;  %v1177_v59 = vadd.f32 %v3867_v18, %v1176_v53 }
 0x1e6   :  { %1033 = vmatpush.msra.mxu3 %v981_v25  ;;  %v545_v36 = vsel %vm336_vm1, %v4864_v42, 0.0 }
 0x1e7   :  { %699 = vadd.xlane.f32.xlu2 %v698_v19  ;;  %543 = vadd.xlane.f32.xlu1 %v542_v22  ;;  %v661_v51 = vpop.xlane.xlu2 %660  ;;  %v348_v6 = vpop.xlane.xlu0 %347  ;;  %3907 = vpow2.f32 %v842_v23  ;;  %v1171_v19 = vadd.f32 %v3867_v18, %v4842_v2  ;;  %v1168_v22 = vadd.f32 %v3867_v18, %v4822_v12 }
 0x1e8   :  { %v674_v21 = vsub.f32 %v4661_v9, %v661_v51  ;;  %v362_v55 = vsub.f32 %v4656_v3, %v348_v6  ;;  %1034 = vmatpush.msra.mxu3 %v978_v38  ;;  %3551 = vmatpush.msk.msra.mxu1 %vm1016_vm3, %v1177_v59 }
 0x1e9   :  { %v4906_v48 = vpop.f32.mrf.mxu0 }
 0x1ea   :  { %v4866_v35 = vpop.eup %3903  ;;  %v684_v33 = vmul.f32 1.442695, %v674_v21  ;;  %v372_v0 = vmul.f32 1.442695, %v362_v55  ;;  %v351_v7 = vpop.xlane.xlu1 %350  ;;  %1035 = vmatpush.msra.mxu3 %v975_v24  ;;  %1213 = vmatpush.msra.mxu1 %v1174_v58  ;;  %v1165_v21 = vadd.f32 %v3867_v18, %v4809_v57 }
 0x1eb   :  { %v4869_v43 = vpop.eup %3905  ;;  %v363_v9 = vsub.f32 %v4663_v10, %v351_v7  ;;  %v386_v3 = vsel %vm336_vm1, %v4866_v35, 0.0  ;;  %v4884_v56 = vpop.f32.mrf.mxu2 }
 0x1ec   :  { %3909 = vpow2.f32 %v684_v33  ;;  %387 = vadd.xlane.f32.xlu0 %v386_v3  ;;  %v857_v44 = vsel %vm336_vm1, %v4869_v43, 0.0  ;;  %1214 = vmatpush.msra.mxu1 %v1171_v19  ;;  %v1162_v33 = vadd.f32 %v3867_v18, %v4795_v39  ;;  %v1159_v3 = vadd.f32 %v3867_v18, %v4785_v26 }
 0x1ed   :  { %3911 = vpow2.f32 %v372_v0  ;;  %v374_v10 = vmul.f32 1.442695, %v363_v9  ;;  %v4886_v60 = vpop.eup %3907 }
 0x1ee   :  { %v860_v23 = vsel %vm336_vm1, %v4886_v60, 0.0  ;;  %1215 = vmatpush.msra.mxu1 %v1168_v22 }
 0x1ef   :  { %546 = vadd.xlane.f32.xlu2 %v545_v36  ;;  %858 = vadd.xlane.f32.xlu1 %v857_v44  ;;  %v508_v47 = vpop.xlane.xlu2 %507  ;;  %v664_v11 = vpop.xlane.xlu0 %663  ;;  %3913 = vpow2.f32 %v374_v10 }
 0x1f0   :  { %v519_v32 = vsub.f32 %v4687_v27, %v508_v47  ;;  %v675_v52 = vsub.f32 %v4692_v30, %v664_v11  ;;  %1216 = vmatpush.msra.mxu1 %v1165_v21 }
 0x1f1   :  { %v4925_v47 = vpop.f32.mrf.mxu0 }
 0x1f2   :  { %v4888_v17 = vpop.eup %3909  ;;  %v530_v50 = vmul.f32 1.442695, %v519_v32  ;;  %v686_v45 = vmul.f32 1.442695, %v675_v52  ;;  %v667_v15 = vpop.xlane.xlu1 %666  ;;  %1217 = vmatpush.msra.mxu1 %v1162_v33 }
 0x1f3   :  { %v4890_v14 = vpop.eup %3911  ;;  %v701_v27 = vsel %vm336_vm1, %v4888_v17, 0.0  ;;  %v676_v30 = vsub.f32 %v4694_v31, %v667_v15  ;;  %v4904_v2 = vpop.f32.mrf.mxu2 }
 0x1f4   :  { %3915 = vpow2.f32 %v530_v50  ;;  %702 = vadd.xlane.f32.xlu0 %v701_v27  ;;  %v389_v51 = vsel %vm336_vm1, %v4890_v14, 0.0  ;;  %1218 = vmatpush.msra.mxu1 %v1159_v3 }
 0x1f5   :  { %3917 = vpow2.f32 %v686_v45  ;;  %v688_v31 = vmul.f32 1.442695, %v676_v30  ;;  %v4908_v12 = vpop.eup %3913 }
 0x1f6   :  { %v392_v24 = vsel %vm336_vm1, %v4908_v12, 0.0 }
 0x1f7   :  { %861 = vadd.xlane.f32.xlu2 %v860_v23  ;;  %390 = vadd.xlane.f32.xlu1 %v389_v51  ;;  %v823_v6 = vpop.xlane.xlu2 %822  ;;  %v511_v25 = vpop.xlane.xlu0 %510  ;;  %3919 = vpow2.f32 %v688_v31 }
 0x1f8   :  { %v520_v55 = vsub.f32 %v4714_v40, %v511_v25  ;;  %v832_v32 = vsub.f32 %v4716_v41, %v823_v6 }
 0x1f9   :  { %v1530_v15 = vpop.f32.mrf.mxu0 }
 0x1fa   :  { %v4910_v38 = vpop.eup %3915  ;;  %v532_v0 = vmul.f32 1.442695, %v520_v55  ;;  %v514_v7 = vpop.xlane.xlu1 %513  ;;  %v844_v59 = vmul.f32 1.442695, %v832_v32 }
 0x1fb   :  { %v4913_v9 = vpop.eup %3917  ;;  %v521_v57 = vsub.f32 %v4723_v1, %v514_v7  ;;  %v548_v40 = vsel %vm336_vm1, %v4910_v38, 0.0  ;;  %v1350_v18 = vpop.f32.mrf.mxu2  ;;  %v3868_v7 = vld [vmem:[%s6830_s9 + $0x2] ss:$0 sm:$0xff] }
 0x1fc   :  { %549 = vadd.xlane.f32.xlu0 %v548_v40  ;;  %3921 = vpow2.f32 %v532_v0  ;;  %v704_v39 = vsel %vm336_vm1, %v4913_v9, 0.0  ;;  %v1345_v32 = vadd.f32 %v3868_v7, %v4884_v56 }
 0x1fd   :  { %v534_v36 = vmul.f32 1.442695, %v521_v57  ;;  %v4927_v11 = vpop.eup %3919 }
 0x1fe   :  { %6861 = vst [vmem:[#allocation8_spill] sm:$0xff] %v4927_v11 }
 0x1ff   :  { %393 = vadd.xlane.f32.xlu2 %v392_v24  ;;  %705 = vadd.xlane.f32.xlu1 %v704_v39  ;;  %v354_v1 = vpop.xlane.xlu2 %353  ;;  %v358_v44 = vpop.xlane.xlu0 %357  ;;  %3923 = vpow2.f32 %v534_v36 }
 0x200   :  { %v364_v10 = vsub.f32 %v4743_v13, %v354_v1  ;;  %v365_v26 = vsub.f32 %v4741_v54, %v358_v44  ;;  %v707_v13 = vsel %vm336_vm1, %v4927_v11, 0.0 }
 0x201   :  { %v1533_v55 = vpop.f32.mrf.mxu0 }
 0x202   :  { %v376_v52 = vmul.f32 1.442695, %v364_v10  ;;  %v378_v53 = vmul.f32 1.442695, %v365_v26  ;;  %v4930_v58 = vpop.eup %3921  ;;  %v1351_v10 = vadd.f32 %v3868_v7, %v1350_v18  ;;  %v1348_v26 = vadd.f32 %v3868_v7, %v4904_v2 }
 0x203   :  { %6862 = vst [vmem:[#allocation9_spill] sm:$0xff] %v4930_v58  ;;  %v551_v54 = vsel %vm336_vm1, %v4930_v58, 0.0  ;;  %v1353_v45 = vpop.f32.mrf.mxu2 }
 0x204   :  { %3925 = vpow2.f32 %v376_v52  ;;  %v1354_v1 = vadd.f32 %v3868_v7, %v1353_v45  ;;  %v1342_v52 = vadd.f32 %v3868_v7, %v4862_v34 }
 0x205   :  { %3927 = vpow2.f32 %v378_v53  ;;  %v4936_v41 = vpop.eup %3923 }
 0x206   :  { %6863 = vst [vmem:[#allocation10_spill] sm:$0xff] %v4936_v41  ;;  %3929 = vpow2.f32 %v844_v59  ;;  %v554_v51 = vsel %vm355_vm2, %v4936_v41, 0.0  ;;  %v3869_v59 = vld [vmem:[%s6830_s9 + $0x3] ss:$0 sm:$0xff]  ;;  %s5017_s9 = sld [smem:[#allocation4 + $0x1]] }
 0x207   :  { %708 = vadd.xlane.f32.xlu2 %v707_v13  ;;  %552 = vadd.xlane.f32.xlu1 %v551_v54  ;;  %v670_v50 = vpop.xlane.xlu2 %669  ;;  %v1534_v2 = vadd.f32 %v3869_v59, %v1533_v55  ;;  %v1531_v56 = vadd.f32 %v3869_v59, %v1530_v15  ;;  %v1528_v34 = vadd.f32 %v3869_v59, %v4925_v47  ;;  %v5026_v55 = vstv %s4979_s10  ;;  %s3763_s10 = sld [smem:[#allocation2 + $0x103]] }
 0x208   :  { %v677_v30 = vsub.f32 %v4756_v62, %v670_v50  ;;  %v1525_v45 = vadd.f32 %v3869_v59, %v4906_v48  ;;  %v3616_v48 = vld [vmem:[%s6822_s1 + $0x38] sm:$0xff] }
 0x209   :  { %v1536_v44 = vpop.f32.mrf.mxu0  ;;  %3630 = vmatmul.msk.f32.vlgmr.msra.gmra.mxu0 %vm116_vm0, %v3616_v48 }
 0x20a   :  { %v4938_v27 = vpop.eup %3925  ;;  %v690_v23 = vmul.f32 1.442695, %v677_v30  ;;  %v1537_v50 = vadd.f32 %v3869_v59, %v1536_v44  ;;  %v5048_v44 = vstv %s4995_s29  ;;  %s6361_s29 = sld [smem:[#allocation4]] }
 0x20b   :  { %6864 = vst [vmem:[#allocation11_spill] sm:$0xff] %v4938_v27  ;;  %v4941_v19 = vpop.eup %3927  ;;  %v395_v22 = vsel %vm336_vm1, %v4938_v27, 0.0  ;;  %v1356_v31 = vpop.f32.mrf.mxu2 }
 0x20c   :  { %6865 = vst [vmem:[#allocation12_spill] sm:$0xff] %v4941_v19  ;;  %396 = vadd.xlane.f32.xlu0 %v395_v22  ;;  %v398_v6 = vsel %vm355_vm2, %v4941_v19, 0.0  ;;  %v4949_v21 = vpop.eup %3929  ;;  %3931 = vpow2.f32 %v690_v23  ;;  %v1357_v3 = vadd.f32 %v3868_v7, %v1356_v31  ;;  %v3617_v22 = vld [vmem:[%s6822_s1 + $0x40] sm:$0xff]  ;;  %v5023_v31 = vstv %s4977_s22  ;;  %s3719_s22 = sld [smem:[#allocation2 + $0x3]] }
 0x20d   :  { %6866 = vst [vmem:[#allocation13_spill] sm:$0xff] %v4949_v21  ;;  %v863_v0 = vsel %vm336_vm1, %v4949_v21, 0.0 }
 0x20f   :  { %555 = vadd.xlane.f32.xlu2 %v554_v51  ;;  %399 = vadd.xlane.f32.xlu1 %v398_v6  ;;  %v826_v25 = vpop.xlane.xlu2 %825 }
 0x210   :  { %v833_v62 = vsub.f32 %v4767_v8, %v826_v25  ;;  %v5020_v25 = vstv %s4975_s21  ;;  %s3787_s21 = sld [smem:[#allocation2 + $0x182]] }
 0x211   :  { %v1539_v53 = vpop.f32.mrf.mxu0  ;;  %3631 = vmatmul.msk.f32.gmra.mxu0 %vm116_vm0, %v3617_v22 }
 0x212   :  { %v846_v33 = vmul.f32 1.442695, %v833_v62  ;;  %v4957_v57 = vpop.eup %3931  ;;  %v1540_v54 = vadd.f32 %v3869_v59, %v1539_v53  ;;  %v5065_v53 = vstv %s5005_s18 }
 0x213   :  { %6867 = vst [vmem:[#allocation14_spill] sm:$0xff] %v4957_v57  ;;  %v1359_v40 = vpop.f32.mrf.mxu2  ;;  %v710_v8 = vsel %vm355_vm2, %v4957_v57, 0.0 }
 0x214   :  { %3933 = vpow2.f32 %v846_v33  ;;  %864 = vadd.xlane.f32.xlu0 %v863_v0  ;;  %v1360_v24 = vadd.f32 %v3868_v7, %v1359_v40  ;;  %v5029_v33 = vstv %s4981_s23  ;;  %v5032_v0 = vstv %s4983_s11  ;;  %s4154_s11 = smov 96   ;;  %s3788_s23 = sld [smem:[#allocation2 + $0x183]] }
 0x215   :  { %v5036_v40 = vstv %s4985_s24  ;;  %s6324_s24 = sld [smem:[#allocation2 + $0x1]] }
 0x216   :  { %3576 = vmatpush.msk.msrb.mxu3 %vm1016_vm3, %v1360_v24 }
 0x218   :  { %1396 = vmatpush.msrb.mxu3 %v1357_v3  ;;  %v5039_v3 = vstv %s4987_s25  ;;  %s6327_s25 = sld [smem:[#allocation2 + $0x81]] }
 0x219   :  { %v1542_v13 = vpop.f32.mrf.mxu0 }
 0x21a   :  { %v4959_v39 = vpop.eup %3933  ;;  %1397 = vmatpush.msrb.mxu3 %v1354_v1  ;;  %v1543_v18 = vadd.f32 %v3869_v59, %v1542_v13  ;;  %v5045_v1 = vstv %s4992_s28  ;;  %v5068_v59 = vstv %s5010_s20  ;;  %v5071_v13 = vstv %s5012_s26  ;;  %s3563_s20 = sld [smem:[#allocation4 + $0x2]] }
 0x21b   :  { %6868 = vst [vmem:[#allocation15_spill] sm:$0xff] %v4959_v39  ;;  %v866_v36 = vsel %vm355_vm2, %v4959_v39, 0.0  ;;  %s3588_s26 = sld [smem:[#allocation4 + $0x3]] }
 0x21c   :  { %711 = vadd.xlane.f32.xlu0 %v710_v8  ;;  %867 = vadd.xlane.f32.xlu1 %v866_v36  ;;  %v3618_v8 = vld [vmem:[%s6822_s1 + $0x48] sm:$0xff]  ;;  %s6329_s28 = sld [smem:[#allocation2 + $0x101]] }
 0x21d   :  { %1398 = vmatpush.msrb.mxu3 %v1351_v10  ;;  %3601 = vmatpush.msk.msrb.mxu1 %vm1016_vm3, %v1543_v18  ;;  %v5054_v10 = vstv %s4999_s15  ;;  %s6877_s15 = sld [smem:[#allocation16_spill]] }
 0x21e   :  { %3632 = vmatmul.msk.f32.gmra.mxu0 %vm116_vm0, %v3618_v8 }
 0x21f   :  { %1399 = vmatpush.msrb.mxu3 %v1348_v26  ;;  %1579 = vmatpush.msrb.mxu1 %v1540_v54  ;;  %v5057_v26 = vstv %s5001_s16  ;;  %s4153_s16 = smov 32  }
 0x221   :  { %1400 = vmatpush.msrb.mxu3 %v1345_v32  ;;  %1580 = vmatpush.msrb.mxu1 %v1537_v50  ;;  %v5074_v50 = vstv %s5015_s27  ;;  %s3762_s27 = sld [smem:[#allocation2 + $0x102]] }
 0x223   :  { %1401 = vmatpush.msrb.mxu3 %v1342_v52  ;;  %1581 = vmatpush.msrb.mxu1 %v1534_v2  ;;  %v5061_v52 = vstv %s5003_s17 }
 0x225   :  { %1582 = vmatpush.msrb.mxu1 %v1531_v56 }
 0x227   :  { %1583 = vmatpush.msrb.mxu1 %v1528_v34 }
 0x229   :  { %1584 = vmatpush.msrb.mxu1 %v1525_v45 }
 0x23a   :  { %v694_v30 = vpop.xlane.xlu0 %693 }
 0x23b   :  { %3935 = vrcp.f32 %v694_v30 }
 0x241   :  { %v3936_v6 = vpop.eup %3935 }
 0x242   :  { %v850_v47 = vpop.xlane.xlu1 %849  ;;  %v382_v15 = vpop.xlane.xlu0 %381  ;;  %v720_v7 = vmul.f32 %v3936_v6, %v4788_v29  ;;  %v5051_v29 = vstv %s4997_s30  ;;  %s3764_s30 = sld [smem:[#allocation4 + $0x2]] }
 0x243   :  { %3937 = vrcp.f32 %v382_v15 }
 0x244   :  { %3939 = vrcp.f32 %v850_v47  ;;  %v910_v56 = vmul.f32 %v5020_v25, %v720_v7  ;;  %v1092_v45 = vmul.f32 %v5023_v31, %v720_v7  ;;  %v1275_v30 = vmul.f32 %v5026_v55, %v720_v7 }
 0x249   :  { %v3938_v62 = vpop.eup %3937 }
 0x24a   :  { %v853_v23 = vpop.xlane.xlu2 %852  ;;  %v538_v51 = vpop.xlane.xlu1 %537  ;;  %v408_v32 = vmul.f32 %v3938_v62, %v4797_v49  ;;  %v5079_v49 = vstv %s5017_s9  ;;  %s3738_s9 = sld [smem:[#allocation2 + $0x83]] }
 0x24b   :  { %3941 = vrcp.f32 %v538_v51  ;;  %v3940_v36 = vpop.eup %3939 }
 0x24c   :  { %3943 = vrcp.f32 %v853_v23  ;;  %v876_v34 = vmul.f32 %v3940_v36, %v4801_v46  ;;  %v885_v15 = vmul.f32 %v5048_v44, %v408_v32  ;;  %v1067_v22 = vmul.f32 %v5051_v29, %v408_v32 }
 0x24d   :  { %v1250_v23 = vmul.f32 %v5054_v10, %v408_v32  ;;  %v1433_v51 = vmul.f32 %v5057_v26, %v408_v32  ;;  %v3619_v32 = vld [vmem:[%s6822_s1 + $0x50] sm:$0xff] }
 0x24e   :  { %v926_v36 = vmul.f32 %v5032_v0, %v876_v34  ;;  %3633 = vmatmul.msk.f32.gmra.mxu0 %vm116_vm0, %v3619_v32 }
 0x24f   :  { %v541_v24 = vpop.xlane.xlu0 %540 }
 0x250   :  { %3945 = vrcp.f32 %v541_v24 }
 0x251   :  { %v3942_v2 = vpop.eup %3941 }
 0x252   :  { %v385_v54 = vpop.xlane.xlu2 %384  ;;  %v697_v18 = vpop.xlane.xlu1 %696  ;;  %v564_v48 = vmul.f32 %v3942_v2, %v4811_v63  ;;  %v1458_v63 = vmul.f32 %v5029_v33, %v720_v7  ;;  %v1474_v7 = vmul.f32 %v5045_v1, %v876_v34 }
 0x253   :  { %3947 = vrcp.f32 %v385_v54  ;;  %v3944_v47 = vpop.eup %3943  ;;  %v1108_v54 = vmul.f32 %v5036_v40, %v876_v34 }
 0x254   :  { %3949 = vrcp.f32 %v697_v18  ;;  %v894_v6 = vmul.f32 %v5061_v52, %v564_v48  ;;  %v1076_v62 = vmul.f32 %v5065_v53, %v564_v48  ;;  %v1259_v24 = vmul.f32 %v5068_v59, %v564_v48 }
 0x255   :  { %v1442_v8 = vmul.f32 %v5071_v13, %v564_v48  ;;  %v1291_v48 = vmul.f32 %v5039_v3, %v876_v34  ;;  %v5104_v11 = vmul.f32 %v3944_v47, %v4814_v20 }
 0x256   :  { %v3946_v46 = vpop.eup %3945  ;;  %v901_v57 = vadd.f32 %v894_v6, %v885_v15  ;;  %v1083_v39 = vadd.f32 %v1076_v62, %v1067_v22  ;;  %v1266_v21 = vadd.f32 %v1259_v24, %v1250_v23 }
 0x257   :  { %v5096_v18 = vmul.f32 %v3946_v46, %v4826_v16  ;;  %v856_v2 = vpop.xlane.xlu0 %855  ;;  %v1449_v19 = vadd.f32 %v1442_v8, %v1433_v51  ;;  %v1109_v32 = vmul.f32 %v5036_v40, %v5104_v11 }
 0x258   :  { %3951 = vrcp.f32 %v856_v2  ;;  %v917_v15 = vadd.f32 %v910_v56, %v901_v57  ;;  %v1099_v22 = vadd.f32 %v1092_v45, %v1083_v39  ;;  %v1282_v23 = vadd.f32 %v1275_v30, %v1266_v21 }
 0x259   :  { %v3948_v41 = vpop.eup %3947  ;;  %v895_v6 = vmul.f32 %v5061_v52, %v5096_v18  ;;  %v1077_v20 = vmul.f32 %v5065_v53, %v5096_v18  ;;  %v1465_v34 = vadd.f32 %v1458_v63, %v1449_v19  ;;  %v1260_v63 = vmul.f32 %v5068_v59, %v5096_v18 }
 0x25a   :  { %v3950_v16 = vpop.eup %3949  ;;  %v409_v46 = vmul.f32 %v3948_v41, %v4824_v28  ;;  %v700_v27 = vpop.xlane.xlu2 %699  ;;  %v933_v47 = vadd.f32 %v926_v36, %v917_v15  ;;  %v1115_v62 = vadd.f32 %v1108_v54, %v1099_v22  ;;  %v5116_v21 = vadd.f32 %v1291_v48, %v1282_v23 }
 0x25b   :  { %v544_v58 = vpop.xlane.xlu1 %543  ;;  %v721_v51 = vmul.f32 %v3950_v16, %v4828_v37  ;;  %v5123_v19 = vadd.f32 %v1474_v7, %v1465_v34  ;;  %v927_v54 = vmul.f32 %v5032_v0, %v5104_v11 }
 0x25c   :  { %3953 = vrcp.f32 %v544_v58  ;;  %v886_v24 = vmul.f32 %v5048_v44, %v409_v46  ;;  %v1068_v41 = vmul.f32 %v5051_v29, %v409_v46  ;;  %v942_v37 = vadd.f32 %v5074_v50, %v933_v47  ;;  %v3620_v58 = vld [vmem:[%s6822_s1 + $0x58] sm:$0xff] }
 0x25d   :  { %3955 = vrcp.f32 %v700_v27  ;;  %v911_v28 = vmul.f32 %v5020_v25, %v721_v51  ;;  %v1124_v57 = vadd.f32 %v5079_v49, %v1115_v62  ;;  %v1093_v30 = vmul.f32 %v5023_v31, %v721_v51  ;;  %3634 = vmatmul.msk.f32.gmra.mxu0 %vm116_vm0, %v3620_v58 }
 0x25e   :  { %v902_v39 = vadd.f32 %v895_v6, %v886_v24  ;;  %v3952_v56 = vpop.eup %3951  ;;  %v1084_v27 = vadd.f32 %v1077_v20, %v1068_v41  ;;  %v1251_v8 = vmul.f32 %v5054_v10, %v409_v46  ;;  %3527 = vmatmul.msk.f32.vlgmr.msra.gmra.mxu3 %vm336_vm1, %v942_v37  ;;  %v1276_v7 = vmul.f32 %v5026_v55, %v721_v51  ;;  %v4103_v20 = vld [vmem:[%s6823_s2 + $0x18] sm:$0xff] }
 0x25f   :  { %v388_v45 = vpop.xlane.xlu0 %387  ;;  %3552 = vmatmul.msk.f32.vlgmr.msra.gmra.mxu1 %vm336_vm1, %v1124_v57  ;;  %v1434_v6 = vmul.f32 %v5057_v26, %v409_v46  ;;  %1819 = vmatpush.msra.mxu3 %v4103_v20  ;;  %v1292_v24 = vmul.f32 %v5039_v3, %v5104_v11  ;;  %v1443_v37 = vmul.f32 %v5071_v13, %v5096_v18  ;;  %v4104_v46 = vld [vmem:[%s6823_s2 + $0x10] sm:$0xff]  ;;  %v4105_v18 = vld [vmem:[%s6823_s2 + $0x8] sm:$0xff] }
 0x260   :  { %3957 = vrcp.f32 %v388_v45  ;;  %v918_v36 = vadd.f32 %v911_v28, %v902_v39  ;;  %v1100_v2 = vadd.f32 %v1093_v30, %v1084_v27  ;;  %v1267_v48 = vadd.f32 %v1260_v63, %v1251_v8 }
 0x261   :  { %1820 = vmatpush.msra.mxu3 %v4104_v46  ;;  %v878_v45 = vmul.f32 %v3952_v56, %v4846_v61  ;;  %v1450_v27 = vadd.f32 %v1443_v37, %v1434_v6  ;;  %v1475_v56 = vmul.f32 %v5045_v1, %v5104_v11  ;;  %v4106_v11 = vld [vmem:[%s6823_s2] sm:$0xff]  ;;  %s2541_s2 = sld [smem:[#allocation2]] }
 0x262   :  { %v3954_v16 = vpop.eup %3953  ;;  %v547_v15 = vpop.xlane.xlu2 %546  ;;  %v934_v23 = vadd.f32 %v927_v54, %v918_v36  ;;  %v1116_v47 = vadd.f32 %v1109_v32, %v1100_v2  ;;  %v1283_v62 = vadd.f32 %v1276_v7, %v1267_v48  ;;  %v3621_v36 = vld [vmem:[%s6822_s1 + $0x60] sm:$0xff] }
 0x263   :  { %v859_v22 = vpop.xlane.xlu1 %858  ;;  %v3956_v34 = vpop.eup %3955  ;;  %v566_v28 = vmul.f32 %v3954_v16, %v4848_v5  ;;  %3959 = vrcp.f32 %v547_v15  ;;  %v1459_v5 = vmul.f32 %v5029_v33, %v721_v51  ;;  %1821 = vmatpush.msra.mxu3 %v4105_v18  ;;  %v928_v48 = vmul.f32 %v5032_v0, %v878_v45 }
 0x264   :  { %v943_v41 = vadd.f32 %v5074_v50, %v934_v23  ;;  %v1125_v57 = vadd.f32 %v5079_v49, %v1116_v47  ;;  %v5151_v39 = vadd.f32 %v1292_v24, %v1283_v62  ;;  %v722_v30 = vmul.f32 %v3956_v34, %v4844_v4 }
 0x265   :  { %3961 = vrcp.f32 %v859_v22  ;;  %v896_v61 = vmul.f32 %v5061_v52, %v566_v28  ;;  %v1466_v51 = vadd.f32 %v1459_v5, %v1450_v27  ;;  %v1078_v54 = vmul.f32 %v5065_v53, %v566_v28  ;;  %3635 = vmatmul.msk.f32.gmra.mxu0 %vm116_vm0, %v3621_v36  ;;  %1822 = vmatpush.msra.mxu3 %v4106_v11 }
 0x266   :  { %v3958_v58 = vpop.eup %3957  ;;  %3528 = vmatmul.msk.f32.gmra.mxu3 %vm336_vm1, %v943_v41  ;;  %v912_v23 = vmul.f32 %v5020_v25, %v722_v30  ;;  %v1094_v20 = vmul.f32 %v5023_v31, %v722_v30  ;;  %v1110_v47 = vmul.f32 %v5036_v40, %v878_v45  ;;  %v1261_v62 = vmul.f32 %v5068_v59, %v566_v28 }
 0x267   :  { %v410_v8 = vmul.f32 %v3958_v58, %v4866_v35  ;;  %v703_v63 = vpop.xlane.xlu0 %702  ;;  %3553 = vmatmul.msk.f32.gmra.mxu1 %vm336_vm1, %v1125_v57  ;;  %v5173_v7 = vadd.f32 %v1475_v56, %v1466_v51  ;;  %v1444_v24 = vmul.f32 %v5071_v13, %v566_v28  ;;  %v1277_v57 = vmul.f32 %v5026_v55, %v722_v30  ;;  %v3622_v28 = vld [vmem:[%s6822_s1 + $0x68] sm:$0x1] }
 0x268   :  { %3963 = vrcp.f32 %v703_v63  ;;  %v1293_v27 = vmul.f32 %v5039_v3, %v878_v45  ;;  %v1460_v18 = vmul.f32 %v5029_v33, %v722_v30  ;;  %v1476_v56 = vmul.f32 %v5045_v1, %v878_v45 }
 0x269   :  { %v887_v4 = vmul.f32 %v5048_v44, %v410_v8  ;;  %v1069_v35 = vmul.f32 %v5051_v29, %v410_v8  ;;  %v1252_v16 = vmul.f32 %v5054_v10, %v410_v8  ;;  %v1435_v15 = vmul.f32 %v5057_v26, %v410_v8  ;;  %v3960_v34 = vpop.eup %3959 }
 0x26a   :  { %v862_v2 = vpop.xlane.xlu2 %861  ;;  %v567_v63 = vmul.f32 %v3960_v34, %v4864_v42 }
 0x26b   :  { %v391_v32 = vpop.xlane.xlu1 %390  ;;  %v903_v22 = vadd.f32 %v896_v61, %v887_v4  ;;  %v1085_v6 = vadd.f32 %v1078_v54, %v1069_v35  ;;  %v3962_v41 = vpop.eup %3961  ;;  %v1268_v58 = vadd.f32 %v1261_v62, %v1252_v16  ;;  %v1451_v5 = vadd.f32 %v1444_v24, %v1435_v15 }
 0x26c   :  { %3965 = vrcp.f32 %v391_v32  ;;  %v879_v4 = vmul.f32 %v3962_v41, %v4869_v43 }
 0x26d   :  { %3967 = vrcp.f32 %v862_v2  ;;  %v919_v37 = vadd.f32 %v912_v23, %v903_v22  ;;  %v1101_v46 = vadd.f32 %v1094_v20, %v1085_v6  ;;  %v1284_v35 = vadd.f32 %v1277_v57, %v1268_v58  ;;  %3636 = vmatmul.msk.f32.gmra.mxu0 %vm116_vm0, %v3622_v28 }
 0x26e   :  { %v3964_v8 = vpop.eup %3963  ;;  %v1467_v54 = vadd.f32 %v1460_v18, %v1451_v5  ;;  %v897_v22 = vmul.f32 %v5061_v52, %v567_v63  ;;  %v929_v23 = vmul.f32 %v5032_v0, %v879_v4  ;;  %v1262_v6 = vmul.f32 %v5068_v59, %v567_v63 }
 0x26f   :  { %v550_v36 = vpop.xlane.xlu0 %549  ;;  %v935_v61 = vadd.f32 %v928_v48, %v919_v37  ;;  %v1117_v51 = vadd.f32 %v1110_v47, %v1101_v46  ;;  %v723_v32 = vmul.f32 %v3964_v8, %v4888_v17  ;;  %v5198_v15 = vadd.f32 %v1293_v27, %v1284_v35 }
 0x270   :  { %3969 = vrcp.f32 %v550_v36  ;;  %v5200_v11 = vadd.f32 %v1476_v56, %v1467_v54  ;;  %v1079_v17 = vmul.f32 %v5065_v53, %v567_v63  ;;  %v1445_v47 = vmul.f32 %v5071_v13, %v567_v63 }
 0x271   :  { %v944_v2 = vadd.f32 %v5074_v50, %v935_v61  ;;  %v1126_v30 = vadd.f32 %v5079_v49, %v1117_v51  ;;  %v913_v41 = vmul.f32 %v5020_v25, %v723_v32  ;;  %v1095_v37 = vmul.f32 %v5023_v31, %v723_v32 }
 0x272   :  { %v3966_v42 = vpop.eup %3965  ;;  %v394_v48 = vpop.xlane.xlu2 %393  ;;  %v1111_v18 = vmul.f32 %v5036_v40, %v879_v4  ;;  %v1278_v8 = vmul.f32 %v5026_v55, %v723_v32  ;;  %v1461_v36 = vmul.f32 %v5029_v33, %v723_v32  ;;  %v1294_v28 = vmul.f32 %v5039_v3, %v879_v4 }
 0x273   :  { %v706_v16 = vpop.xlane.xlu1 %705  ;;  %v3968_v45 = vpop.eup %3967  ;;  %v411_v43 = vmul.f32 %v3966_v42, %v4890_v14  ;;  %3971 = vrcp.f32 %v394_v48  ;;  %3529 = vmatmul.msk.f32.gmra.mxu3 %vm336_vm1, %v944_v2  ;;  %3554 = vmatmul.msk.f32.gmra.mxu1 %vm336_vm1, %v1126_v30  ;;  %v1477_v56 = vmul.f32 %v5045_v1, %v879_v4 }
 0x274   :  { %3973 = vrcp.f32 %v706_v16  ;;  %v5214_v24 = vmul.f32 %v3968_v45, %v4886_v60 }
 0x275   :  { %v888_v20 = vmul.f32 %v5048_v44, %v411_v43  ;;  %v1070_v34 = vmul.f32 %v5051_v29, %v411_v43  ;;  %v1253_v14 = vmul.f32 %v5054_v10, %v411_v43  ;;  %v1436_v46 = vmul.f32 %v5057_v26, %v411_v43 }
 0x276   :  { %v3970_v62 = vpop.eup %3969  ;;  %v930_v30 = vmul.f32 %v5032_v0, %v5214_v24 }
 0x277   :  { %v568_v57 = vmul.f32 %v3970_v62, %v4910_v38  ;;  %v904_v58 = vadd.f32 %v897_v22, %v888_v20  ;;  %v1086_v27 = vadd.f32 %v1079_v17, %v1070_v34  ;;  %v1269_v5 = vadd.f32 %v1262_v6, %v1253_v14 }
 0x278   :  { %v1452_v63 = vadd.f32 %v1445_v47, %v1436_v46 }
 0x279   :  { %v3972_v60 = vpop.eup %3971  ;;  %v920_v61 = vadd.f32 %v913_v41, %v904_v58  ;;  %v1102_v51 = vadd.f32 %v1095_v37, %v1086_v27  ;;  %v1285_v42 = vadd.f32 %v1278_v8, %v1269_v5  ;;  %v898_v43 = vmul.f32 %v5061_v52, %v568_v57 }
 0x27a   :  { %v3974_v35 = vpop.eup %3973  ;;  %v412_v38 = vmul.f32 %v3972_v60, %v4908_v12  ;;  %v709_v54 = vpop.xlane.xlu2 %708  ;;  %v1468_v48 = vadd.f32 %v1461_v36, %v1452_v63  ;;  %v1080_v17 = vmul.f32 %v5065_v53, %v568_v57  ;;  %v1263_v37 = vmul.f32 %v5068_v59, %v568_v57 }
 0x27b   :  { %v553_v2 = vpop.xlane.xlu1 %552  ;;  %v724_v16 = vmul.f32 %v3974_v35, %v4913_v9  ;;  %v936_v32 = vadd.f32 %v929_v23, %v920_v61  ;;  %v1118_v45 = vadd.f32 %v1111_v18, %v1102_v51  ;;  %v5233_v12 = vadd.f32 %v1294_v28, %v1285_v42 }
 0x27c   :  { %v889_v22 = vmul.f32 %v5048_v44, %v412_v38  ;;  %v1071_v4 = vmul.f32 %v5051_v29, %v412_v38  ;;  %3975 = vrcp.f32 %v553_v2  ;;  %v5239_v47 = vadd.f32 %v1477_v56, %v1468_v48 }
 0x27d   :  { %v945_v6 = vadd.f32 %v5074_v50, %v936_v32  ;;  %v1127_v20 = vadd.f32 %v5079_v49, %v1118_v45  ;;  %v914_v34 = vmul.f32 %v5020_v25, %v724_v16  ;;  %v1096_v14 = vmul.f32 %v5023_v31, %v724_v16  ;;  %v6869_v32 = vld [vmem:[#allocation9_spill] sm:$0xff] }
 0x27e   :  { %v905_v9 = vadd.f32 %v898_v43, %v889_v22  ;;  %v1087_v23 = vadd.f32 %v1080_v17, %v1071_v4  ;;  %v1254_v41 = vmul.f32 %v5054_v10, %v412_v38  ;;  %v1437_v46 = vmul.f32 %v5057_v26, %v412_v38  ;;  %v6870_v4 = vld [vmem:[#allocation11_spill] sm:$0xff] }
 0x27f   :  { %3530 = vmatmul.msk.f32.gmra.mxu3 %vm336_vm1, %v945_v6  ;;  %3555 = vmatmul.msk.f32.gmra.mxu1 %vm336_vm1, %v1127_v20  ;;  %v397_v62 = vpop.xlane.xlu0 %396  ;;  %v1112_v5 = vmul.f32 %v5036_v40, %v5214_v24  ;;  %v1279_v8 = vmul.f32 %v5026_v55, %v724_v16  ;;  %v1446_v63 = vmul.f32 %v5071_v13, %v568_v57 }
 0x280   :  { %3977 = vrcp.f32 %v397_v62  ;;  %v921_v58 = vadd.f32 %v914_v34, %v905_v9  ;;  %v1103_v27 = vadd.f32 %v1096_v14, %v1087_v23  ;;  %v1270_v18 = vadd.f32 %v1263_v37, %v1254_v41  ;;  %v6871_v23 = vld [vmem:[#allocation8_spill] sm:$0xff]  ;;  %v6872_v62 = vld [vmem:[#allocation10_spill] sm:$0xff] }
 0x281   :  { %3979 = vrcp.f32 %v709_v54  ;;  %v1295_v35 = vmul.f32 %v5039_v3, %v5214_v24  ;;  %v1453_v38 = vadd.f32 %v1446_v63, %v1437_v46  ;;  %v1462_v42 = vmul.f32 %v5029_v33, %v724_v16  ;;  %v6873_v46 = vld [vmem:[#allocation12_spill] sm:$0xff] }
 0x282   :  { %v556_v36 = vpop.xlane.xlu2 %555  ;;  %v937_v61 = vadd.f32 %v930_v30, %v921_v58  ;;  %v1119_v51 = vadd.f32 %v1112_v5, %v1103_v27  ;;  %v3976_v28 = vpop.eup %3975  ;;  %v1286_v56 = vadd.f32 %v1279_v8, %v1270_v18  ;;  %v1478_v43 = vmul.f32 %v5045_v1, %v5214_v24 }
 0x283   :  { %v400_v60 = vpop.xlane.xlu1 %399  ;;  %3981 = vrcp.f32 %v556_v36  ;;  %v5258_v30 = vmul.f32 %v3976_v28, %v6869_v32  ;;  %v1469_v45 = vadd.f32 %v1462_v42, %v1453_v38  ;;  %v6874_v28 = vld [vmem:[#allocation13_spill] sm:$0xff] }
 0x284   :  { %3983 = vrcp.f32 %v400_v60  ;;  %v946_v2 = vadd.f32 %v5074_v50, %v937_v61  ;;  %v1128_v54 = vadd.f32 %v5079_v49, %v1119_v51  ;;  %v5255_v48 = vadd.f32 %v1295_v35, %v1286_v56 }
 0x285   :  { %v5267_v16 = vadd.f32 %v1478_v43, %v1469_v45  ;;  %v899_v37 = vmul.f32 %v5061_v52, %v5258_v30  ;;  %v1081_v27 = vmul.f32 %v5065_v53, %v5258_v30 }
 0x286   :  { %v3978_v57 = vpop.eup %3977 }
 0x287   :  { %v3980_v22 = vpop.eup %3979  ;;  %v5263_v17 = vmul.f32 %v3978_v57, %v6870_v4  ;;  %3531 = vmatmul.msk.f32.gmra.mxu3 %vm336_vm1, %v946_v2  ;;  %3556 = vmatmul.msk.f32.gmra.mxu1 %vm336_vm1, %v1128_v54  ;;  %v865_v6 = vpop.xlane.xlu0 %864 }
 0x288   :  { %3985 = vrcp.f32 %v865_v6  ;;  %v5274_v14 = vmul.f32 %v3980_v22, %v6871_v23  ;;  %v6875_v6 = vld [vmem:[#allocation15_spill] sm:$0xff] }
 0x289   :  { %v3982_v20 = vpop.eup %3981  ;;  %v890_v34 = vmul.f32 %v5048_v44, %v5263_v17  ;;  %v1072_v9 = vmul.f32 %v5051_v29, %v5263_v17 }
 0x28a   :  { %v3984_v24 = vpop.eup %3983  ;;  %v5277_v41 = vmul.f32 %v3982_v20, %v6872_v62  ;;  %v915_v51 = vmul.f32 %v5020_v25, %v5274_v14 }
 0x28b   :  { %v5282_v58 = vmul.f32 %v3984_v24, %v6873_v46  ;;  %v906_v5 = vadd.f32 %v899_v37, %v890_v34  ;;  %v1088_v63 = vadd.f32 %v1081_v27, %v1072_v9  ;;  %v6876_v34 = vld [vmem:[#allocation14_spill] sm:$0xff] }
 0x28c   :  { %v900_v18 = vmul.f32 %v5061_v52, %v5277_v41  ;;  %v1082_v8 = vmul.f32 %v5065_v53, %v5277_v41  ;;  %v1097_v52 = vmul.f32 %v5023_v31, %v5274_v14 }
 0x28d   :  { %v891_v36 = vmul.f32 %v5048_v44, %v5282_v58  ;;  %v1073_v60 = vmul.f32 %v5051_v29, %v5282_v58  ;;  %v922_v54 = vadd.f32 %v915_v51, %v906_v5 }
 0x28e   :  { %v3986_v61 = vpop.eup %3985  ;;  %v1104_v29 = vadd.f32 %v1097_v52, %v1088_v63 }
 0x28f   :  { %v5297_v56 = vmul.f32 %v3986_v61, %v6874_v28  ;;  %v868_v35 = vpop.xlane.xlu1 %867  ;;  %v712_v38 = vpop.xlane.xlu0 %711  ;;  %v907_v53 = vadd.f32 %v900_v18, %v891_v36  ;;  %v1089_v2 = vadd.f32 %v1082_v8, %v1073_v60  ;;  %v1255_v60 = vmul.f32 %v5054_v10, %v5263_v17 }
 0x290   :  { %3987 = vrcp.f32 %v868_v35  ;;  %v5345_v36 = vpop.f32.mrf.mxu0  ;;  %v1447_v61 = vmul.f32 %v5071_v13, %v5258_v30 }
 0x291   :  { %3989 = vrcp.f32 %v712_v38  ;;  %v931_v44 = vmul.f32 %v5032_v0, %v5297_v56  ;;  %v1113_v42 = vmul.f32 %v5036_v40, %v5297_v56  ;;  %v1296_v52 = vmul.f32 %v5039_v3, %v5297_v56 }
 0x293   :  { %v938_v57 = vadd.f32 %v931_v44, %v922_v54  ;;  %v1120_v32 = vadd.f32 %v1113_v42, %v1104_v29  ;;  %v1265_v54 = vmul.f32 %v5068_v59, %v5277_v41 }
 0x295   :  { %v947_v45 = vadd.f32 %v5074_v50, %v938_v57  ;;  %v1129_v43 = vadd.f32 %v5079_v49, %v1120_v32 }
 0x296   :  { %v3988_v22 = vpop.eup %3987 }
 0x297   :  { %v3990_v4 = vpop.eup %3989  ;;  %3532 = vmatmul.msk.f32.gmra.mxu3 %vm336_vm1, %v947_v45  ;;  %3557 = vmatmul.msk.f32.gmra.mxu1 %vm336_vm1, %v1129_v43  ;;  %v5310_v20 = vmul.f32 %v3988_v22, %v6875_v6  ;;  %v5411_v45 = vld [vmem:[%s6833_s12 + $0x60] sm:$0xff] }
 0x298   :  { %v726_v9 = vmul.f32 %v3990_v4, %v6876_v34  ;;  %v5361_v28 = vpop.f32.mrf.mxu0  ;;  %v5423_v4 = vld [vmem:[%s6833_s12 + $0x58] sm:$0xff] }
 0x299   :  { %v932_v37 = vmul.f32 %v5032_v0, %v5310_v20  ;;  %v1114_v27 = vmul.f32 %v5036_v40, %v5310_v20  ;;  %v1297_v43 = vmul.f32 %v5039_v3, %v5310_v20  ;;  %v1480_v22 = vmul.f32 %v5045_v1, %v5310_v20 }
 0x29a   :  { %v916_v24 = vmul.f32 %v5020_v25, %v726_v9  ;;  %v1098_v23 = vmul.f32 %v5023_v31, %v726_v9  ;;  %v5323_v25 = vstv %s3563_s20  ;;  %v5325_v31 = vstv %s3588_s26  ;;  %s3760_s20 = sld [smem:[#allocation2 + $0x100]] }
 0x29b   :  { %v1307_v0 = vadd.f32 %v5323_v25, %v5116_v21  ;;  %v1490_v40 = vadd.f32 %v5325_v31, %v5123_v19  ;;  %v1309_v21 = vadd.f32 %v5323_v25, %v5198_v15  ;;  %v1492_v19 = vadd.f32 %v5325_v31, %v5200_v11  ;;  %s3737_s26 = sld [smem:[#allocation2 + $0x82]] }
 0x29c   :  { %v923_v62 = vadd.f32 %v916_v24, %v907_v53  ;;  %v1105_v46 = vadd.f32 %v1098_v23, %v1089_v2  ;;  %v1438_v15 = vmul.f32 %v5057_v26, %v5263_v17  ;;  %v1264_v11 = vmul.f32 %v5068_v59, %v5258_v30  ;;  %v5390_v59 = vld [vmem:[%s6833_s12 + $0x78] sm:$0xff]  ;;  %v5443_v23 = vld [vmem:[%s6833_s12 + $0x40] sm:$0xff] }
 0x29d   :  { %v1463_v17 = vmul.f32 %v5029_v33, %v5274_v14  ;;  %v1311_v35 = vadd.f32 %v5323_v25, %v5255_v48  ;;  %v1494_v38 = vadd.f32 %v5325_v31, %v5267_v16  ;;  %v1479_v30 = vmul.f32 %v5045_v1, %v5297_v56  ;;  %1724 = vmatpush.msra.mxu2 %v5390_v59  ;;  %v5435_v1 = vld [vmem:[%s6833_s12 + $0x48] sm:$0xff] }
 0x29e   :  { %v939_v5 = vadd.f32 %v932_v37, %v923_v62  ;;  %v1121_v18 = vadd.f32 %v1114_v27, %v1105_v46  ;;  %v1454_v51 = vadd.f32 %v1447_v61, %v1438_v15  ;;  %v1256_v48 = vmul.f32 %v5054_v10, %v5282_v58  ;;  %v5395_v10 = vld [vmem:[%s6833_s12 + $0x70] sm:$0xff]  ;;  %v5451_v62 = vld [vmem:[%s6833_s12 + $0x38] sm:$0xff]  ;;  %v4107_v15 = vld [vmem:[%s6826_s5] ss:$0 sm:$0xff]  ;;  %s3785_s5 = sld [smem:[#allocation2 + $0x180]] }
 0x29f   :  { %v1439_v16 = vmul.f32 %v5057_v26, %v5282_v58  ;;  %v1281_v29 = vmul.f32 %v5026_v55, %v726_v9  ;;  %v1464_v42 = vmul.f32 %v5029_v33, %v726_v9  ;;  %1725 = vmatpush.msra.mxu2 %v5395_v10  ;;  %v5429_v9 = vld [vmem:[%s6833_s12 + $0x50] sm:$0xff]  ;;  %v3609_v27 = vld [vmem:[%s6821_s0 + $0x38] sm:$0xff] }
 0x2a0   :  { %v948_v8 = vadd.f32 %v5074_v50, %v939_v5  ;;  %v1130_v63 = vadd.f32 %v5079_v49, %v1121_v18  ;;  %v1308_v50 = vadd.f32 %v5323_v25, %v5151_v39  ;;  %v1491_v49 = vadd.f32 %v5325_v31, %v5173_v7  ;;  %v5461_v5 = vld [vmem:[%s6833_s12 + $0x30] sm:$0xff]  ;;  %v85_v18 = vld [vmem:[%s6833_s12 + $0x28] sm:$0xff] }
 0x2a1   :  { %v1310_v39 = vadd.f32 %v5323_v25, %v5233_v12  ;;  %v1493_v7 = vadd.f32 %v5325_v31, %v5239_v47  ;;  %v1271_v12 = vadd.f32 %v1264_v11, %v1255_v60  ;;  %v1280_v47 = vmul.f32 %v5026_v55, %v5274_v14  ;;  %v5403_v55 = vld [vmem:[%s6833_s12 + $0x68] sm:$0xff] }
 0x2a2   :  { %3533 = vmatmul.msk.f32.gmra.mxu3 %vm336_vm1, %v948_v8  ;;  %3558 = vmatmul.msk.f32.gmra.mxu1 %vm336_vm1, %v1130_v63  ;;  %v1470_v2 = vadd.f32 %v1463_v17, %v1454_v51  ;;  %v1448_v14 = vmul.f32 %v5071_v13, %v5277_v41  ;;  %v1272_v26 = vadd.f32 %v1265_v54, %v1256_v48  ;;  %v5398_v41 = vpop.f32.mrf.mxu0  ;;  %v84_v8 = vld [vmem:[%s6833_s12 + $0x20] sm:$0xff]  ;;  %v83_v63 = vld [vmem:[%s6833_s12 + $0x18] sm:$0xff]  ;;  %v3611_v60 = vld [vmem:[%s6821_s0 + $0x48] sm:$0xff] }
 0x2a3   :  { %v1287_v53 = vadd.f32 %v1280_v47, %v1271_v12  ;;  %1726 = vmatpush.msra.mxu2 %v5403_v55  ;;  %v3612_v47 = vld [vmem:[%s6821_s0 + $0x50] sm:$0xff]  ;;  %v1884_v54 = vadd.f32 %v4107_v15, %v5345_v36 }
 0x2a4   :  { %v1486_v56 = vadd.f32 %v1479_v30, %v1470_v2  ;;  %v1455_v13 = vadd.f32 %v1448_v14, %v1439_v16  ;;  %v1288_v57 = vadd.f32 %v1281_v29, %v1272_v26  ;;  %v3613_v30 = vld [vmem:[%s6821_s0 + $0x58] sm:$0xff]  ;;  %v3615_v14 = vld [vmem:[%s6821_s0 + $0x68] sm:$0x1] }
 0x2a5   :  { %v1303_v44 = vadd.f32 %v1296_v52, %v1287_v53  ;;  %1727 = vmatpush.msra.mxu2 %v5411_v45  ;;  %v1887_v53 = vadd.f32 %v4107_v15, %v5361_v28  ;;  %v3614_v28 = vld [vmem:[%s6821_s0 + $0x60] sm:$0xff] }
 0x2a6   :  { %v1495_v58 = vadd.f32 %v5325_v31, %v1486_v56  ;;  %v1471_v32 = vadd.f32 %v1464_v42, %v1455_v13  ;;  %v1304_v6 = vadd.f32 %v1297_v43, %v1288_v57 }
 0x2a7   :  { %v1312_v33 = vadd.f32 %v5323_v25, %v1303_v44  ;;  %1728 = vmatpush.msra.mxu2 %v5423_v4 }
 0x2a8   :  { %v1487_v34 = vadd.f32 %v1480_v22, %v1471_v32  ;;  %v1313_v20 = vadd.f32 %v5323_v25, %v1304_v6 }
 0x2a9   :  { %1729 = vmatpush.msra.mxu2 %v5429_v9 }
 0x2aa   :  { %3577 = vmatmul.msk.f32.vlgmr.msrb.gmra.mxu3 %vm336_vm1, %v1307_v0  ;;  %3602 = vmatmul.msk.f32.vlgmr.msrb.gmra.mxu1 %vm336_vm1, %v1490_v40  ;;  %v1496_v24 = vadd.f32 %v5325_v31, %v1487_v34  ;;  %v82_v31 = vld [vmem:[%s6833_s12 + $0x10] sm:$0xff] }
 0x2ab   :  { %1730 = vmatpush.msra.mxu2 %v5435_v1 }
 0x2ad   :  { %1731 = vmatpush.msra.mxu2 %v5443_v23 }
 0x2af   :  { %1732 = vmatpush.msra.mxu2 %v5451_v62 }
 0x2b1   :  { %1733 = vmatpush.msra.mxu2 %v5461_v5 }
 0x2b2   :  { %3578 = vmatmul.msk.f32.gmra.mxu3 %vm336_vm1, %v1308_v50  ;;  %3603 = vmatmul.msk.f32.gmra.mxu1 %vm336_vm1, %v1491_v49  ;;  %v3610_v49 = vld [vmem:[%s6821_s0 + $0x40] sm:$0xff]  ;;  %s4155_s0 = smov 64  }
 0x2b3   :  { %1734 = vmatpush.msra.mxu2 %v85_v18 }
 0x2b5   :  { %1735 = vmatpush.msra.mxu2 %v84_v8 }
 0x2b7   :  { %1736 = vmatpush.msra.mxu2 %v83_v63 }
 0x2b9   :  { %1737 = vmatpush.msra.mxu2 %v82_v31 }
 0x2ba   :  { %3579 = vmatmul.msk.f32.gmra.mxu3 %vm336_vm1, %v1309_v21  ;;  %3604 = vmatmul.msk.f32.gmra.mxu1 %vm336_vm1, %v1492_v19  ;;  %v81_v19 = vld [vmem:[%s6833_s12 + $0x8] sm:$0xff] }
 0x2bb   :  { %1738 = vmatpush.msra.mxu2 %v81_v19 }
 0x2c2   :  { %3580 = vmatmul.msk.f32.gmra.mxu3 %vm336_vm1, %v1310_v39  ;;  %3605 = vmatmul.msk.f32.gmra.mxu1 %vm336_vm1, %v1493_v7  ;;  %v80_v39 = vld [vmem:[%s6833_s12] sm:$0xff] }
 0x2c3   :  { %1739 = vmatpush.msra.mxu2 %v80_v39 }
 0x2ca   :  { %3581 = vmatmul.msk.f32.gmra.mxu3 %vm336_vm1, %v1311_v35  ;;  %3606 = vmatmul.msk.f32.gmra.mxu1 %vm336_vm1, %v1494_v38  ;;  %v1890_v38 = vadd.f32 %v4107_v15, %v5398_v41 }
 0x2cb   :  { %v1892_v3 = vpop.f32.mrf.mxu0 }
 0x2cc   :  { %v1893_v17 = vadd.f32 %v4107_v15, %v1892_v3 }
 0x2d2   :  { %3582 = vmatmul.msk.f32.gmra.mxu3 %vm336_vm1, %v1312_v33  ;;  %3607 = vmatmul.msk.f32.gmra.mxu1 %vm336_vm1, %v1495_v58 }
 0x2da   :  { %3583 = vmatmul.msk.f32.gmra.mxu3 %vm336_vm1, %v1313_v20  ;;  %3608 = vmatmul.msk.f32.gmra.mxu1 %vm336_vm1, %v1496_v24  ;;  %v1895_v46 = vpop.f32.mrf.mxu0 }
 0x2db   :  { %v1896_v51 = vadd.f32 %v4107_v15, %v1895_v46 }
 0x2dc   :  { %v1220_v37 = vpop.f32.mrf.mxu1 }
 0x2dd   :  { %v1241_v0 = vmax.f32 %v1220_v37, 0.0 }
 0x2e1   :  { %v5494_v61 = vpop.f32.mrf.mxu3 }
 0x2e2   :  { %3623 = vmatmul.msk.f32.vlgmr.msra.gmra.mxu3 %vm116_vm0, %v3609_v27  ;;  %v1898_v50 = vpop.f32.mrf.mxu0 }
 0x2e3   :  { %v1899_v12 = vadd.f32 %v4107_v15, %v1898_v50 }
 0x2e4   :  { %v1223_v25 = vpop.f32.mrf.mxu1 }
 0x2e5   :  { %v1242_v40 = vmax.f32 %v1223_v25, 0.0 }
 0x2e7   :  { %v3830_v21 = vpack.i.bf16 %v1242_v40, %v1241_v0 }
 0x2e9   :  { %3831 = vrot.lane.b32.xlu2 %v3830_v21, %s4153_s16  ;;  %v5512_v35 = vpop.f32.mrf.mxu3 }
 0x2ea   :  { %3624 = vmatmul.msk.f32.gmra.mxu3 %vm116_vm0, %v3610_v49  ;;  %v1901_v7 = vpop.f32.mrf.mxu0 }
 0x2eb   :  { %v1902_v11 = vadd.f32 %v4107_v15, %v1901_v7 }
 0x2ed   :  { %3637 = vmatpush.xpose.msk.msra.mxu1 %vm116_vm0, %v1902_v11  ;;  %3659 = vmatpush.xpose.msk.msrb.mxu2 %vm116_vm0, %v1902_v11 }
 0x2ee   :  { %3703 = vmatpush.xpose.msk.msrb.mxu0 %vm116_vm0, %v1902_v11  ;;  %3681 = vmatpush.xpose.msk.msrb.mxu3 %vm116_vm0, %v1902_v11 }
 0x2f0   :  { %v1226_v52 = vpop.f32.mrf.mxu1 }
 0x2f1   :  { %3638 = vmatpush.xpose.msk.msra.mxu1 %vm116_vm0, %v1899_v12  ;;  %3660 = vmatpush.xpose.msk.msrb.mxu2 %vm116_vm0, %v1899_v12  ;;  %v1243_v37 = vmax.f32 %v1226_v52, 0.0  ;;  %v5584_v52 = vld [vmem:[%s6827_s6 + $0x3] ss:$0 sm:$0xff] }
 0x2f2   :  { %3625 = vmatmul.msk.f32.gmra.mxu3 %vm116_vm0, %v3611_v60  ;;  %3704 = vmatpush.xpose.msk.msrb.mxu0 %vm116_vm0, %v1899_v12 }
 0x2f3   :  { %3682 = vmatpush.xpose.msk.msrb.mxu3 %vm116_vm0, %v1899_v12 }
 0x2f5   :  { %3639 = vmatpush.xpose.msk.msra.mxu1 %vm116_vm0, %v1896_v51  ;;  %3661 = vmatpush.xpose.msk.msrb.mxu2 %vm116_vm0, %v1896_v51 }
 0x2f6   :  { %3705 = vmatpush.xpose.msk.msrb.mxu0 %vm116_vm0, %v1896_v51  ;;  %v5528_v2 = vpop.f32.mrf.mxu3 }
 0x2f7   :  { %3683 = vmatpush.xpose.msk.msrb.mxu3 %vm116_vm0, %v1896_v51 }
 0x2f9   :  { %3640 = vmatpush.xpose.msk.msra.mxu1 %vm116_vm0, %v1893_v17  ;;  %3662 = vmatpush.xpose.msk.msrb.mxu2 %vm116_vm0, %v1893_v17 }
 0x2fa   :  { %3626 = vmatmul.msk.f32.gmra.mxu3 %vm116_vm0, %v3612_v47  ;;  %3706 = vmatpush.xpose.msk.msrb.mxu0 %vm116_vm0, %v1893_v17 }
 0x2fb   :  { %3684 = vmatpush.xpose.msk.msrb.mxu3 %vm116_vm0, %v1893_v17  ;;  %v3870_v17 = vld [vmem:[%s6827_s6] ss:$0 sm:$0xff] }
 0x2fc   :  { %v1229_v48 = vpop.f32.mrf.mxu1 }
 0x2fd   :  { %3641 = vmatpush.xpose.msk.msra.mxu1 %vm116_vm0, %v1890_v38  ;;  %3663 = vmatpush.xpose.msk.msrb.mxu2 %vm116_vm0, %v1890_v38  ;;  %v1244_v20 = vmax.f32 %v1229_v48, 0.0 }
 0x2fe   :  { %3707 = vmatpush.xpose.msk.msrb.mxu0 %vm116_vm0, %v1890_v38 }
 0x2ff   :  { %3685 = vmatpush.xpose.msk.msrb.mxu3 %vm116_vm0, %v1890_v38  ;;  %v3840_v18 = vpack.i.bf16 %v1244_v20, %v1243_v37  ;;  %v5579_v38 = vld [vmem:[%s6827_s6 + $0x2] ss:$0 sm:$0xff] }
 0x301   :  { %3642 = vmatpush.xpose.msk.msra.mxu1 %vm116_vm0, %v1887_v53  ;;  %3664 = vmatpush.xpose.msk.msrb.mxu2 %vm116_vm0, %v1887_v53 }
 0x302   :  { %3627 = vmatmul.msk.f32.gmra.mxu3 %vm116_vm0, %v3613_v30  ;;  %3708 = vmatpush.xpose.msk.msrb.mxu0 %vm116_vm0, %v1887_v53  ;;  %v5543_v36 = vpop.f32.mrf.mxu3 }
 0x303   :  { %3686 = vmatpush.xpose.msk.msrb.mxu3 %vm116_vm0, %v1887_v53  ;;  %v4108_v53 = vld [vmem:[%s6824_s3] ss:$0 sm:$0xff] }
 0x304   :  { %v1232_v16 = vpop.f32.mrf.mxu1 }
 0x305   :  { %3643 = vmatpush.xpose.msk.msra.mxu1 %vm116_vm0, %v1884_v54  ;;  %3665 = vmatpush.xpose.msk.msrb.mxu2 %vm116_vm0, %v1884_v54  ;;  %v1245_v8 = vmax.f32 %v1232_v16, 0.0 }
 0x306   :  { %3709 = vmatpush.xpose.msk.msrb.mxu0 %vm116_vm0, %v1884_v54 }
 0x307   :  { %3687 = vmatpush.xpose.msk.msrb.mxu3 %vm116_vm0, %v1884_v54 }
 0x30a   :  { %3628 = vmatmul.msk.f32.gmra.mxu3 %vm116_vm0, %v3614_v28  ;;  %v5550_v44 = vpop.f32.mrf.mxu3 }
 0x312   :  { %3629 = vmatmul.msk.f32.gmra.mxu3 %vm116_vm0, %v3615_v14 }
 0x314   :  { %v1235_v56 = vpop.f32.mrf.mxu1 }
 0x315   :  { %v1246_v0 = vmax.f32 %v1235_v56, 0.0 }
 0x31a   :  { %v5552_v29 = vpop.f32.mrf.mxu3 }
 0x31f   :  { %v1238_v42 = vpop.f32.mrf.mxu1 }
 0x320   :  { %v1247_v21 = vmax.f32 %v1238_v42, 0.0 }
 0x325   :  { %v5554_v26 = vpop.f32.mrf.mxu3 }
 0x327   :  { %v1586_v13 = vpop.f32.mrf.mxu1 }
 0x328   :  { %v1607_v41 = vmax.f32 %v1586_v13, 0.0 }
 0x32a   :  { %1677 = vrot.lane.b32.xlu1 %v1607_v41, %s4154_s11 }
 0x32d   :  { %v1403_v33 = vpop.f32.mrf.mxu3 }
 0x32e   :  { %v1424_v43 = vmax.f32 %v1403_v33, 0.0 }
 0x32f   :  { %v1589_v58 = vpop.f32.mrf.mxu1 }
 0x330   :  { %v1608_v57 = vmax.f32 %v1589_v58, 0.0 }
 0x332   :  { %1679 = vrot.lane.b32.xlu2 %v1608_v57, %s4154_s11 }
 0x335   :  { %v1406_v32 = vpop.f32.mrf.mxu3 }
 0x336   :  { %v1425_v22 = vmax.f32 %v1406_v32, 0.0 }
 0x337   :  { %v1592_v6 = vpop.f32.mrf.mxu1 }
 0x338   :  { %v3835_v34 = vpack.i.bf16 %v1425_v22, %v1424_v43  ;;  %v1609_v3 = vmax.f32 %v1592_v6, 0.0 }
 0x33a   :  { %1681 = vrot.lane.b32.xlu1 %v1609_v3, %s4154_s11  ;;  %3836 = vrot.lane.b32.xlu0 %v3835_v34, %s4155_s0 }
 0x33d   :  { %v1409_v24 = vpop.f32.mrf.mxu3 }
 0x33e   :  { %v1426_v46 = vmax.f32 %v1409_v24, 0.0 }
 0x33f   :  { %v1595_v27 = vpop.f32.mrf.mxu1 }
 0x340   :  { %1653 = vrot.lane.b32.xlu2 %v1426_v46, %s4155_s0  ;;  %v1610_v25 = vmax.f32 %v1595_v27, 0.0 }
 0x342   :  { %1629 = vrot.lane.b32.xlu1 %v1245_v8, %s4153_s16  ;;  %3841 = vrot.lane.b32.xlu0 %v3840_v18, %s4153_s16 }
 0x345   :  { %v1412_v63 = vpop.f32.mrf.mxu3 }
 0x346   :  { %v1427_v40 = vmax.f32 %v1412_v63, 0.0 }
 0x347   :  { %v1598_v31 = vpop.f32.mrf.mxu1 }
 0x348   :  { %1683 = vrot.lane.b32.xlu2 %v1610_v25, %s4154_s11  ;;  %v1611_v49 = vmax.f32 %v1598_v31, 0.0 }
 0x34a   :  { %1631 = vrot.lane.b32.xlu1 %v1246_v0, %s4153_s16  ;;  %1655 = vrot.lane.b32.xlu0 %v1427_v40, %s4155_s0 }
 0x34d   :  { %v1415_v50 = vpop.f32.mrf.mxu3 }
 0x34e   :  { %v1428_v19 = vmax.f32 %v1415_v50, 0.0  ;;  %v3832_v50 = vpop.permute.xlu2 %3831 }
 0x34f   :  { %v1601_v39 = vpop.f32.mrf.mxu1 }
 0x350   :  { %1685 = vrot.lane.b32.xlu2 %v1611_v49, %s4154_s11  ;;  %v1612_v60 = vmax.f32 %v1601_v39, 0.0  ;;  %v3833_v49 = vunpack.i.l.bf16 %v3832_v50 }
 0x352   :  { %1633 = vrot.lane.b32.xlu1 %v1247_v21, %s4153_s16  ;;  %1657 = vrot.lane.b32.xlu0 %v1428_v19, %s4155_s0  ;;  %v1058_v21 = vmax.f32 %v5494_v61, 0.0 }
 0x355   :  { %v1418_v7 = vpop.f32.mrf.mxu3 }
 0x356   :  { %v1429_v15 = vmax.f32 %v1418_v7, 0.0  ;;  %v1698_v7 = vsel %vm116_vm0, %v1058_v21, %v3833_v49 }
 0x357   :  { %v1604_v11 = vpop.f32.mrf.mxu1 }
 0x358   :  { %1687 = vrot.lane.b32.xlu2 %v1612_v60, %s4154_s11  ;;  %v1613_v51 = vmax.f32 %v1604_v11, 0.0 }
 0x35a   :  { %1659 = vrot.lane.b32.xlu0 %v1429_v15, %s4155_s0 }
 0x35d   :  { %v1421_v12 = vpop.f32.mrf.mxu3 }
 0x35e   :  { %v1430_v47 = vmax.f32 %v1421_v12, 0.0  ;;  %v3834_v12 = vunpack.i.h.bf16 %v3832_v50  ;;  %v1063_v50 = vmax.f32 %v5552_v29, 0.0  ;;  %v1064_v29 = vmax.f32 %v5554_v26, 0.0  ;;  %v1915_v26 = vld [vmem:[%s6828_s7] sm:$0xff] }
 0x360   :  { %1689 = vrot.lane.b32.xlu2 %v1613_v51, %s4154_s11 }
 0x362   :  { %1661 = vrot.lane.b32.xlu0 %v1430_v47, %s4155_s0 }
 0x365   :  { %v1824_v30 = vpop.f32.mrf.mxu3 }
 0x366   :  { %v5589_v54 = vadd.f32 %v4108_v53, %v1824_v30 }
 0x368   :  { %v1908_v48 = vmul.f32 %v3870_v17, %v5589_v54  ;;  %v2237_v28 = vmul.f32 %v5579_v38, %v5589_v54  ;;  %v2391_v16 = vmul.f32 %v5584_v52, %v5589_v54 }
 0x36a   :  { %3644 = vmatmul.msk.f32.vlgmr.msra.gmra.mxu1 %vm116_vm0, %v1908_v48  ;;  %3688 = vmatmul.msk.f32.vlgmr.msrb.gmra.mxu3 %vm116_vm0, %v2237_v28 }
 0x36b   :  { %3710 = vmatmul.msk.f32.vlgmr.msrb.gmra.mxu0 %vm116_vm0, %v2391_v16  ;;  %v1060_v16 = vmax.f32 %v5528_v2, 0.0 }
 0x36d   :  { %v1827_v14 = vpop.f32.mrf.mxu3 }
 0x36e   :  { %v5599_v56 = vadd.f32 %v4108_v53, %v1827_v14 }
 0x370   :  { %v1909_v42 = vmul.f32 %v3870_v17, %v5599_v56  ;;  %v2238_v13 = vmul.f32 %v5579_v38, %v5599_v56  ;;  %v2392_v41 = vmul.f32 %v5584_v52, %v5599_v56 }
 0x372   :  { %3645 = vmatmul.msk.f32.gmra.mxu1 %vm116_vm0, %v1909_v42  ;;  %3689 = vmatmul.msk.f32.gmra.mxu3 %vm116_vm0, %v2238_v13 }
 0x373   :  { %3711 = vmatmul.msk.f32.gmra.mxu0 %vm116_vm0, %v2392_v41 }
 0x375   :  { %v1830_v33 = vpop.f32.mrf.mxu3 }
 0x376   :  { %v5609_v58 = vadd.f32 %v4108_v53, %v1830_v33 }
 0x378   :  { %v1910_v57 = vmul.f32 %v3870_v17, %v5609_v58  ;;  %v2239_v32 = vmul.f32 %v5579_v38, %v5609_v58  ;;  %v2393_v43 = vmul.f32 %v5584_v52, %v5609_v58 }
 0x37a   :  { %3646 = vmatmul.msk.f32.gmra.mxu1 %vm116_vm0, %v1910_v57  ;;  %3690 = vmatmul.msk.f32.gmra.mxu3 %vm116_vm0, %v2239_v32 }
 0x37b   :  { %3712 = vmatmul.msk.f32.gmra.mxu0 %vm116_vm0, %v2393_v43  ;;  %v1061_v43 = vmax.f32 %v5543_v36, 0.0 }
 0x37d   :  { %v1833_v22 = vpop.f32.mrf.mxu3 }
 0x37e   :  { %v5619_v6 = vadd.f32 %v4108_v53, %v1833_v22 }
 0x380   :  { %v1911_v34 = vmul.f32 %v3870_v17, %v5619_v6  ;;  %v2240_v3 = vmul.f32 %v5579_v38, %v5619_v6  ;;  %v2394_v20 = vmul.f32 %v5584_v52, %v5619_v6 }
 0x382   :  { %3647 = vmatmul.msk.f32.gmra.mxu1 %vm116_vm0, %v1911_v34  ;;  %3691 = vmatmul.msk.f32.gmra.mxu3 %vm116_vm0, %v2240_v3 }
 0x383   :  { %3713 = vmatmul.msk.f32.gmra.mxu0 %vm116_vm0, %v2394_v20 }
 0x385   :  { %v1836_v24 = vpop.f32.mrf.mxu3 }
 0x386   :  { %v5629_v37 = vadd.f32 %v4108_v53, %v1836_v24  ;;  %v1062_v24 = vmax.f32 %v5550_v44, 0.0 }
 0x388   :  { %v1912_v46 = vmul.f32 %v3870_v17, %v5629_v37  ;;  %v2241_v27 = vmul.f32 %v5579_v38, %v5629_v37  ;;  %v2395_v18 = vmul.f32 %v5584_v52, %v5629_v37 }
 0x38a   :  { %3648 = vmatmul.msk.f32.gmra.mxu1 %vm116_vm0, %v1912_v46  ;;  %3692 = vmatmul.msk.f32.gmra.mxu3 %vm116_vm0, %v2241_v27 }
 0x38b   :  { %3714 = vmatmul.msk.f32.gmra.mxu0 %vm116_vm0, %v2395_v18 }
 0x38c   :  { %v1680_v60 = vpop.permute.xlu2 %1679 }
 0x38d   :  { %v1839_v8 = vpop.f32.mrf.mxu3 }
 0x38e   :  { %v5639_v63 = vadd.f32 %v4108_v53, %v1839_v8 }
 0x390   :  { %v1913_v25 = vmul.f32 %v3870_v17, %v5639_v63 }
 0x392   :  { %3649 = vmatmul.msk.f32.gmra.mxu1 %vm116_vm0, %v1913_v25 }
 0x395   :  { %v1842_v31 = vpop.f32.mrf.mxu3 }
 0x396   :  { %v5643_v0 = vadd.f32 %v4108_v53, %v1842_v31  ;;  %v2242_v31 = vmul.f32 %v5579_v38, %v5639_v63 }
 0x398   :  { %v1914_v40 = vmul.f32 %v3870_v17, %v5643_v0  ;;  %v1059_v17 = vmax.f32 %v5512_v35, 0.0  ;;  %3693 = vmatmul.msk.f32.gmra.mxu3 %vm116_vm0, %v2242_v31 }
 0x39a   :  { %3650 = vmatmul.msk.f32.gmra.mxu1 %vm116_vm0, %v1914_v40  ;;  %v1699_v61 = vsel %vm116_vm0, %v1059_v17, %v3834_v12  ;;  %v1654_v28 = vpop.permute.xlu2 %1653  ;;  %v2396_v40 = vmul.f32 %v5584_v52, %v5639_v63 }
 0x39c   :  { %v1678_v15 = vpop.permute.xlu1 %1677  ;;  %3715 = vmatmul.msk.f32.gmra.mxu0 %vm116_vm0, %v2396_v40 }
 0x3a2   :  { %v1684_v32 = vpop.permute.xlu2 %1683 }
 0x3aa   :  { %v1686_v46 = vpop.permute.xlu2 %1685 }
 0x3ac   :  { %v3837_v19 = vpop.permute.xlu0 %3836  ;;  %v1682_v13 = vpop.permute.xlu1 %1681 }
 0x3ad   :  { %v3838_v39 = vunpack.i.l.bf16 %v3837_v19  ;;  %v3839_v47 = vunpack.i.h.bf16 %v3837_v19 }
 0x3af   :  { %v1706_v11 = vsel %vm1705_vm4, %v1698_v7, %v3838_v39  ;;  %v1707_v53 = vsel %vm1705_vm4, %v1699_v61, %v3839_v47  ;;  %v2243_v7 = vmul.f32 %v5579_v38, %v5643_v0  ;;  %v5690_v38 = vld [vmem:[%s6827_s6 + $0x1] ss:$0 sm:$0xff]  ;;  %s3718_s6 = sld [smem:[#allocation2 + $0x2]] }
 0x3b0   :  { %v1714_v51 = vsel %vm1713_vm5, %v1706_v11, %v1678_v15  ;;  %v1715_v14 = vsel %vm1713_vm5, %v1707_v53, %v1680_v60  ;;  %v2397_v60 = vmul.f32 %v5584_v52, %v5643_v0  ;;  %v2083_v52 = vmul.f32 %v5690_v38, %v5589_v54  ;;  %v3696_v53 = vld [vmem:[%s6828_s7 + $0xa8] sm:$0xff] }
 0x3b1   :  { %1740 = vmatmul.f32.vlgmr.msra.gmra.mxu2 %v1714_v51  ;;  %3694 = vmatmul.msk.f32.gmra.mxu3 %vm116_vm0, %v2243_v7 }
 0x3b2   :  { %v1688_v49 = vpop.permute.xlu2 %1687  ;;  %3716 = vmatmul.msk.f32.gmra.mxu0 %vm116_vm0, %v2397_v60 }
 0x3b4   :  { %v3842_v30 = vpop.permute.xlu0 %3841  ;;  %v1630_v34 = vpop.permute.xlu1 %1629 }
 0x3b5   :  { %v3843_v48 = vunpack.i.l.bf16 %v3842_v30  ;;  %v3844_v57 = vunpack.i.h.bf16 %v3842_v30  ;;  %v1702_v27 = vsel %vm116_vm0, %v1062_v24, %v1630_v34  ;;  %v1917_v34 = vld [vmem:[%s6828_s7 + $0x10] sm:$0xff] }
 0x3b7   :  { %v1700_v42 = vsel %vm116_vm0, %v1060_v16, %v3843_v48  ;;  %v1701_v22 = vsel %vm116_vm0, %v1061_v43, %v3844_v57 }
 0x3b8   :  { %v1708_v33 = vsel %vm1705_vm4, %v1700_v42, %v1654_v28  ;;  %v3674_v28 = vld [vmem:[%s6828_s7 + $0x70] sm:$0xff] }
 0x3b9   :  { %1743 = vmatmul.f32.gmra.mxu2 %v1715_v14  ;;  %v1716_v35 = vsel %vm1713_vm5, %v1708_v33, %v1682_v13  ;;  %v1916_v14 = vld [vmem:[%s6828_s7 + $0x8] sm:$0xff] }
 0x3ba   :  { %v1690_v51 = vpop.permute.xlu2 %1689 }
 0x3bc   :  { %v1656_v41 = vpop.permute.xlu0 %1655  ;;  %v1632_v8 = vpop.permute.xlu1 %1631 }
 0x3bd   :  { %v1709_v2 = vsel %vm1705_vm4, %v1701_v22, %v1656_v41  ;;  %v1703_v44 = vsel %vm116_vm0, %v1063_v50, %v1632_v8  ;;  %v2084_v41 = vmul.f32 %v5690_v38, %v5599_v56  ;;  %v3697_v22 = vld [vmem:[%s6828_s7 + $0xb0] sm:$0xff]  ;;  %v3675_v56 = vld [vmem:[%s6828_s7 + $0x78] sm:$0xff] }
 0x3be   :  { %v1717_v20 = vsel %vm1713_vm5, %v1709_v2, %v1684_v32  ;;  %v1918_v50 = vld [vmem:[%s6828_s7 + $0x18] sm:$0xff] }
 0x3c1   :  { %1746 = vmatmul.f32.gmra.mxu2 %v1716_v35 }
 0x3c4   :  { %v1658_v3 = vpop.permute.xlu0 %1657  ;;  %v1634_v39 = vpop.permute.xlu1 %1633 }
 0x3c5   :  { %v1710_v18 = vsel %vm1705_vm4, %v1702_v27, %v1658_v3  ;;  %v1704_v11 = vsel %vm116_vm0, %v1064_v29, %v1634_v39 }
 0x3c6   :  { %v1718_v36 = vsel %vm1713_vm5, %v1710_v18, %v1686_v46  ;;  %v2085_v46 = vmul.f32 %v5690_v38, %v5609_v58  ;;  %v3676_v58 = vld [vmem:[%s6828_s7 + $0x80] sm:$0xff] }
 0x3c9   :  { %1749 = vmatmul.f32.gmra.mxu2 %v1717_v20 }
 0x3cc   :  { %v1660_v25 = vpop.permute.xlu0 %1659 }
 0x3cd   :  { %v1711_v21 = vsel %vm1705_vm4, %v1703_v44, %v1660_v25 }
 0x3ce   :  { %v1719_v19 = vsel %vm1713_vm5, %v1711_v21, %v1688_v49 }
 0x3d1   :  { %1752 = vmatmul.f32.gmra.mxu2 %v1718_v36  ;;  %v3698_v36 = vld [vmem:[%s6828_s7 + $0xb8] sm:$0xff] }
 0x3d4   :  { %v1662_v15 = vpop.permute.xlu0 %1661 }
 0x3d5   :  { %v1712_v12 = vsel %vm1705_vm4, %v1704_v11, %v1662_v15  ;;  %v3699_v15 = vld [vmem:[%s6828_s7 + $0xc0] sm:$0xff] }
 0x3d6   :  { %v1720_v47 = vsel %vm1713_vm5, %v1712_v12, %v1690_v51  ;;  %v1919_v51 = vld [vmem:[%s6828_s7 + $0x20] sm:$0xff] }
 0x3d9   :  { %1755 = vmatmul.f32.gmra.mxu2 %v1719_v19  ;;  %v2086_v19 = vmul.f32 %v5690_v38, %v5619_v6  ;;  %v3677_v6 = vld [vmem:[%s6828_s7 + $0x88] sm:$0xff] }
 0x3e1   :  { %1758 = vmatmul.f32.gmra.mxu2 %v1720_v47 }
 0x3e7   :  { %v1981_v17 = vpop.f32.mrf.mxu1 }
 0x3e8   :  { %v5697_v30 = vadd.f32 %v1981_v17, %v1915_v26  ;;  %v2443_v61 = vpop.f32.mrf.mxu0  ;;  %v2087_v17 = vmul.f32 %v5690_v38, %v5629_v37  ;;  %v3678_v37 = vld [vmem:[%s6828_s7 + $0x90] sm:$0xff] }
 0x3e9   :  { %3666 = vmatmul.msk.f32.vlgmr.msrb.gmra.mxu2 %vm116_vm0, %v2083_v52  ;;  %v5708_v16 = vadd.f32 %v3696_v53, %v2443_v61 }
 0x3ea   :  { %v2002_v48 = vsel %vm336_vm1, %v5697_v30, -inf }
 0x3eb   :  { %2003 = vmax.xlane.f32.xlu1 %v2002_v48  ;;  %v2464_v35 = vsel %vm336_vm1, %v5708_v16, -inf }
 0x3ed   :  { %v2289_v54 = vpop.f32.mrf.mxu3 }
 0x3ee   :  { %v5713_v42 = vadd.f32 %v3674_v28, %v2289_v54  ;;  %v3700_v54 = vld [vmem:[%s6828_s7 + $0xc8] sm:$0xff] }
 0x3ef   :  { %v1984_v13 = vpop.f32.mrf.mxu1 }
 0x3f0   :  { %v5717_v33 = vadd.f32 %v1984_v13, %v1916_v14  ;;  %v2310_v57 = vsel %vm336_vm1, %v5713_v42, -inf  ;;  %v2446_v32 = vpop.f32.mrf.mxu0  ;;  %v1920_v13 = vld [vmem:[%s6828_s7 + $0x28] sm:$0xff] }
 0x3f1   :  { %2311 = vmax.xlane.f32.xlu2 %v2310_v57  ;;  %3667 = vmatmul.msk.f32.gmra.mxu2 %vm116_vm0, %v2084_v41  ;;  %v5735_v3 = vadd.f32 %v3697_v22, %v2446_v32 }
 0x3f2   :  { %v2005_v43 = vsel %vm336_vm1, %v5717_v33, -inf }
 0x3f3   :  { %2465 = vmax.xlane.f32.xlu1 %v2464_v35  ;;  %2006 = vmax.xlane.f32.xlu0 %v2005_v43  ;;  %v2467_v25 = vsel %vm336_vm1, %v5735_v3, -inf  ;;  %v2088_v43 = vmul.f32 %v5690_v38, %v5639_v63  ;;  %v1921_v63 = vld [vmem:[%s6828_s7 + $0x30] sm:$0x1] }
 0x3f5   :  { %v2292_v2 = vpop.f32.mrf.mxu3 }
 0x3f6   :  { %v5737_v20 = vadd.f32 %v3675_v56, %v2292_v2 }
 0x3f7   :  { %v1987_v24 = vpop.f32.mrf.mxu1 }
 0x3f8   :  { %v5741_v27 = vadd.f32 %v1987_v24, %v1917_v34  ;;  %v2313_v18 = vsel %vm336_vm1, %v5737_v20, -inf  ;;  %v2449_v8 = vpop.f32.mrf.mxu0 }
 0x3f9   :  { %3668 = vmatmul.msk.f32.gmra.mxu2 %vm116_vm0, %v2085_v46  ;;  %v5756_v40 = vadd.f32 %v3698_v36, %v2449_v8  ;;  %v2089_v46 = vmul.f32 %v5690_v38, %v5643_v0  ;;  %v3874_v36 = vld [vmem:[%s6834_s13] ss:$0 sm:$0xff]  ;;  %v2609_v0 = vld [vmem:[%s6829_s8 + $0x10] sm:$0xff]  ;;  %v2608_v38 = vld [vmem:[%s6829_s8 + $0x8] sm:$0xff] }
 0x3fa   :  { %v2008_v31 = vsel %vm336_vm1, %v5741_v27, -inf }
 0x3fb   :  { %2009 = vmax.xlane.f32.xlu2 %v2008_v31  ;;  %2314 = vmax.xlane.f32.xlu1 %v2313_v18  ;;  %v2470_v7 = vsel %vm336_vm1, %v5756_v40, -inf }
 0x3fc   :  { %2468 = vmax.xlane.f32.xlu0 %v2467_v25  ;;  %v2610_v25 = vld [vmem:[%s6829_s8 + $0x18] sm:$0xff] }
 0x3fd   :  { %v2295_v44 = vpop.f32.mrf.mxu3  ;;  %2627 = vmatpush.msrb.mxu1 %v2610_v25 }
 0x3fe   :  { %v5761_v49 = vadd.f32 %v3676_v58, %v2295_v44 }
 0x3ff   :  { %v1990_v21 = vpop.f32.mrf.mxu1  ;;  %2628 = vmatpush.msrb.mxu1 %v2609_v0 }
 0x400   :  { %v5765_v39 = vadd.f32 %v1990_v21, %v1918_v50  ;;  %v2452_v60 = vpop.f32.mrf.mxu0  ;;  %v2316_v29 = vsel %vm336_vm1, %v5761_v49, -inf  ;;  %v2607_v50 = vld [vmem:[%s6829_s8] sm:$0xff] }
 0x401   :  { %3669 = vmatmul.msk.f32.gmra.mxu2 %vm116_vm0, %v2086_v19  ;;  %v5780_v12 = vadd.f32 %v3699_v15, %v2452_v60  ;;  %2629 = vmatpush.msrb.mxu1 %v2608_v38  ;;  %v5854_v19 = vld [vmem:[%s6822_s1 + $0x38] sm:$0xff]  ;;  %v3742_v60 = vld [vmem:[%s6829_s8 + $0x30] sm:$0xff]  ;;  %v3765_v38 = vld [vmem:[%s6829_s8 + $0x40] sm:$0xff] }
 0x402   :  { %v2011_v11 = vsel %vm336_vm1, %v5765_v39, -inf }
 0x403   :  { %2471 = vmax.xlane.f32.xlu2 %v2470_v7  ;;  %2012 = vmax.xlane.f32.xlu1 %v2011_v11  ;;  %v2473_v48 = vsel %vm336_vm1, %v5780_v12, -inf  ;;  %v3743_v7 = vld [vmem:[%s6829_s8 + $0x38] sm:$0xff]  ;;  %v5871_v11 = vld [vmem:[%s6822_s1 + $0x40] sm:$0xff] }
 0x404   :  { %2317 = vmax.xlane.f32.xlu0 %v2316_v29  ;;  %2630 = vmatpush.msrb.mxu1 %v2607_v50 }
 0x405   :  { %v2298_v47 = vpop.f32.mrf.mxu3  ;;  %3720 = vmatmul.msk.f32.vlgmr.msrb.gmra.mxu1 %vm116_vm0, %v5854_v19  ;;  %2808 = vmatpush.msra.mxu3 %v3743_v7 }
 0x406   :  { %v5785_v26 = vadd.f32 %v3677_v6, %v2298_v47  ;;  %v3741_v6 = vld [vmem:[%s6829_s8 + $0x28] sm:$0xff] }
 0x407   :  { %v1993_v52 = vpop.f32.mrf.mxu1  ;;  %2809 = vmatpush.msra.mxu3 %v3742_v60 }
 0x408   :  { %v5789_v61 = vadd.f32 %v1993_v52, %v1919_v51  ;;  %v2319_v53 = vsel %vm336_vm1, %v5785_v26, -inf  ;;  %v2455_v14 = vpop.f32.mrf.mxu0  ;;  %v3740_v51 = vld [vmem:[%s6829_s8 + $0x20] sm:$0xff] }
 0x409   :  { %3670 = vmatmul.msk.f32.gmra.mxu2 %vm116_vm0, %v2087_v17  ;;  %v5807_v57 = vadd.f32 %v3700_v54, %v2455_v14  ;;  %2810 = vmatpush.msra.mxu3 %v3741_v6  ;;  %v5890_v17 = vld [vmem:[%s6822_s1 + $0x48] sm:$0xff] }
 0x40a   :  { %v2014_v28 = vsel %vm336_vm1, %v5789_v61, -inf }
 0x40b   :  { %2320 = vmax.xlane.f32.xlu2 %v2319_v53  ;;  %2474 = vmax.xlane.f32.xlu1 %v2473_v48  ;;  %v2476_v34 = vsel %vm336_vm1, %v5807_v57, -inf }
 0x40c   :  { %2015 = vmax.xlane.f32.xlu0 %v2014_v28  ;;  %2811 = vmatpush.msra.mxu3 %v3740_v51  ;;  %v5903_v28 = vld [vmem:[%s6822_s1 + $0x50] sm:$0xff] }
 0x40d   :  { %v2301_v41 = vpop.f32.mrf.mxu3  ;;  %3721 = vmatmul.msk.f32.gmra.mxu1 %vm116_vm0, %v5871_v11  ;;  %3745 = vmatmul.msk.f32.vlgmr.msra.gmra.mxu3 %vm116_vm0, %v5854_v19 }
 0x40e   :  { %v5809_v35 = vadd.f32 %v3678_v37, %v2301_v41  ;;  %v5916_v37 = vld [vmem:[%s6822_s1 + $0x58] sm:$0xff] }
 0x40f   :  { %v1996_v32 = vpop.f32.mrf.mxu1 }
 0x410   :  { %v5813_v22 = vadd.f32 %v1996_v32, %v1920_v13  ;;  %v2322_v56 = vsel %vm336_vm1, %v5809_v35, -inf  ;;  %v5929_v32 = vld [vmem:[%s6822_s1 + $0x60] sm:$0xff] }
 0x411   :  { %3671 = vmatmul.msk.f32.gmra.mxu2 %vm116_vm0, %v2088_v43  ;;  %v3652_v43 = vld [vmem:[%s6828_s7 + $0x38] sm:$0xff] }
 0x412   :  { %v2017_v2 = vsel %vm336_vm1, %v5813_v22, -inf }
 0x413   :  { %2018 = vmax.xlane.f32.xlu2 %v2017_v2  ;;  %2323 = vmax.xlane.f32.xlu1 %v2322_v56  ;;  %v5947_v2 = vld [vmem:[%s6822_s1 + $0x68] sm:$0x1] }
 0x414   :  { %2477 = vmax.xlane.f32.xlu0 %v2476_v34 }
 0x415   :  { %3722 = vmatmul.msk.f32.gmra.mxu1 %vm116_vm0, %v5890_v17  ;;  %3746 = vmatmul.msk.f32.gmra.mxu3 %vm116_vm0, %v5871_v11 }
 0x417   :  { %v1999_v24 = vpop.f32.mrf.mxu1 }
 0x418   :  { %v5827_v18 = vadd.f32 %v1999_v24, %v1921_v63  ;;  %v3768_v63 = vld [vmem:[%s6829_s8 + $0x58] sm:$0xff]  ;;  %v3767_v24 = vld [vmem:[%s6829_s8 + $0x50] sm:$0xff] }
 0x419   :  { %3672 = vmatmul.msk.f32.gmra.mxu2 %vm116_vm0, %v2089_v46  ;;  %2989 = vmatpush.msra.mxu1 %v3768_v63  ;;  %v2458_v6 = vpop.f32.mrf.mxu0 }
 0x41a   :  { %v2020_v8 = vsel %vm355_vm2, %v5827_v18, -inf }
 0x41b   :  { %2021 = vmax.xlane.f32.xlu1 %v2020_v8  ;;  %v3766_v8 = vld [vmem:[%s6829_s8 + $0x48] sm:$0xff]  ;;  %2990 = vmatpush.msra.mxu1 %v3767_v24 }
 0x41d   :  { %3723 = vmatmul.msk.f32.gmra.mxu1 %vm116_vm0, %v5903_v28  ;;  %3747 = vmatmul.msk.f32.gmra.mxu3 %vm116_vm0, %v5890_v17 }
 0x41e   :  { %2991 = vmatpush.msra.mxu1 %v3766_v8 }
 0x420   :  { %2992 = vmatpush.msra.mxu1 %v3765_v38  ;;  %v3656_v38 = vld [vmem:[%s6828_s7 + $0x58] sm:$0xff] }
 0x422   :  { %3370 = vmatpush.msrb.mxu1 %v5390_v59  ;;  %v3791_v59 = vld [vmem:[%s6829_s8 + $0x68] sm:$0xff] }
 0x424   :  { %3371 = vmatpush.msrb.mxu1 %v5395_v10  ;;  %v3790_v10 = vld [vmem:[%s6829_s8 + $0x60] sm:$0xff] }
 0x425   :  { %3724 = vmatmul.msk.f32.gmra.mxu1 %vm116_vm0, %v5916_v37  ;;  %3748 = vmatmul.msk.f32.gmra.mxu3 %vm116_vm0, %v5903_v28 }
 0x426   :  { %3372 = vmatpush.msrb.mxu1 %v5403_v55  ;;  %v3680_v55 = vld [vmem:[%s6828_s7 + $0xa0] sm:$0x1] }
 0x428   :  { %3373 = vmatpush.msrb.mxu1 %v5411_v45  ;;  %v3655_v45 = vld [vmem:[%s6828_s7 + $0x50] sm:$0xff] }
 0x42a   :  { %3374 = vmatpush.msrb.mxu1 %v5423_v4 }
 0x42c   :  { %3375 = vmatpush.msrb.mxu1 %v5429_v9 }
 0x42d   :  { %3725 = vmatmul.msk.f32.gmra.mxu1 %vm116_vm0, %v5929_v32  ;;  %3749 = vmatmul.msk.f32.gmra.mxu3 %vm116_vm0, %v5916_v37 }
 0x42e   :  { %3376 = vmatpush.msrb.mxu1 %v5435_v1 }
 0x430   :  { %3377 = vmatpush.msrb.mxu1 %v5443_v23 }
 0x432   :  { %3378 = vmatpush.msrb.mxu1 %v5451_v62 }
 0x434   :  { %v1741_v31 = vpop.f32.mrf.mxu2  ;;  %3379 = vmatpush.msrb.mxu1 %v5461_v5  ;;  %v4116_v5 = vld [vmem:[%s6833_s12 + $0x28] sm:$0xff] }
 0x435   :  { %v1742_v58 = vadd.f32 %v3874_v36, %v1741_v31  ;;  %3726 = vmatmul.msk.f32.gmra.mxu1 %vm116_vm0, %v5947_v2  ;;  %v2304_v31 = vpop.f32.mrf.mxu3  ;;  %3750 = vmatmul.msk.f32.gmra.mxu3 %vm116_vm0, %v5929_v32 }
 0x436   :  { %3380 = vmatpush.msrb.mxu1 %v4116_v5 }
 0x437   :  { %1762 = vst.msk [vmem:[%s6835_s14] sm:$0xff] %vm116_vm0, %v1742_v58  ;;  %v3653_v58 = vld [vmem:[%s6828_s7 + $0x40] sm:$0xff] }
 0x43c   :  { %v1744_v44 = vpop.f32.mrf.mxu2 }
 0x43d   :  { %v1745_v21 = vadd.f32 %v3874_v36, %v1744_v44  ;;  %3770 = vmatmul.msk.f32.vlgmr.msra.gmra.mxu1 %vm116_vm0, %v5854_v19  ;;  %3751 = vmatmul.msk.f32.gmra.mxu3 %vm116_vm0, %v5947_v2 }
 0x43f   :  { %1763 = vst.msk [vmem:[%s6835_s14 + $0x8] sm:$0xff] %vm116_vm0, %v1745_v21  ;;  %v3793_v21 = vld [vmem:[%s6829_s8 + $0x78] sm:$0xff] }
 0x440   :  { %3170 = vmatpush.msrb.mxu3 %v3793_v21 }
 0x444   :  { %v1747_v29 = vpop.f32.mrf.mxu2 }
 0x445   :  { %v1748_v15 = vadd.f32 %v3874_v36, %v1747_v29  ;;  %3771 = vmatmul.msk.f32.gmra.mxu1 %vm116_vm0, %v5871_v11 }
 0x447   :  { %1764 = vst.msk [vmem:[%s6835_s14 + $0x10] sm:$0xff] %vm116_vm0, %v1748_v15  ;;  %v3701_v15 = vld [vmem:[%s6828_s7 + $0xd0] sm:$0xff] }
 0x44c   :  { %v1750_v47 = vpop.f32.mrf.mxu2 }
 0x44d   :  { %v1751_v52 = vadd.f32 %v3874_v36, %v1750_v47  ;;  %3772 = vmatmul.msk.f32.gmra.mxu1 %vm116_vm0, %v5890_v17 }
 0x44f   :  { %1765 = vst.msk [vmem:[%s6835_s14 + $0x18] sm:$0xff] %vm116_vm0, %v1751_v52  ;;  %v3654_v52 = vld [vmem:[%s6828_s7 + $0x48] sm:$0xff] }
 0x454   :  { %v1753_v53 = vpop.f32.mrf.mxu2 }
 0x455   :  { %v1754_v48 = vadd.f32 %v3874_v36, %v1753_v53  ;;  %3773 = vmatmul.msk.f32.gmra.mxu1 %vm116_vm0, %v5903_v28 }
 0x457   :  { %1766 = vst.msk [vmem:[%s6835_s14 + $0x20] sm:$0xff] %vm116_vm0, %v1754_v48  ;;  %v6001_v48 = vadd.f32 %v3701_v15, %v2458_v6  ;;  %v2461_v6 = vpop.f32.mrf.mxu0 }
 0x459   :  { %v2479_v63 = vsel %vm336_vm1, %v6001_v48, -inf }
 0x45c   :  { %v1756_v54 = vpop.f32.mrf.mxu2 }
 0x45d   :  { %v1757_v14 = vadd.f32 %v3874_v36, %v1756_v54  ;;  %3774 = vmatmul.msk.f32.gmra.mxu1 %vm116_vm0, %v5916_v37 }
 0x45e   :  { %v2004_v25 = vpop.xlane.xlu1 %2003 }
 0x45f   :  { %1767 = vst.msk [vmem:[%s6835_s14 + $0x28] sm:$0xff] %vm116_vm0, %v1757_v14  ;;  %v2023_v7 = vsub.f32 %v5697_v30, %v2004_v25  ;;  %v3792_v30 = vld [vmem:[%s6829_s8 + $0x70] sm:$0xff] }
 0x460   :  { %3171 = vmatpush.msrb.mxu3 %v3792_v30 }
 0x461   :  { %v2030_v51 = vmul.f32 1.442695, %v2023_v7 }
 0x462   :  { %3172 = vmatpush.msrb.mxu3 %v3791_v59 }
 0x463   :  { %3991 = vpow2.f32 %v2030_v51  ;;  %v3657_v51 = vld [vmem:[%s6828_s7 + $0x60] sm:$0xff] }
 0x464   :  { %v1759_v13 = vpop.f32.mrf.mxu2  ;;  %v2312_v53 = vpop.xlane.xlu2 %2311  ;;  %3173 = vmatpush.msrb.mxu3 %v3790_v10 }
 0x465   :  { %v1760_v41 = vadd.f32 %v3874_v36, %v1759_v13  ;;  %v3679_v36 = vld [vmem:[%s6828_s7 + $0x98] sm:$0xff]  ;;  %v2331_v13 = vsub.f32 %v5713_v42, %v2312_v53  ;;  %3795 = vmatmul.msk.f32.vlgmr.msrb.gmra.mxu3 %vm116_vm0, %v5854_v19  ;;  %3775 = vmatmul.msk.f32.gmra.mxu1 %vm116_vm0, %v5929_v32 }
 0x466   :  { %v5968_v0 = vadd.f32 %v3679_v36, %v2304_v31  ;;  %v2466_v47 = vpop.xlane.xlu1 %2465  ;;  %v2007_v36 = vpop.xlane.xlu0 %2006 }
 0x467   :  { %1769 = vst.msk [vmem:[%s6835_s14 + $0x30] sm:$0x1] %vm1768_vm6, %v1760_v41  ;;  %v2485_v41 = vsub.f32 %v5708_v16, %v2466_v47  ;;  %v2338_v42 = vmul.f32 1.442695, %v2331_v13 }
 0x468   :  { %v2325_v29 = vsel %vm336_vm1, %v5968_v0, -inf }
 0x469   :  { %v2492_v16 = vmul.f32 1.442695, %v2485_v41  ;;  %3993 = vpow2.f32 %v2338_v42  ;;  %v3658_v42 = vld [vmem:[%s6828_s7 + $0x68] sm:$0x1] }
 0x46b   :  { %3995 = vpow2.f32 %v2492_v16  ;;  %v4120_v16 = vld [vmem:[%s6833_s12 + $0x8] sm:$0xff] }
 0x46c   :  { %v2135_v56 = vpop.f32.mrf.mxu2 }
 0x46d   :  { %v5942_v34 = vadd.f32 %v3652_v43, %v2135_v56  ;;  %v2307_v43 = vpop.f32.mrf.mxu3  ;;  %3796 = vmatmul.msk.f32.gmra.mxu3 %vm116_vm0, %v5871_v11  ;;  %3776 = vmatmul.msk.f32.gmra.mxu1 %vm116_vm0, %v5947_v2 }
 0x46e   :  { %v6024_v24 = vadd.f32 %v3680_v55, %v2307_v43  ;;  %v2315_v8 = vpop.xlane.xlu1 %2314 }
 0x46f   :  { %v2156_v46 = vsel %vm336_vm1, %v5942_v34, -inf  ;;  %v2332_v19 = vsub.f32 %v5737_v20, %v2315_v8  ;;  %v2469_v11 = vpop.xlane.xlu0 %2468 }
 0x470   :  { %2157 = vmax.xlane.f32.xlu0 %v2156_v46  ;;  %v6032_v46 = vpop.eup %3991  ;;  %v2328_v4 = vsel %vm355_vm2, %v6024_v24, -inf  ;;  %v2486_v13 = vsub.f32 %v5735_v3, %v2469_v11  ;;  %v4119_v3 = vld [vmem:[%s6833_s12 + $0x10] sm:$0xff] }
 0x471   :  { %v2044_v9 = vsel %vm336_vm1, %v6032_v46, 0.0  ;;  %v2340_v1 = vmul.f32 1.442695, %v2332_v19  ;;  %v6053_v20 = vpop.eup %3993 }
 0x472   :  { %v6055_v7 = vpop.eup %3995  ;;  %v2352_v62 = vsel %vm336_vm1, %v6053_v20, 0.0 }
 0x473   :  { %3997 = vpow2.f32 %v2340_v1 }
 0x474   :  { %v2138_v50 = vpop.f32.mrf.mxu2 }
 0x475   :  { %v5975_v44 = vadd.f32 %v3653_v58, %v2138_v50  ;;  %v2010_v50 = vpop.xlane.xlu2 %2009  ;;  %3797 = vmatmul.msk.f32.gmra.mxu3 %vm116_vm0, %v5890_v17  ;;  %v4118_v17 = vld [vmem:[%s6833_s12 + $0x18] sm:$0xff] }
 0x476   :  { %v2025_v23 = vsub.f32 %v5741_v27, %v2010_v50  ;;  %v2506_v27 = vsel %vm336_vm1, %v6055_v7, 0.0 }
 0x477   :  { %v2159_v60 = vsel %vm336_vm1, %v5975_v44, -inf }
 0x478   :  { %2160 = vmax.xlane.f32.xlu2 %v2159_v60  ;;  %2326 = vmax.xlane.f32.xlu0 %v2325_v29  ;;  %v2024_v60 = vsub.f32 %v5717_v33, %v2007_v36  ;;  %v3702_v33 = vld [vmem:[%s6828_s7 + $0xd8] sm:$0x1]  ;;  %v2034_v59 = vmul.f32 1.442695, %v2025_v23  ;;  %s6331_s7 = sld [smem:[#allocation2 + $0x181]] }
 0x479   :  { %v6079_v47 = vadd.f32 %v3702_v33, %v2461_v6  ;;  %v2013_v33 = vpop.xlane.xlu1 %2012 }
 0x47a   :  { %v2032_v30 = vmul.f32 1.442695, %v2024_v60 }
 0x47b   :  { %v2482_v55 = vsel %vm355_vm2, %v6079_v47, -inf }
 0x47c   :  { %v2141_v54 = vpop.f32.mrf.mxu2  ;;  %3999 = vpow2.f32 %v2032_v30 }
 0x47d   :  { %v6006_v14 = vadd.f32 %v3654_v52, %v2141_v54  ;;  %v4117_v52 = vld [vmem:[%s6833_s12 + $0x20] sm:$0xff]  ;;  %v6086_v54 = vpop.eup %3997  ;;  %4001 = vpow2.f32 %v2034_v59  ;;  %3798 = vmatmul.msk.f32.gmra.mxu3 %vm116_vm0, %v5903_v28 }
 0x47e   :  { %3381 = vmatpush.msrb.mxu1 %v4117_v52  ;;  %v2355_v43 = vsel %vm336_vm1, %v6086_v54, 0.0  ;;  %v4121_v28 = vld [vmem:[%s6833_s12] sm:$0xff]  ;;  %s6375_s12 = sld [smem:[#allocation4 + $0x1]] }
 0x47f   :  { %v2162_v56 = vsel %vm336_vm1, %v6006_v14, -inf }
 0x480   :  { %2163 = vmax.xlane.f32.xlu1 %v2162_v56  ;;  %2480 = vmax.xlane.f32.xlu2 %v2479_v63  ;;  %v2318_v56 = vpop.xlane.xlu0 %2317  ;;  %v2494_v63 = vmul.f32 1.442695, %v2486_v13 }
 0x481   :  { %3382 = vmatpush.msrb.mxu1 %v4118_v17  ;;  %v2475_v59 = vpop.xlane.xlu1 %2474 }
 0x482   :  { %4003 = vpow2.f32 %v2494_v63 }
 0x483   :  { %3383 = vmatpush.msrb.mxu1 %v4119_v3 }
 0x484   :  { %v2144_v25 = vpop.f32.mrf.mxu2 }
 0x485   :  { %v6034_v31 = vadd.f32 %v3655_v45, %v2144_v25  ;;  %v6108_v45 = vpop.eup %3999  ;;  %3384 = vmatpush.msrb.mxu1 %v4120_v16  ;;  %3799 = vmatmul.msk.f32.gmra.mxu3 %vm116_vm0, %v5916_v37 }
 0x486   :  { %v6115_v8 = vpop.eup %4001 }
 0x487   :  { %v2165_v58 = vsel %vm336_vm1, %v6034_v31, -inf  ;;  %3385 = vmatpush.msrb.mxu1 %v4121_v28  ;;  %v2050_v19 = vsel %vm336_vm1, %v6115_v8, 0.0  ;;  %v3875_v28 = vld [vmem:[%s6877_s15] ss:$0 sm:$0xff] }
 0x488   :  { %2045 = vadd.xlane.f32.xlu1 %v2044_v9  ;;  %2329 = vmax.xlane.f32.xlu2 %v2328_v4  ;;  %v2333_v4 = vsub.f32 %v5761_v49, %v2318_v56  ;;  %v2047_v9 = vsel %vm336_vm1, %v6108_v45, 0.0  ;;  %v2016_v50 = vpop.xlane.xlu0 %2015  ;;  %v6133_v49 = vpop.eup %4003 }
 0x489   :  { %2166 = vmax.xlane.f32.xlu0 %v2165_v58  ;;  %v2027_v1 = vsub.f32 %v5789_v61, %v2016_v50  ;;  %v6162_v13 = vpop.xlane.xlu1 %2323 }
 0x48b   :  { %v2038_v60 = vmul.f32 1.442695, %v2027_v1 }
 0x48c   :  { %v2147_v21 = vpop.f32.mrf.mxu2 }
 0x48d   :  { %v6058_v29 = vadd.f32 %v3656_v38, %v2147_v21  ;;  %v2342_v38 = vmul.f32 1.442695, %v2333_v4  ;;  %v2509_v21 = vsel %vm336_vm1, %v6133_v49, 0.0  ;;  %3800 = vmatmul.msk.f32.gmra.mxu3 %vm116_vm0, %v5929_v32 }
 0x48f   :  { %v2168_v15 = vsel %vm336_vm1, %v6058_v29, -inf  ;;  %4005 = vpow2.f32 %v2342_v38 }
 0x490   :  { %2353 = vadd.xlane.f32.xlu1 %v2352_v62  ;;  %2169 = vmax.xlane.f32.xlu2 %v2168_v15  ;;  %4007 = vpow2.f32 %v2038_v60  ;;  %v6152_v62 = vpop.f32.mrf.mxu1  ;;  %v6154_v6 = vpop.f32.mrf.mxu3 }
 0x491   :  { %2507 = vadd.xlane.f32.xlu0 %v2506_v27  ;;  %v2472_v27 = vpop.xlane.xlu2 %2471  ;;  %v6170_v16 = vpop.xlane.xlu1 %2021 }
 0x494   :  { %v2150_v53 = vpop.f32.mrf.mxu2 }
 0x495   :  { %v6088_v10 = vadd.f32 %v3657_v51, %v2150_v53  ;;  %v6142_v23 = vpop.eup %4005  ;;  %3801 = vmatmul.msk.f32.gmra.mxu3 %vm116_vm0, %v5947_v2  ;;  %v6158_v2 = vpop.xlane.xlu0 %2477 }
 0x496   :  { %v2358_v37 = vsel %vm336_vm1, %v6142_v23, 0.0  ;;  %v6148_v11 = vpop.eup %4007 }
 0x497   :  { %v2171_v41 = vsel %vm336_vm1, %v6088_v10, -inf  ;;  %v2056_v61 = vsel %vm336_vm1, %v6148_v11, 0.0 }
 0x498   :  { %2172 = vmax.xlane.f32.xlu1 %v2171_v41  ;;  %2483 = vmax.xlane.f32.xlu2 %v2482_v55  ;;  %v2635_v15 = vpop.f32.mrf.mxu1  ;;  %v6156_v5 = vpop.f32.mrf.mxu3 }
 0x499   :  { %2356 = vadd.xlane.f32.xlu0 %v2355_v43  ;;  %v2321_v51 = vpop.xlane.xlu2 %2320  ;;  %v2026_v43 = vsub.f32 %v5765_v39, %v2013_v33 }
 0x49c   :  { %v2153_v25 = vpop.f32.mrf.mxu2 }
 0x49d   :  { %v6117_v36 = vadd.f32 %v3658_v42, %v2153_v25  ;;  %v2036_v42 = vmul.f32 1.442695, %v2026_v43  ;;  %v2488_v43 = vsub.f32 %v5780_v12, %v2475_v59  ;;  %v2633_v12 = vadd.f32 %v3875_v28, %v6152_v62 }
 0x49e   :  { %v2335_v62 = vsub.f32 %v5809_v35, %v6162_v13 }
 0x49f   :  { %v2174_v58 = vsel %vm355_vm2, %v6117_v36, -inf }
 0x4a0   :  { %2051 = vadd.xlane.f32.xlu1 %v2050_v19  ;;  %2048 = vadd.xlane.f32.xlu2 %v2047_v9  ;;  %v2638_v32 = vpop.f32.mrf.mxu1  ;;  %v6160_v53 = vpop.f32.mrf.mxu3  ;;  %v2346_v35 = vmul.f32 1.442695, %v2335_v62 }
 0x4a1   :  { %2175 = vmax.xlane.f32.xlu0 %v2174_v58  ;;  %v6164_v17 = vpop.xlane.xlu2 %2018 }
 0x4a8   :  { %2510 = vadd.xlane.f32.xlu2 %v2509_v21  ;;  %v2641_v30 = vpop.f32.mrf.mxu1  ;;  %v6168_v63 = vpop.f32.mrf.mxu3 }
 0x4b0   :  { %2359 = vadd.xlane.f32.xlu2 %v2358_v37  ;;  %v2644_v52 = vpop.f32.mrf.mxu1  ;;  %v2825_v38 = vpop.f32.mrf.mxu3 }
 0x4b1   :  { %v2645_v37 = vadd.f32 %v3875_v28, %v2644_v52 }
 0x4b8   :  { %2057 = vadd.xlane.f32.xlu2 %v2056_v61  ;;  %v2647_v3 = vpop.f32.mrf.mxu1 }
 0x4b9   :  { %v2648_v50 = vadd.f32 %v3875_v28, %v2647_v3  ;;  %v2639_v3 = vadd.f32 %v3875_v28, %v2638_v32 }
 0x4c0   :  { %v2650_v58 = vpop.f32.mrf.mxu1 }
 0x4c1   :  { %v2651_v1 = vadd.f32 %v3875_v28, %v2650_v58 }
 0x4c3   :  { %3727 = vmatpush.msk.msra.mxu2 %vm1016_vm3, %v2651_v1 }
 0x4c5   :  { %2687 = vmatpush.msra.mxu2 %v2648_v50 }
 0x4c7   :  { %2688 = vmatpush.msra.mxu2 %v2645_v37 }
 0x4e3   :  { %v2158_v41 = vpop.xlane.xlu0 %2157 }
 0x4e4   :  { %v2177_v55 = vsub.f32 %v5942_v34, %v2158_v41  ;;  %v2487_v34 = vsub.f32 %v5756_v40, %v2472_v27  ;;  %v2334_v27 = vsub.f32 %v5785_v26, %v2321_v51  ;;  %v2642_v41 = vadd.f32 %v3875_v28, %v2641_v30  ;;  %v6197_v26 = vpop.f32.mrf.mxu1 }
 0x4e5   :  { %v2636_v51 = vadd.f32 %v3875_v28, %v2635_v15  ;;  %v2489_v28 = vsub.f32 %v5807_v57, %v6158_v2 }
 0x4e6   :  { %v2184_v56 = vmul.f32 1.442695, %v2177_v55  ;;  %v2344_v30 = vmul.f32 1.442695, %v2334_v27  ;;  %2689 = vmatpush.msra.mxu2 %v2642_v41 }
 0x4e7   :  { %v2500_v57 = vmul.f32 1.442695, %v2489_v28 }
 0x4e8   :  { %4009 = vpow2.f32 %v2184_v56  ;;  %2690 = vmatpush.msra.mxu2 %v2639_v3 }
 0x4e9   :  { %4011 = vpow2.f32 %v2036_v42 }
 0x4ea   :  { %2691 = vmatpush.msra.mxu2 %v2636_v51 }
 0x4eb   :  { %v2161_v25 = vpop.xlane.xlu2 %2160  ;;  %v6186_v40 = vpop.xlane.xlu0 %2326 }
 0x4ec   :  { %v2178_v4 = vsub.f32 %v5975_v44, %v2161_v25  ;;  %v2496_v44 = vmul.f32 1.442695, %v2487_v34  ;;  %v2498_v25 = vmul.f32 1.442695, %v2488_v43  ;;  %2692 = vmatpush.msra.mxu2 %v2633_v12 }
 0x4ee   :  { %v6176_v19 = vpop.eup %4009  ;;  %v2186_v39 = vmul.f32 1.442695, %v2178_v4 }
 0x4ef   :  { %v2198_v9 = vsel %vm336_vm1, %v6176_v19, 0.0  ;;  %v6184_v61 = vpop.eup %4011 }
 0x4f0   :  { %4013 = vpow2.f32 %v2186_v39  ;;  %2199 = vadd.xlane.f32.xlu0 %v2198_v9  ;;  %v2053_v42 = vsel %vm336_vm1, %v6184_v61, 0.0  ;;  %v3876_v39 = vld [vmem:[%s6877_s15 + $0x1] ss:$0 sm:$0xff] }
 0x4f1   :  { %4015 = vpow2.f32 %v2496_v44  ;;  %v2826_v27 = vadd.f32 %v3876_v39, %v2825_v38  ;;  %v2823_v3 = vadd.f32 %v3876_v39, %v6168_v63 }
 0x4f3   :  { %v2164_v21 = vpop.xlane.xlu1 %2163  ;;  %v6181_v60 = vpop.xlane.xlu2 %2480 }
 0x4f4   :  { %v2179_v33 = vsub.f32 %v6006_v14, %v2164_v21  ;;  %v2828_v14 = vpop.f32.mrf.mxu3 }
 0x4f5   :  { %v2829_v21 = vadd.f32 %v3876_v39, %v2828_v14 }
 0x4f6   :  { %v6190_v55 = vpop.eup %4013  ;;  %v2188_v56 = vmul.f32 1.442695, %v2179_v33 }
 0x4f7   :  { %v2201_v52 = vsel %vm336_vm1, %v6190_v55, 0.0  ;;  %v6204_v4 = vpop.eup %4015 }
 0x4f8   :  { %4017 = vpow2.f32 %v2188_v56  ;;  %2202 = vadd.xlane.f32.xlu1 %v2201_v52  ;;  %2054 = vadd.xlane.f32.xlu0 %v2053_v42  ;;  %v2512_v50 = vsel %vm336_vm1, %v6204_v4, 0.0  ;;  %v2028_v52 = vsub.f32 %v5813_v22, %v6164_v17 }
 0x4f9   :  { %4019 = vpow2.f32 %v2344_v30  ;;  %v2336_v30 = vsub.f32 %v5968_v0, %v6186_v40 }
 0x4fa   :  { %4021 = vpow2.f32 %v2498_v25  ;;  %v2817_v25 = vadd.f32 %v3876_v39, %v6156_v5  ;;  %v2040_v0 = vmul.f32 1.442695, %v2028_v52  ;;  %v2490_v5 = vsub.f32 %v6001_v48, %v6181_v60 }
 0x4fb   :  { %v6200_v32 = vpop.xlane.xlu1 %2045  ;;  %v6202_v59 = vpop.xlane.xlu2 %2329  ;;  %v2348_v40 = vmul.f32 1.442695, %v2336_v30 }
 0x4fc   :  { %v2167_v34 = vpop.xlane.xlu0 %2166  ;;  %v2831_v44 = vpop.f32.mrf.mxu3  ;;  %v2502_v48 = vmul.f32 1.442695, %v2490_v5  ;;  %v3877_v5 = vld [vmem:[%s6877_s15 + $0x2] ss:$0 sm:$0xff] }
 0x4fd   :  { %v2180_v9 = vsub.f32 %v6034_v31, %v2167_v34  ;;  %v6220_v31 = vpop.f32.mrf.mxu1  ;;  %v2832_v37 = vadd.f32 %v3876_v39, %v2831_v44 }
 0x4fe   :  { %v6210_v15 = vpop.eup %4017 }
 0x4ff   :  { %v2190_v58 = vmul.f32 1.442695, %v2180_v9  ;;  %v2204_v1 = vsel %vm336_vm1, %v6210_v15, 0.0  ;;  %v6222_v13 = vpop.eup %4019  ;;  %3752 = vmatpush.msk.msra.mxu0 %vm1016_vm3, %v2832_v37 }
 0x500   :  { %2513 = vadd.xlane.f32.xlu1 %v2512_v50  ;;  %2205 = vadd.xlane.f32.xlu0 %v2204_v1  ;;  %v6227_v41 = vpop.eup %4021  ;;  %v2361_v14 = vsel %vm336_vm1, %v6222_v13, 0.0 }
 0x501   :  { %4023 = vpow2.f32 %v2190_v58  ;;  %2868 = vmatpush.msra.mxu0 %v2829_v21  ;;  %v2515_v63 = vsel %vm336_vm1, %v6227_v41, 0.0 }
 0x502   :  { %4025 = vpow2.f32 %v2346_v35 }
 0x503   :  { %v6224_v2 = vpop.xlane.xlu1 %2353  ;;  %v2170_v33 = vpop.xlane.xlu2 %2169  ;;  %4027 = vpow2.f32 %v2500_v57  ;;  %2869 = vmatpush.msra.mxu0 %v2826_v27 }
 0x504   :  { %v2181_v43 = vsub.f32 %v6058_v29, %v2170_v33  ;;  %v6230_v56 = vpop.xlane.xlu0 %2507  ;;  %v2820_v29 = vadd.f32 %v3876_v39, %v6160_v53  ;;  %v6248_v51 = vpop.f32.mrf.mxu3  ;;  %v2814_v53 = vadd.f32 %v3876_v39, %v6154_v6  ;;  %v2029_v6 = vsub.f32 %v5827_v18, %v6170_v16 }
 0x505   :  { %v6246_v17 = vpop.f32.mrf.mxu1  ;;  %2870 = vmatpush.msra.mxu0 %v2823_v3  ;;  %v2337_v33 = vsub.f32 %v6024_v24, %v6202_v59 }
 0x506   :  { %v2192_v42 = vmul.f32 1.442695, %v2181_v43  ;;  %v2042_v18 = vmul.f32 1.442695, %v2029_v6 }
 0x507   :  { %v6237_v38 = vpop.eup %4023  ;;  %2871 = vmatpush.msra.mxu0 %v2820_v29  ;;  %v2350_v24 = vmul.f32 1.442695, %v2337_v33  ;;  %v2998_v33 = vadd.f32 %v3877_v5, %v6220_v31 }
 0x508   :  { %4029 = vpow2.f32 %v2192_v42  ;;  %2362 = vadd.xlane.f32.xlu1 %v2361_v14  ;;  %2516 = vadd.xlane.f32.xlu0 %v2515_v63  ;;  %v2207_v22 = vsel %vm336_vm1, %v6237_v38, 0.0  ;;  %v6252_v34 = vpop.eup %4025 }
 0x509   :  { %2208 = vadd.xlane.f32.xlu2 %v2207_v22  ;;  %v6257_v28 = vpop.eup %4027  ;;  %2872 = vmatpush.msra.mxu0 %v2817_v25  ;;  %4031 = vpow2.f32 %v2040_v0 }
 0x50a   :  { %4033 = vpow2.f32 %v2348_v40  ;;  %v2518_v1 = vsel %vm336_vm1, %v6257_v28, 0.0 }
 0x50b   :  { %v2173_v12 = vpop.xlane.xlu1 %2172  ;;  %2873 = vmatpush.msra.mxu0 %v2814_v53  ;;  %v2484_v60 = vpop.xlane.xlu2 %2483 }
 0x50c   :  { %v2182_v9 = vsub.f32 %v6088_v10, %v2173_v12  ;;  %v6255_v62 = vpop.xlane.xlu0 %2356  ;;  %v2364_v10 = vsel %vm336_vm1, %v6252_v34, 0.0  ;;  %v6271_v21 = vpop.f32.mrf.mxu3  ;;  %v2491_v43 = vsub.f32 %v6079_v47, %v2484_v60 }
 0x50d   :  { %v3003_v44 = vpop.f32.mrf.mxu1 }
 0x50e   :  { %v6259_v58 = vpop.eup %4029  ;;  %v2194_v50 = vmul.f32 1.442695, %v2182_v9  ;;  %v2504_v59 = vmul.f32 1.442695, %v2491_v43  ;;  %v3004_v60 = vadd.f32 %v3877_v5, %v3003_v44  ;;  %v2995_v43 = vadd.f32 %v3877_v5, %v6197_v26 }
 0x50f   :  { %v2210_v39 = vsel %vm336_vm1, %v6259_v58, 0.0  ;;  %v6273_v16 = vpop.eup %4031 }
 0x510   :  { %2211 = vadd.xlane.f32.xlu1 %v2210_v39  ;;  %4035 = vpow2.f32 %v2194_v50  ;;  %2365 = vadd.xlane.f32.xlu0 %v2364_v10  ;;  %v6275_v35 = vpop.eup %4033  ;;  %v2059_v52 = vsel %vm336_vm1, %v6273_v16, 0.0 }
 0x511   :  { %2519 = vadd.xlane.f32.xlu2 %v2518_v1  ;;  %4037 = vpow2.f32 %v2502_v48 }
 0x512   :  { %4039 = vpow2.f32 %v2042_v18 }
 0x514   :  { %v2176_v37 = vpop.xlane.xlu0 %2175  ;;  %v3181_v30 = vpop.f32.mrf.mxu3 }
 0x515   :  { %v2183_v57 = vsub.f32 %v6117_v36, %v2176_v37  ;;  %v2367_v36 = vsel %vm336_vm1, %v6275_v35, 0.0  ;;  %v3006_v14 = vpop.f32.mrf.mxu1  ;;  %v3001_v37 = vadd.f32 %v3877_v5, %v6246_v17 }
 0x516   :  { %v6280_v27 = vpop.eup %4035  ;;  %v3007_v18 = vadd.f32 %v3877_v5, %v3006_v14 }
 0x517   :  { %v2196_v3 = vmul.f32 1.442695, %v2183_v57  ;;  %v2213_v42 = vsel %vm336_vm1, %v6280_v27, 0.0  ;;  %v6289_v29 = vpop.eup %4037 }
 0x518   :  { %2060 = vadd.xlane.f32.xlu1 %v2059_v52  ;;  %2214 = vadd.xlane.f32.xlu0 %v2213_v42  ;;  %v6291_v47 = vpop.eup %4039  ;;  %v2521_v22 = vsel %vm336_vm1, %v6289_v29, 0.0 }
 0x519   :  { %4041 = vpow2.f32 %v2196_v3  ;;  %2368 = vadd.xlane.f32.xlu2 %v2367_v36  ;;  %v2062_v25 = vsel %vm355_vm2, %v6291_v47, 0.0  ;;  %v3878_v3 = vld [vmem:[%s6877_s15 + $0x3] ss:$0 sm:$0xff]  ;;  %s3789_s15 = sld [smem:[#allocation4 + $0x3]] }
 0x51a   :  { %4043 = vpow2.f32 %v2350_v24  ;;  %v3182_v14 = vadd.f32 %v3878_v3, %v3181_v30  ;;  %v3179_v31 = vadd.f32 %v3878_v3, %v6271_v21  ;;  %v3176_v26 = vadd.f32 %v3878_v3, %v6248_v51  ;;  %v2049_v24 = vpop.xlane.xlu2 %2048  ;;  %v2052_v21 = vpop.xlane.xlu1 %2051 }
 0x51b   :  { %4045 = vpow2.f32 %v2504_v59 }
 0x51c   :  { %v3184_v40 = vpop.f32.mrf.mxu3  ;;  %4047 = vrcp.f32 %v6200_v32  ;;  %v6333_v32 = vstv %s2541_s2 }
 0x51d   :  { %v3009_v53 = vpop.f32.mrf.mxu1  ;;  %v3185_v17 = vadd.f32 %v3878_v3, %v3184_v40  ;;  %4049 = vrcp.f32 %v6224_v2  ;;  %v6335_v2 = vstv %s3735_s19 }
 0x51e   :  { %v3010_v1 = vadd.f32 %v3877_v5, %v3009_v53  ;;  %4051 = vrcp.f32 %v6230_v56  ;;  %v6339_v56 = vstv %s3785_s5  ;;  %v6341_v53 = vstv %s3718_s6 }
 0x51f   :  { %v6293_v63 = vpop.eup %4041  ;;  %6881 = vst [vmem:[#allocation10_spill] sm:$0xff] %v6339_v56 }
 0x520   :  { %2522 = vadd.xlane.f32.xlu1 %v2521_v22  ;;  %v2216_v0 = vsel %vm355_vm2, %v6293_v63, 0.0  ;;  %2063 = vadd.xlane.f32.xlu0 %v2062_v25  ;;  %v6301_v12 = vpop.eup %4043 }
 0x521   :  { %2217 = vadd.xlane.f32.xlu2 %v2216_v0  ;;  %6878 = vst [vmem:[#allocation9_spill] sm:$0xff] %v6301_v12  ;;  %v6303_v9 = vpop.eup %4045  ;;  %v2370_v50 = vsel %vm355_vm2, %v6301_v12, 0.0  ;;  %v6337_v0 = vstv %s3760_s20 }
 0x522   :  { %6879 = vst [vmem:[#allocation11_spill] sm:$0xff] %v6303_v9  ;;  %v2524_v6 = vsel %vm355_vm2, %v6303_v9, 0.0  ;;  %v2511_v51 = vpop.xlane.xlu2 %2510  ;;  %v4048_v59 = vpop.eup %4047 }
 0x523   :  { %v4050_v22 = vpop.eup %4049  ;;  %6880 = vst [vmem:[#allocation8_spill] sm:$0xff] %v6337_v0  ;;  %v2072_v40 = vmul.f32 %v4048_v59, %v6032_v46 }
 0x524   :  { %v3187_v10 = vpop.f32.mrf.mxu3  ;;  %v4052_v25 = vpop.eup %4051 }
 0x525   :  { %v3012_v39 = vpop.f32.mrf.mxu1  ;;  %v3188_v36 = vadd.f32 %v3878_v3, %v3187_v10  ;;  %v6351_v10 = vstv %s3719_s22  ;;  %v2534_v46 = vmul.f32 %v4052_v25, %v6055_v7  ;;  %v2724_v7 = vmul.f32 %v6335_v2, %v2072_v40 }
 0x526   :  { %v3013_v48 = vadd.f32 %v3877_v5, %v3012_v39  ;;  %v6344_v5 = vstv %s3737_s26  ;;  %v2380_v39 = vmul.f32 %v4050_v22, %v6053_v20  ;;  %v6370_v20 = vstv %s6329_s28 }
 0x527   :  { %6884 = vst [vmem:[#allocation15_spill] sm:$0xff] %v6370_v20  ;;  %v2584_v22 = vmul.f32 %v6351_v10, %v2534_v46 }
 0x528   :  { %2371 = vadd.xlane.f32.xlu1 %v2370_v50  ;;  %2525 = vadd.xlane.f32.xlu0 %v2524_v6  ;;  %v6346_v50 = vstv %s3762_s27  ;;  %v6348_v6 = vstv %s3787_s21 }
 0x529   :  { %3777 = vmatpush.msk.msrb.mxu2 %vm1016_vm3, %v3013_v48  ;;  %6882 = vst [vmem:[#allocation12_spill] sm:$0xff] %v6346_v50  ;;  %v6355_v48 = vstv %s3763_s10  ;;  %v3111_v59 = vmul.f32 %v6348_v6, %v2380_v39 }
 0x52a   :  { %6883 = vst [vmem:[#allocation13_spill] sm:$0xff] %v6348_v6 }
 0x52b   :  { %3049 = vmatpush.msrb.mxu2 %v3010_v1  ;;  %v6353_v1 = vstv %s3738_s9 }
 0x52c   :  { %v3190_v57 = vpop.f32.mrf.mxu3 }
 0x52d   :  { %3050 = vmatpush.msrb.mxu2 %v3007_v18  ;;  %v3191_v42 = vadd.f32 %v3878_v3, %v3190_v57  ;;  %v6357_v18 = vstv %s3788_s23  ;;  %v6364_v57 = vstv %s6324_s24 }
 0x52f   :  { %3051 = vmatpush.msrb.mxu2 %v3004_v60 }
 0x531   :  { %3052 = vmatpush.msrb.mxu2 %v3001_v37  ;;  %v2360_v37 = vpop.xlane.xlu2 %2359 }
 0x533   :  { %3053 = vmatpush.msrb.mxu2 %v2998_v33  ;;  %v6367_v33 = vstv %s6327_s25 }
 0x534   :  { %v3193_v52 = vpop.f32.mrf.mxu3 }
 0x535   :  { %3054 = vmatpush.msrb.mxu2 %v2995_v43  ;;  %v3194_v44 = vadd.f32 %v3878_v3, %v3193_v52  ;;  %v6373_v43 = vstv %s6331_s7  ;;  %v2543_v3 = vmul.f32 %v6333_v32, %v2072_v40 }
 0x536   :  { %6885 = vst [vmem:[#allocation14_spill] sm:$0xff] %v6373_v43 }
 0x537   :  { %3802 = vmatpush.msk.msrb.mxu0 %vm1016_vm3, %v3194_v44  ;;  %v2905_v44 = vmul.f32 %v6337_v0, %v2072_v40  ;;  %v2765_v0 = vmul.f32 %v6353_v1, %v2534_v46 }
 0x539   :  { %3230 = vmatpush.msrb.mxu0 %v3191_v42 }
 0x53b   :  { %3231 = vmatpush.msrb.mxu0 %v3188_v36  ;;  %v3086_v36 = vmul.f32 %v6339_v56, %v2072_v40 }
 0x53d   :  { %3232 = vmatpush.msrb.mxu0 %v3185_v17  ;;  %v2568_v17 = vmul.f32 %v6341_v53, %v2380_v39 }
 0x53f   :  { %3233 = vmatpush.msrb.mxu0 %v3182_v14 }
 0x541   :  { %3234 = vmatpush.msrb.mxu0 %v3179_v31 }
 0x543   :  { %3235 = vmatpush.msrb.mxu0 %v3176_v26 }
 0x563   :  { %v2200_v30 = vpop.xlane.xlu0 %2199 }
 0x564   :  { %4053 = vrcp.f32 %v2200_v30  ;;  %v2930_v30 = vmul.f32 %v6346_v50, %v2380_v39 }
 0x565   :  { %4055 = vrcp.f32 %v2049_v24 }
 0x566   :  { %4057 = vrcp.f32 %v6255_v62 }
 0x567   :  { %4059 = vrcp.f32 %v2511_v51 }
 0x56a   :  { %v4054_v60 = vpop.eup %4053 }
 0x56b   :  { %v2226_v62 = vmul.f32 %v4054_v60, %v6176_v19  ;;  %v2203_v52 = vpop.xlane.xlu1 %2202  ;;  %v2055_v42 = vpop.xlane.xlu0 %2054  ;;  %v2749_v19 = vmul.f32 %v6344_v5, %v2380_v39 }
 0x56c   :  { %4061 = vrcp.f32 %v2203_v52  ;;  %v4056_v14 = vpop.eup %4055 }
 0x56d   :  { %v2552_v31 = vmul.f32 %v6364_v57, %v2226_v62  ;;  %v2733_v26 = vmul.f32 %v6367_v33, %v2226_v62  ;;  %v2914_v24 = vmul.f32 %v6370_v20, %v2226_v62  ;;  %v3095_v51 = vmul.f32 %v6373_v43, %v2226_v62  ;;  %v4058_v25 = vpop.eup %4057 }
 0x56e   :  { %v2946_v20 = vmul.f32 %v6355_v48, %v2534_v46  ;;  %4063 = vrcp.f32 %v2052_v21  ;;  %v6394_v62 = vmul.f32 %v4056_v14, %v6108_v45  ;;  %v4060_v50 = vpop.eup %4059 }
 0x56f   :  { %v2559_v40 = vadd.f32 %v2552_v31, %v2543_v3  ;;  %v2740_v60 = vadd.f32 %v2733_v26, %v2724_v7  ;;  %v2921_v52 = vadd.f32 %v2914_v24, %v2905_v44  ;;  %v3102_v56 = vadd.f32 %v3095_v51, %v3086_v36 }
 0x570   :  { %v3127_v3 = vmul.f32 %v6357_v18, %v2534_v46  ;;  %4065 = vrcp.f32 %v2360_v37  ;;  %v6398_v7 = vstv %s6361_s29  ;;  %v6401_v44 = vstv %s6375_s12 }
 0x571   :  { %v2575_v43 = vadd.f32 %v2568_v17, %v2559_v40  ;;  %v2756_v39 = vadd.f32 %v2749_v19, %v2740_v60  ;;  %v2937_v6 = vadd.f32 %v2930_v30, %v2921_v52  ;;  %v3118_v9 = vadd.f32 %v3111_v59, %v3102_v56  ;;  %v2058_v56 = vpop.xlane.xlu2 %2057 }
 0x572   :  { %v4062_v12 = vpop.eup %4061  ;;  %v6409_v17 = vmul.f32 %v4058_v25, %v6086_v54  ;;  %v2544_v46 = vmul.f32 %v6333_v32, %v6394_v62 }
 0x573   :  { %v6404_v36 = vmul.f32 %v4062_v12, %v6190_v55  ;;  %v2514_v21 = vpop.xlane.xlu1 %2513  ;;  %v2206_v31 = vpop.xlane.xlu0 %2205  ;;  %v2591_v45 = vadd.f32 %v2584_v22, %v2575_v43  ;;  %v2772_v14 = vadd.f32 %v2765_v0, %v2756_v39  ;;  %v6406_v26 = vadd.f32 %v2946_v20, %v2937_v6 }
 0x574   :  { %4067 = vrcp.f32 %v2514_v21  ;;  %v6413_v37 = vadd.f32 %v3127_v3, %v3118_v9  ;;  %v2725_v0 = vmul.f32 %v6335_v2, %v6394_v62  ;;  %v4064_v6 = vpop.eup %4063  ;;  %v6420_v20 = vmul.f32 %v4060_v50, %v6133_v49 }
 0x575   :  { %4069 = vrcp.f32 %v2206_v31  ;;  %v2600_v55 = vadd.f32 %v6398_v7, %v2591_v45  ;;  %v2781_v12 = vadd.f32 %v6401_v44, %v2772_v14  ;;  %v2553_v54 = vmul.f32 %v6364_v57, %v6404_v36 }
 0x576   :  { %4071 = vrcp.f32 %v2055_v42  ;;  %v2734_v9 = vmul.f32 %v6367_v33, %v6404_v36  ;;  %v4066_v43 = vpop.eup %4065  ;;  %v2569_v51 = vmul.f32 %v6341_v53, %v6409_v17  ;;  %v2750_v49 = vmul.f32 %v6344_v5, %v6409_v17 }
 0x577   :  { %3728 = vmatmul.msk.f32.vlgmr.msra.gmra.mxu2 %vm336_vm1, %v2600_v55  ;;  %3753 = vmatmul.msk.f32.vlgmr.msra.gmra.mxu0 %vm336_vm1, %v2781_v12  ;;  %v2560_v24 = vadd.f32 %v2553_v54, %v2544_v46  ;;  %v6433_v50 = vmul.f32 %v4064_v6, %v6115_v8  ;;  %v2585_v59 = vmul.f32 %v6351_v10, %v6420_v20  ;;  %4073 = vrcp.f32 %v2058_v56 }
 0x578   :  { %v2741_v19 = vadd.f32 %v2734_v9, %v2725_v0  ;;  %v2766_v25 = vmul.f32 %v6353_v1, %v6420_v20  ;;  %v6440_v60 = vmul.f32 %v4066_v43, %v6142_v23 }
 0x579   :  { %v2576_v30 = vadd.f32 %v2569_v51, %v2560_v24  ;;  %v2545_v46 = vmul.f32 %v6333_v32, %v6433_v50  ;;  %v2726_v12 = vmul.f32 %v6335_v2, %v6433_v50 }
 0x57a   :  { %v4068_v42 = vpop.eup %4067  ;;  %v2757_v22 = vadd.f32 %v2750_v49, %v2741_v19  ;;  %v2570_v6 = vmul.f32 %v6341_v53, %v6440_v60 }
 0x57b   :  { %v4070_v40 = vpop.eup %4069  ;;  %v2363_v52 = vpop.xlane.xlu1 %2362  ;;  %v2592_v31 = vadd.f32 %v2585_v59, %v2576_v30  ;;  %v6446_v14 = vmul.f32 %v4068_v42, %v6204_v4 }
 0x57c   :  { %v2517_v39 = vpop.xlane.xlu0 %2516  ;;  %v4072_v3 = vpop.eup %4071  ;;  %v6443_v8 = vmul.f32 %v4070_v40, %v6210_v15  ;;  %4075 = vrcp.f32 %v2363_v52  ;;  %v2773_v45 = vadd.f32 %v2766_v25, %v2757_v22 }
 0x57d   :  { %v2209_v21 = vpop.xlane.xlu2 %2208  ;;  %v2601_v23 = vadd.f32 %v6398_v7, %v2592_v31  ;;  %v6455_v55 = vmul.f32 %v4072_v3, %v6184_v61  ;;  %v4074_v54 = vpop.eup %4073  ;;  %v2751_v61 = vmul.f32 %v6344_v5, %v6440_v60  ;;  %v2586_v51 = vmul.f32 %v6351_v10, %v6446_v14 }
 0x57e   :  { %4077 = vrcp.f32 %v2209_v21  ;;  %v2782_v56 = vadd.f32 %v6401_v44, %v2773_v45  ;;  %v2554_v15 = vmul.f32 %v6364_v57, %v6443_v8  ;;  %v2735_v4 = vmul.f32 %v6367_v33, %v6443_v8 }
 0x57f   :  { %4079 = vrcp.f32 %v2517_v39  ;;  %3729 = vmatmul.msk.f32.gmra.mxu2 %vm336_vm1, %v2601_v23  ;;  %v2767_v30 = vmul.f32 %v6353_v1, %v6446_v14  ;;  %v2546_v59 = vmul.f32 %v6333_v32, %v6455_v55  ;;  %v2727_v45 = vmul.f32 %v6335_v2, %v6455_v55 }
 0x580   :  { %3754 = vmatmul.msk.f32.gmra.mxu0 %vm336_vm1, %v2782_v56  ;;  %v2561_v0 = vadd.f32 %v2554_v15, %v2545_v46  ;;  %v2742_v9 = vadd.f32 %v2735_v4, %v2726_v12  ;;  %v6490_v23 = vmul.f32 %v4074_v54, %v6148_v11 }
 0x582   :  { %v4076_v43 = vpop.eup %4075  ;;  %v2577_v24 = vadd.f32 %v2570_v6, %v2561_v0  ;;  %v2758_v42 = vadd.f32 %v2751_v61, %v2742_v9 }
 0x583   :  { %v2212_v49 = vpop.xlane.xlu1 %2211  ;;  %v6474_v25 = vmul.f32 %v4076_v43, %v6222_v13 }
 0x584   :  { %v4078_v19 = vpop.eup %4077  ;;  %4081 = vrcp.f32 %v2212_v49  ;;  %v2366_v39 = vpop.xlane.xlu0 %2365  ;;  %v2593_v3 = vadd.f32 %v2586_v51, %v2577_v24  ;;  %v2774_v31 = vadd.f32 %v2767_v30, %v2758_v42  ;;  %v2547_v51 = vmul.f32 %v6333_v32, %v6490_v23 }
 0x585   :  { %v4080_v22 = vpop.eup %4079  ;;  %v6477_v40 = vmul.f32 %v4078_v19, %v6237_v38  ;;  %v2520_v52 = vpop.xlane.xlu2 %2519  ;;  %v2571_v15 = vmul.f32 %v6341_v53, %v6474_v25  ;;  %v2752_v4 = vmul.f32 %v6344_v5, %v6474_v25  ;;  %v2728_v19 = vmul.f32 %v6335_v2, %v6490_v23 }
 0x586   :  { %v6480_v21 = vmul.f32 %v4080_v22, %v6227_v41  ;;  %4083 = vrcp.f32 %v2520_v52  ;;  %v2602_v46 = vadd.f32 %v6398_v7, %v2593_v3  ;;  %v2783_v41 = vadd.f32 %v6401_v44, %v2774_v31 }
 0x587   :  { %4085 = vrcp.f32 %v2366_v39  ;;  %v2555_v13 = vmul.f32 %v6364_v57, %v6477_v40  ;;  %v2736_v38 = vmul.f32 %v6367_v33, %v6477_v40 }
 0x588   :  { %3730 = vmatmul.msk.f32.gmra.mxu2 %vm336_vm1, %v2602_v46  ;;  %3755 = vmatmul.msk.f32.gmra.mxu0 %vm336_vm1, %v2783_v41  ;;  %v2587_v11 = vmul.f32 %v6351_v10, %v6480_v21  ;;  %v2768_v9 = vmul.f32 %v6353_v1, %v6480_v21 }
 0x589   :  { %v2562_v56 = vadd.f32 %v2555_v13, %v2546_v59  ;;  %v2743_v12 = vadd.f32 %v2736_v38, %v2727_v45 }
 0x58a   :  { %v4082_v0 = vpop.eup %4081 }
 0x58b   :  { %v2578_v6 = vadd.f32 %v2571_v15, %v2562_v56  ;;  %v2759_v54 = vadd.f32 %v2752_v4, %v2743_v12  ;;  %v6504_v43 = vmul.f32 %v4082_v0, %v6259_v58  ;;  %v2061_v24 = vpop.xlane.xlu1 %2060 }
 0x58c   :  { %v4084_v61 = vpop.eup %4083  ;;  %4087 = vrcp.f32 %v2061_v24  ;;  %v2215_v59 = vpop.xlane.xlu0 %2214 }
 0x58d   :  { %v4086_v49 = vpop.eup %4085  ;;  %v6511_v42 = vmul.f32 %v4084_v61, %v6257_v28  ;;  %v2369_v30 = vpop.xlane.xlu2 %2368  ;;  %v2594_v22 = vadd.f32 %v2587_v11, %v2578_v6  ;;  %v2775_v52 = vadd.f32 %v2768_v9, %v2759_v54  ;;  %v2556_v58 = vmul.f32 %v6364_v57, %v6504_v43 }
 0x58e   :  { %v6514_v39 = vmul.f32 %v4086_v49, %v6252_v34  ;;  %4089 = vrcp.f32 %v2369_v30  ;;  %v2737_v3 = vmul.f32 %v6367_v33, %v6504_v43 }
 0x58f   :  { %4091 = vrcp.f32 %v2215_v59  ;;  %v2603_v31 = vadd.f32 %v6398_v7, %v2594_v22  ;;  %v2784_v28 = vadd.f32 %v6401_v44, %v2775_v52  ;;  %v2563_v45 = vadd.f32 %v2556_v58, %v2547_v51 }
 0x590   :  { %v2572_v46 = vmul.f32 %v6341_v53, %v6514_v39  ;;  %v2744_v13 = vadd.f32 %v2737_v3, %v2728_v19  ;;  %v2753_v34 = vmul.f32 %v6344_v5, %v6514_v39  ;;  %v2588_v41 = vmul.f32 %v6351_v10, %v6511_v42 }
 0x591   :  { %3731 = vmatmul.msk.f32.gmra.mxu2 %vm336_vm1, %v2603_v31  ;;  %3756 = vmatmul.msk.f32.gmra.mxu0 %vm336_vm1, %v2784_v28  ;;  %v2769_v15 = vmul.f32 %v6353_v1, %v6511_v42 }
 0x592   :  { %v2579_v38 = vadd.f32 %v2572_v46, %v2563_v45  ;;  %v2760_v56 = vadd.f32 %v2753_v34, %v2744_v13  ;;  %v4088_v12 = vpop.eup %4087 }
 0x593   :  { %v6533_v0 = vmul.f32 %v4088_v12, %v6273_v16  ;;  %v2523_v6 = vpop.xlane.xlu1 %2522 }
 0x594   :  { %v4090_v4 = vpop.eup %4089  ;;  %v2595_v11 = vadd.f32 %v2588_v41, %v2579_v38  ;;  %v2776_v54 = vadd.f32 %v2769_v15, %v2760_v56  ;;  %4093 = vrcp.f32 %v2523_v6  ;;  %v2064_v24 = vpop.xlane.xlu0 %2063 }
 0x595   :  { %v4092_v9 = vpop.eup %4091  ;;  %v2218_v61 = vpop.xlane.xlu2 %2217  ;;  %v6541_v30 = vmul.f32 %v4090_v4, %v6275_v35  ;;  %v2548_v16 = vmul.f32 %v6333_v32, %v6533_v0  ;;  %v2729_v59 = vmul.f32 %v6335_v2, %v6533_v0 }
 0x596   :  { %v6536_v51 = vmul.f32 %v4092_v9, %v6280_v27  ;;  %4095 = vrcp.f32 %v2218_v61  ;;  %v2604_v19 = vadd.f32 %v6398_v7, %v2595_v11  ;;  %v2785_v49 = vadd.f32 %v6401_v44, %v2776_v54 }
 0x597   :  { %4097 = vrcp.f32 %v2064_v24  ;;  %v2573_v3 = vmul.f32 %v6341_v53, %v6541_v30  ;;  %v2754_v31 = vmul.f32 %v6344_v5, %v6541_v30 }
 0x598   :  { %v2557_v22 = vmul.f32 %v6364_v57, %v6536_v51  ;;  %v2738_v27 = vmul.f32 %v6367_v33, %v6536_v51 }
 0x599   :  { %3732 = vmatmul.msk.f32.gmra.mxu2 %vm336_vm1, %v2604_v19  ;;  %3757 = vmatmul.msk.f32.gmra.mxu0 %vm336_vm1, %v2785_v49  ;;  %v6886_v49 = vld [vmem:[#allocation9_spill] sm:$0xff] }
 0x59a   :  { %v2564_v52 = vadd.f32 %v2557_v22, %v2548_v16  ;;  %v2745_v35 = vadd.f32 %v2738_v27, %v2729_v59  ;;  %v4094_v58 = vpop.eup %4093 }
 0x59b   :  { %v6558_v45 = vmul.f32 %v4094_v58, %v6289_v29  ;;  %v2372_v46 = vpop.xlane.xlu1 %2371 }
 0x59c   :  { %v4096_v28 = vpop.eup %4095  ;;  %4099 = vrcp.f32 %v2372_v46  ;;  %v2526_v38 = vpop.xlane.xlu0 %2525  ;;  %v2580_v41 = vadd.f32 %v2573_v3, %v2564_v52  ;;  %v2761_v56 = vadd.f32 %v2754_v31, %v2745_v35  ;;  %v6888_v46 = vld [vmem:[#allocation15_spill] sm:$0xff] }
 0x59d   :  { %v4098_v13 = vpop.eup %4097  ;;  %v6561_v34 = vmul.f32 %v4096_v28, %v6293_v63  ;;  %4101 = vrcp.f32 %v2526_v38  ;;  %v2589_v12 = vmul.f32 %v6351_v10, %v6558_v45  ;;  %v2770_v29 = vmul.f32 %v6353_v1, %v6558_v45 }
 0x59e   :  { %v6564_v15 = vmul.f32 %v4098_v13, %v6291_v47  ;;  %v2915_v13 = vmul.f32 %v6888_v46, %v6404_v36 }
 0x59f   :  { %v2596_v4 = vadd.f32 %v2589_v12, %v2580_v41  ;;  %v2777_v6 = vadd.f32 %v2770_v29, %v2761_v56  ;;  %v2558_v63 = vmul.f32 %v6364_v57, %v6561_v34  ;;  %v2739_v11 = vmul.f32 %v6367_v33, %v6561_v34  ;;  %v6887_v57 = vld [vmem:[#allocation11_spill] sm:$0xff]  ;;  %v6891_v41 = vld [vmem:[#allocation10_spill] sm:$0xff] }
 0x5a0   :  { %v2549_v9 = vmul.f32 %v6333_v32, %v6564_v15  ;;  %v2730_v61 = vmul.f32 %v6335_v2, %v6564_v15  ;;  %v3087_v56 = vmul.f32 %v6891_v41, %v6394_v62  ;;  %v6608_v29 = vstv %s3764_s30 }
 0x5a1   :  { %v2605_v54 = vadd.f32 %v6398_v7, %v2596_v4  ;;  %v2786_v47 = vadd.f32 %v6401_v44, %v2777_v6  ;;  %v6892_v4 = vld [vmem:[#allocation12_spill] sm:$0xff] }
 0x5a2   :  { %v4100_v24 = vpop.eup %4099  ;;  %v2565_v59 = vadd.f32 %v2558_v63, %v2549_v9  ;;  %v2746_v32 = vadd.f32 %v2739_v11, %v2730_v61  ;;  %v2931_v6 = vmul.f32 %v6892_v4, %v6409_v17  ;;  %v2916_v11 = vmul.f32 %v6888_v46, %v6443_v8 }
 0x5a3   :  { %v4102_v19 = vpop.eup %4101  ;;  %v6581_v16 = vmul.f32 %v4100_v24, %v6886_v49  ;;  %3733 = vmatmul.msk.f32.gmra.mxu2 %vm336_vm1, %v2605_v54  ;;  %3758 = vmatmul.msk.f32.gmra.mxu0 %vm336_vm1, %v2786_v47 }
 0x5a4   :  { %v6586_v33 = vmul.f32 %v4102_v19, %v6887_v57 }
 0x5a5   :  { %v2574_v22 = vmul.f32 %v6341_v53, %v6581_v16  ;;  %v2755_v2 = vmul.f32 %v6344_v5, %v6581_v16  ;;  %v6889_v5 = vld [vmem:[#allocation14_spill] sm:$0xff] }
 0x5a6   :  { %v2590_v52 = vmul.f32 %v6351_v10, %v6586_v33  ;;  %v2771_v58 = vmul.f32 %v6353_v1, %v6586_v33  ;;  %v3096_v38 = vmul.f32 %v6889_v5, %v6404_v36  ;;  %v6890_v10 = vld [vmem:[#allocation8_spill] sm:$0xff]  ;;  %v6893_v36 = vld [vmem:[#allocation13_spill] sm:$0xff]  ;;  %v3097_v54 = vmul.f32 %v6889_v5, %v6443_v8 }
 0x5a7   :  { %v2581_v27 = vadd.f32 %v2574_v22, %v2565_v59  ;;  %v2762_v35 = vadd.f32 %v2755_v2, %v2746_v32  ;;  %v2906_v1 = vmul.f32 %v6890_v10, %v6394_v62  ;;  %v3112_v63 = vmul.f32 %v6893_v36, %v6409_v17 }
 0x5a8   :  { %v2962_v62 = vadd.f32 %v6608_v29, %v6406_v26  ;;  %v2907_v24 = vmul.f32 %v6890_v10, %v6433_v50  ;;  %v3088_v17 = vmul.f32 %v6891_v41, %v6433_v50  ;;  %v2947_v8 = vmul.f32 %v6355_v48, %v6420_v20 }
 0x5a9   :  { %v2597_v3 = vadd.f32 %v2590_v52, %v2581_v27  ;;  %v2778_v31 = vadd.f32 %v2771_v58, %v2762_v35  ;;  %v2922_v12 = vadd.f32 %v2915_v13, %v2906_v1  ;;  %v3128_v26 = vmul.f32 %v6357_v18, %v6420_v20 }
 0x5aa   :  { %v2923_v19 = vadd.f32 %v2916_v11, %v2907_v24  ;;  %v2932_v59 = vmul.f32 %v6892_v4, %v6440_v60  ;;  %v3113_v50 = vmul.f32 %v6893_v36, %v6440_v60  ;;  %v2917_v52 = vmul.f32 %v6888_v46, %v6477_v40 }
 0x5ab   :  { %v2606_v28 = vadd.f32 %v6398_v7, %v2597_v3  ;;  %v2787_v53 = vadd.f32 %v6401_v44, %v2778_v31  ;;  %v3103_v7 = vadd.f32 %v3096_v38, %v3087_v56  ;;  %v6610_v44 = vstv %s3789_s15 }
 0x5ac   :  { %v3143_v47 = vadd.f32 %v6610_v44, %v6413_v37  ;;  %v2938_v9 = vadd.f32 %v2931_v6, %v2922_v12  ;;  %v3104_v37 = vadd.f32 %v3097_v54, %v3088_v17  ;;  %v2939_v22 = vadd.f32 %v2932_v59, %v2923_v19 }
 0x5ad   :  { %3734 = vmatmul.msk.f32.gmra.mxu2 %vm336_vm1, %v2606_v28  ;;  %3759 = vmatmul.msk.f32.gmra.mxu0 %vm336_vm1, %v2787_v53  ;;  %v3119_v61 = vadd.f32 %v3112_v63, %v3103_v7  ;;  %v3098_v20 = vmul.f32 %v6889_v5, %v6477_v40  ;;  %v2948_v35 = vmul.f32 %v6355_v48, %v6446_v14 }
 0x5ae   :  { %v2954_v49 = vadd.f32 %v2947_v8, %v2938_v9  ;;  %v3120_v32 = vadd.f32 %v3113_v50, %v3104_v37  ;;  %v3129_v58 = vmul.f32 %v6357_v18, %v6446_v14  ;;  %v2908_v60 = vmul.f32 %v6890_v10, %v6455_v55 }
 0x5af   :  { %v3135_v57 = vadd.f32 %v3128_v26, %v3119_v61  ;;  %v3089_v3 = vmul.f32 %v6891_v41, %v6455_v55  ;;  %v2955_v31 = vadd.f32 %v2948_v35, %v2939_v22  ;;  %v2933_v13 = vmul.f32 %v6892_v4, %v6474_v25 }
 0x5b0   :  { %v2963_v2 = vadd.f32 %v6608_v29, %v2954_v49  ;;  %v3136_v28 = vadd.f32 %v3129_v58, %v3120_v32  ;;  %v2924_v53 = vadd.f32 %v2917_v52, %v2908_v60  ;;  %v3114_v14 = vmul.f32 %v6893_v36, %v6474_v25 }
 0x5b1   :  { %v3144_v27 = vadd.f32 %v6610_v44, %v3135_v57  ;;  %v3105_v40 = vadd.f32 %v3098_v20, %v3089_v3  ;;  %v2964_v38 = vadd.f32 %v6608_v29, %v2955_v31  ;;  %v2918_v7 = vmul.f32 %v6888_v46, %v6504_v43 }
 0x5b2   :  { %v3145_v1 = vadd.f32 %v6610_v44, %v3136_v28  ;;  %v2940_v56 = vadd.f32 %v2933_v13, %v2924_v53  ;;  %v3099_v55 = vmul.f32 %v6889_v5, %v6504_v43  ;;  %v2909_v6 = vmul.f32 %v6890_v10, %v6490_v23 }
 0x5b3   :  { %v3121_v12 = vadd.f32 %v3114_v14, %v3105_v40  ;;  %v2949_v25 = vmul.f32 %v6355_v48, %v6480_v21  ;;  %v3130_v63 = vmul.f32 %v6357_v18, %v6480_v21  ;;  %v3090_v11 = vmul.f32 %v6891_v41, %v6490_v23 }
 0x5b4   :  { %v2934_v9 = vmul.f32 %v6892_v4, %v6514_v39  ;;  %v3115_v61 = vmul.f32 %v6893_v36, %v6514_v39  ;;  %v2910_v21 = vmul.f32 %v6890_v10, %v6533_v0  ;;  %v2919_v23 = vmul.f32 %v6888_v46, %v6536_v51 }
 0x5b5   :  { %3778 = vmatmul.msk.f32.vlgmr.msrb.gmra.mxu2 %vm336_vm1, %v2962_v62  ;;  %3803 = vmatmul.msk.f32.vlgmr.msrb.gmra.mxu0 %vm336_vm1, %v3143_v47  ;;  %v2956_v54 = vadd.f32 %v2949_v25, %v2940_v56  ;;  %v3137_v62 = vadd.f32 %v3130_v63, %v3121_v12  ;;  %v2925_v47 = vadd.f32 %v2918_v7, %v2909_v6 }
 0x5b6   :  { %v3106_v43 = vadd.f32 %v3099_v55, %v3090_v11  ;;  %v3091_v19 = vmul.f32 %v6891_v41, %v6533_v0  ;;  %v3100_v37 = vmul.f32 %v6889_v5, %v6536_v51  ;;  %v2950_v39 = vmul.f32 %v6355_v48, %v6511_v42 }
 0x5b7   :  { %v2965_v24 = vadd.f32 %v6608_v29, %v2956_v54  ;;  %v3146_v17 = vadd.f32 %v6610_v44, %v3137_v62  ;;  %v2941_v8 = vadd.f32 %v2934_v9, %v2925_v47  ;;  %v3131_v49 = vmul.f32 %v6357_v18, %v6511_v42 }
 0x5b8   :  { %v3122_v26 = vadd.f32 %v3115_v61, %v3106_v43  ;;  %v2926_v50 = vadd.f32 %v2919_v23, %v2910_v21  ;;  %v3107_v22 = vadd.f32 %v3100_v37, %v3091_v19  ;;  %v2935_v0 = vmul.f32 %v6892_v4, %v6541_v30 }
 0x5b9   :  { %v2957_v57 = vadd.f32 %v2950_v39, %v2941_v8  ;;  %v3116_v51 = vmul.f32 %v6893_v36, %v6541_v30  ;;  %v3132_v42 = vmul.f32 %v6357_v18, %v6558_v45  ;;  %v2911_v35 = vmul.f32 %v6890_v10, %v6564_v15 }
 0x5ba   :  { %v3138_v59 = vadd.f32 %v3131_v49, %v3122_v26  ;;  %v2942_v52 = vadd.f32 %v2935_v0, %v2926_v50  ;;  %v2920_v30 = vmul.f32 %v6888_v46, %v6561_v34  ;;  %v3092_v58 = vmul.f32 %v6891_v41, %v6564_v15 }
 0x5bb   :  { %v2966_v32 = vadd.f32 %v6608_v29, %v2957_v57  ;;  %v3123_v20 = vadd.f32 %v3116_v51, %v3107_v22  ;;  %v3101_v60 = vmul.f32 %v6889_v5, %v6561_v34  ;;  %v2936_v31 = vmul.f32 %v6892_v4, %v6581_v16 }
 0x5bc   :  { %v3117_v10 = vmul.f32 %v6893_v36, %v6581_v16  ;;  %v2927_v28 = vadd.f32 %v2920_v30, %v2911_v35  ;;  %v2952_v34 = vmul.f32 %v6355_v48, %v6586_v33  ;;  %v3133_v15 = vmul.f32 %v6357_v18, %v6586_v33 }
 0x5bd   :  { %3779 = vmatmul.msk.f32.gmra.mxu2 %vm336_vm1, %v2963_v2  ;;  %3804 = vmatmul.msk.f32.gmra.mxu0 %vm336_vm1, %v3144_v27  ;;  %v3147_v2 = vadd.f32 %v6610_v44, %v3138_v59  ;;  %v2951_v27 = vmul.f32 %v6355_v48, %v6558_v45  ;;  %v3139_v45 = vadd.f32 %v3132_v42, %v3123_v20 }
 0x5be   :  { %v3108_v53 = vadd.f32 %v3101_v60, %v3092_v58  ;;  %v2943_v13 = vadd.f32 %v2936_v31, %v2927_v28 }
 0x5bf   :  { %v2958_v3 = vadd.f32 %v2951_v27, %v2942_v52  ;;  %v3148_v46 = vadd.f32 %v6610_v44, %v3139_v45 }
 0x5c0   :  { %v3124_v14 = vadd.f32 %v3117_v10, %v3108_v53  ;;  %v2959_v5 = vadd.f32 %v2952_v34, %v2943_v13 }
 0x5c1   :  { %v2967_v40 = vadd.f32 %v6608_v29, %v2958_v3 }
 0x5c2   :  { %v3140_v16 = vadd.f32 %v3133_v15, %v3124_v14  ;;  %v2968_v41 = vadd.f32 %v6608_v29, %v2959_v5 }
 0x5c4   :  { %v3149_v4 = vadd.f32 %v6610_v44, %v3140_v16 }
 0x5c5   :  { %3780 = vmatmul.msk.f32.gmra.mxu2 %vm336_vm1, %v2964_v38  ;;  %3805 = vmatmul.msk.f32.gmra.mxu0 %vm336_vm1, %v3145_v1 }
 0x5cd   :  { %3781 = vmatmul.msk.f32.gmra.mxu2 %vm336_vm1, %v2965_v24  ;;  %3806 = vmatmul.msk.f32.gmra.mxu0 %vm336_vm1, %v3146_v17 }
 0x5d5   :  { %3782 = vmatmul.msk.f32.gmra.mxu2 %vm336_vm1, %v2966_v32  ;;  %3807 = vmatmul.msk.f32.gmra.mxu0 %vm336_vm1, %v3147_v2 }
 0x5dd   :  { %3783 = vmatmul.msk.f32.gmra.mxu2 %vm336_vm1, %v2967_v40  ;;  %3808 = vmatmul.msk.f32.gmra.mxu0 %vm336_vm1, %v3148_v46 }
 0x5e5   :  { %3784 = vmatmul.msk.f32.gmra.mxu2 %vm336_vm1, %v2968_v41  ;;  %3809 = vmatmul.msk.f32.gmra.mxu0 %vm336_vm1, %v3149_v4 }
 0x5f4   :  { %v2875_v36 = vpop.f32.mrf.mxu0 }
 0x5f5   :  { %v2896_v56 = vmax.f32 %v2875_v36, 0.0 }
 0x5fa   :  { %v6730_v38 = vpop.f32.mrf.mxu2 }
 0x5fb   :  { %v2715_v46 = vmax.f32 %v6730_v38, 0.0 }
 0x5fd   :  { %v2878_v1 = vpop.f32.mrf.mxu0 }
 0x5fe   :  { %v2897_v12 = vmax.f32 %v2878_v1, 0.0 }
 0x600   :  { %v3845_v48 = vpack.i.bf16 %v2897_v12, %v2896_v56 }
 0x602   :  { %3846 = vrot.lane.b32.xlu2 %v3845_v48, %s4153_s16  ;;  %v6733_v18 = vpop.f32.mrf.mxu2 }
 0x603   :  { %v2716_v36 = vmax.f32 %v6733_v18, 0.0 }
 0x605   :  { %v2881_v33 = vpop.f32.mrf.mxu0 }
 0x606   :  { %v2898_v61 = vmax.f32 %v2881_v33, 0.0 }
 0x60b   :  { %v6735_v7 = vpop.f32.mrf.mxu2 }
 0x60e   :  { %v2884_v29 = vpop.f32.mrf.mxu0 }
 0x60f   :  { %v2899_v43 = vmax.f32 %v2884_v29, 0.0  ;;  %v2717_v29 = vmax.f32 %v6735_v7, 0.0 }
 0x611   :  { %v3855_v17 = vpack.i.bf16 %v2899_v43, %v2898_v61 }
 0x614   :  { %v6737_v44 = vpop.f32.mrf.mxu2 }
 0x616   :  { %v2887_v55 = vpop.f32.mrf.mxu0 }
 0x617   :  { %v2900_v59 = vmax.f32 %v2887_v55, 0.0 }
 0x61c   :  { %v6739_v6 = vpop.f32.mrf.mxu2 }
 0x620   :  { %v2890_v25 = vpop.f32.mrf.mxu0 }
 0x621   :  { %v2901_v51 = vmax.f32 %v2890_v25, 0.0 }
 0x626   :  { %v6741_v63 = vpop.f32.mrf.mxu2 }
 0x62a   :  { %v2893_v11 = vpop.f32.mrf.mxu0 }
 0x62b   :  { %v2902_v52 = vmax.f32 %v2893_v11, 0.0 }
 0x630   :  { %v6743_v54 = vpop.f32.mrf.mxu2 }
 0x632   :  { %v3237_v62 = vpop.f32.mrf.mxu0 }
 0x633   :  { %v3258_v47 = vmax.f32 %v3237_v62, 0.0 }
 0x635   :  { %3328 = vrot.lane.b32.xlu0 %v3258_v47, %s4154_s11 }
 0x638   :  { %v3056_v9 = vpop.f32.mrf.mxu2 }
 0x639   :  { %v3077_v21 = vmax.f32 %v3056_v9, 0.0  ;;  %v2718_v9 = vmax.f32 %v6737_v44, 0.0 }
 0x63a   :  { %v3240_v24 = vpop.f32.mrf.mxu0 }
 0x63b   :  { %v3259_v8 = vmax.f32 %v3240_v24, 0.0 }
 0x63d   :  { %3856 = vrot.lane.b32.xlu0 %v3855_v17, %s4153_s16  ;;  %3330 = vrot.lane.b32.xlu2 %v3259_v8, %s4154_s11 }
 0x640   :  { %v3059_v26 = vpop.f32.mrf.mxu2 }
 0x641   :  { %v3078_v23 = vmax.f32 %v3059_v26, 0.0 }
 0x642   :  { %v3243_v19 = vpop.f32.mrf.mxu0 }
 0x643   :  { %v3850_v37 = vpack.i.bf16 %v3078_v23, %v3077_v21  ;;  %v3260_v39 = vmax.f32 %v3243_v19, 0.0  ;;  %v2719_v21 = vmax.f32 %v6739_v6, 0.0  ;;  %v2721_v6 = vmax.f32 %v6743_v54, 0.0 }
 0x645   :  { %3332 = vrot.lane.b32.xlu2 %v3260_v39, %s4154_s11  ;;  %3851 = vrot.lane.b32.xlu1 %v3850_v37, %s4155_s0 }
 0x648   :  { %v3062_v49 = vpop.f32.mrf.mxu2 }
 0x649   :  { %v3079_v50 = vmax.f32 %v3062_v49, 0.0  ;;  %v2720_v49 = vmax.f32 %v6741_v63, 0.0 }
 0x64a   :  { %v3246_v57 = vpop.f32.mrf.mxu0 }
 0x64b   :  { %v3261_v32 = vmax.f32 %v3246_v57, 0.0 }
 0x64d   :  { %3280 = vrot.lane.b32.xlu2 %v2900_v59, %s4153_s16  ;;  %3304 = vrot.lane.b32.xlu1 %v3079_v50, %s4155_s0 }
 0x650   :  { %v3065_v22 = vpop.f32.mrf.mxu2 }
 0x651   :  { %v3080_v0 = vmax.f32 %v3065_v22, 0.0 }
 0x652   :  { %v3249_v2 = vpop.f32.mrf.mxu0 }
 0x653   :  { %3306 = vrot.lane.b32.xlu0 %v3080_v0, %s4155_s0  ;;  %v3262_v20 = vmax.f32 %v3249_v2, 0.0 }
 0x655   :  { %3282 = vrot.lane.b32.xlu2 %v2901_v51, %s4153_s16  ;;  %3334 = vrot.lane.b32.xlu1 %v3261_v32, %s4154_s11 }
 0x658   :  { %v3068_v27 = vpop.f32.mrf.mxu2 }
 0x659   :  { %v3081_v42 = vmax.f32 %v3068_v27, 0.0 }
 0x65a   :  { %v3252_v35 = vpop.f32.mrf.mxu0 }
 0x65b   :  { %3308 = vrot.lane.b32.xlu0 %v3081_v42, %s4155_s0  ;;  %v3263_v60 = vmax.f32 %v3252_v35, 0.0 }
 0x65c   :  { %v3847_v28 = vpop.permute.xlu2 %3846 }
 0x65d   :  { %3284 = vrot.lane.b32.xlu2 %v2902_v52, %s4153_s16  ;;  %3336 = vrot.lane.b32.xlu1 %v3262_v20, %s4154_s11  ;;  %v3848_v53 = vunpack.i.l.bf16 %v3847_v28  ;;  %v3849_v5 = vunpack.i.h.bf16 %v3847_v28  ;;  %v4122_v52 = vld [vmem:[%s6834_s13] ss:$0 sm:$0xff] }
 0x65f   :  { %v3349_v34 = vsel %vm116_vm0, %v2715_v46, %v3848_v53  ;;  %v3350_v56 = vsel %vm116_vm0, %v2716_v36, %v3849_v5 }
 0x660   :  { %v3071_v30 = vpop.f32.mrf.mxu2 }
 0x661   :  { %v3082_v58 = vmax.f32 %v3071_v30, 0.0 }
 0x662   :  { %v3255_v3 = vpop.f32.mrf.mxu0 }
 0x663   :  { %3310 = vrot.lane.b32.xlu0 %v3082_v58, %s4155_s0  ;;  %v3264_v10 = vmax.f32 %v3255_v3, 0.0 }
 0x665   :  { %3338 = vrot.lane.b32.xlu1 %v3263_v60, %s4154_s11 }
 0x668   :  { %v3074_v45 = vpop.f32.mrf.mxu2 }
 0x669   :  { %v3083_v31 = vmax.f32 %v3074_v45, 0.0 }
 0x66b   :  { %3312 = vrot.lane.b32.xlu0 %v3083_v31, %s4155_s0 }
 0x66d   :  { %3340 = vrot.lane.b32.xlu1 %v3264_v10, %s4154_s11 }
 0x697   :  { %v3331_v41 = vpop.permute.xlu2 %3330 }
 0x69f   :  { %v3333_v55 = vpop.permute.xlu2 %3332 }
 0x6a7   :  { %v3329_v40 = vpop.permute.xlu0 %3328  ;;  %v3281_v24 = vpop.permute.xlu2 %3280 }
 0x6a8   :  { %v3353_v23 = vsel %vm116_vm0, %v2719_v21, %v3281_v24 }
 0x6af   :  { %v3857_v1 = vpop.permute.xlu0 %3856  ;;  %v3283_v37 = vpop.permute.xlu2 %3282 }
 0x6b0   :  { %v3858_v48 = vunpack.i.l.bf16 %v3857_v1  ;;  %v3859_v18 = vunpack.i.h.bf16 %v3857_v1  ;;  %v3354_v59 = vsel %vm116_vm0, %v2720_v49, %v3283_v37 }
 0x6b2   :  { %v3351_v25 = vsel %vm116_vm0, %v2717_v29, %v3858_v48  ;;  %v3352_v61 = vsel %vm116_vm0, %v2718_v9, %v3859_v18 }
 0x6b7   :  { %v3852_v13 = vpop.permute.xlu1 %3851  ;;  %v3285_v0 = vpop.permute.xlu2 %3284 }
 0x6b8   :  { %v3853_v14 = vunpack.i.l.bf16 %v3852_v13  ;;  %v3854_v4 = vunpack.i.h.bf16 %v3852_v13  ;;  %v3355_v32 = vsel %vm116_vm0, %v2721_v6, %v3285_v0 }
 0x6ba   :  { %v3356_v15 = vsel %vm1705_vm4, %v3349_v34, %v3853_v14  ;;  %v3357_v38 = vsel %vm1705_vm4, %v3350_v56, %v3854_v4 }
 0x6bb   :  { %v3363_v16 = vsel %vm1713_vm5, %v3356_v15, %v3329_v40  ;;  %v3364_v33 = vsel %vm1713_vm5, %v3357_v38, %v3331_v41 }
 0x6bc   :  { %3386 = vmatmul.f32.vlgmr.msrb.gmra.mxu1 %v3363_v16 }
 0x6bf   :  { %v3305_v12 = vpop.permute.xlu1 %3304 }
 0x6c0   :  { %v3358_v62 = vsel %vm1705_vm4, %v3351_v25, %v3305_v12 }
 0x6c1   :  { %v3365_v43 = vsel %vm1713_vm5, %v3358_v62, %v3333_v55 }
 0x6c4   :  { %3389 = vmatmul.f32.gmra.mxu1 %v3364_v33 }
 0x6c5   :  { %v3307_v11 = vpop.permute.xlu0 %3306 }
 0x6c6   :  { %v3359_v17 = vsel %vm1705_vm4, %v3352_v61, %v3307_v11 }
 0x6c7   :  { %v3335_v47 = vpop.permute.xlu1 %3334 }
 0x6c8   :  { %v3366_v7 = vsel %vm1713_vm5, %v3359_v17, %v3335_v47 }
 0x6cc   :  { %3392 = vmatmul.f32.gmra.mxu1 %v3365_v43 }
 0x6cd   :  { %v3309_v8 = vpop.permute.xlu0 %3308 }
 0x6ce   :  { %v3360_v19 = vsel %vm1705_vm4, %v3353_v23, %v3309_v8 }
 0x6cf   :  { %v3337_v26 = vpop.permute.xlu1 %3336 }
 0x6d0   :  { %v3367_v44 = vsel %vm1713_vm5, %v3360_v19, %v3337_v26 }
 0x6d4   :  { %3395 = vmatmul.f32.gmra.mxu1 %v3366_v7 }
 0x6d5   :  { %v3311_v39 = vpop.permute.xlu0 %3310 }
 0x6d6   :  { %v3361_v50 = vsel %vm1705_vm4, %v3354_v59, %v3311_v39 }
 0x6d7   :  { %v3339_v57 = vpop.permute.xlu1 %3338 }
 0x6d8   :  { %v3368_v22 = vsel %vm1713_vm5, %v3361_v50, %v3339_v57 }
 0x6dc   :  { %3398 = vmatmul.f32.gmra.mxu1 %v3367_v44 }
 0x6dd   :  { %v3313_v51 = vpop.permute.xlu0 %3312 }
 0x6de   :  { %v3362_v2 = vsel %vm1705_vm4, %v3355_v32, %v3313_v51 }
 0x6df   :  { %v3341_v27 = vpop.permute.xlu1 %3340 }
 0x6e0   :  { %v3369_v42 = vsel %vm1713_vm5, %v3362_v2, %v3341_v27 }
 0x6e4   :  { %3401 = vmatmul.f32.gmra.mxu1 %v3368_v22 }
 0x6ec   :  { %3404 = vmatmul.f32.gmra.mxu1 %v3369_v42 }
 0x739   :  { %v3387_v63 = vpop.f32.mrf.mxu1 }
 0x73a   :  { %v3388_v20 = vadd.f32 %v4122_v52, %v3387_v63 }
 0x73c   :  { %3810 = vst.msk [vmem:[%s6835_s14 + $0x38] sm:$0xff] %vm116_vm0, %v3388_v20 }
 0x741   :  { %v3390_v54 = vpop.f32.mrf.mxu1 }
 0x742   :  { %v3391_v35 = vadd.f32 %v4122_v52, %v3390_v54 }
 0x744   :  { %3811 = vst.msk [vmem:[%s6835_s14 + $0x40] sm:$0xff] %vm116_vm0, %v3391_v35 }
 0x749   :  { %v3393_v30 = vpop.f32.mrf.mxu1 }
 0x74a   :  { %v3394_v58 = vadd.f32 %v4122_v52, %v3393_v30 }
 0x74c   :  { %3812 = vst.msk [vmem:[%s6835_s14 + $0x48] sm:$0xff] %vm116_vm0, %v3394_v58 }
 0x751   :  { %v3396_v60 = vpop.f32.mrf.mxu1 }
 0x752   :  { %v3397_v3 = vadd.f32 %v4122_v52, %v3396_v60 }
 0x754   :  { %3813 = vst.msk [vmem:[%s6835_s14 + $0x50] sm:$0xff] %vm116_vm0, %v3397_v3 }
 0x759   :  { %v3399_v45 = vpop.f32.mrf.mxu1 }
 0x75a   :  { %v3400_v31 = vadd.f32 %v4122_v52, %v3399_v45 }
 0x75c   :  { %3814 = vst.msk [vmem:[%s6835_s14 + $0x58] sm:$0xff] %vm116_vm0, %v3400_v31 }
 0x761   :  { %v3402_v10 = vpop.f32.mrf.mxu1 }
 0x762   :  { %v3403_v28 = vadd.f32 %v4122_v52, %v3402_v10 }
 0x764   :  { %3815 = vst.msk [vmem:[%s6835_s14 + $0x60] sm:$0xff] %vm116_vm0, %v3403_v28 }
 0x769   :  { %v3405_v53 = vpop.f32.mrf.mxu1 }
 0x76a   :  { %v3406_v40 = vadd.f32 %v4122_v52, %v3405_v53 }
 0x76c   :  { %3816 = vst.msk [vmem:[%s6835_s14 + $0x68] sm:$0x1] %vm1768_vm6, %v3406_v40 }
 0x76d   :  { %3420 = vsyncpa [#allocation3], 1 }
 0x76e   :  { %3421 = vsyncpa [#allocation5], 1 }

</bundles_post_ra>
